<compile_context>
chip_gen: v6e
topology: v6e:2x2x1
jax: 0.10.0
libtpu: 0.0.40
codegen_flags: <defaults>
</compile_context>

<pallas_src>
import jax
import jax.numpy as jnp
from jax.experimental import pallas as pl
from jax.experimental.pallas import tpu as pltpu

H = W = 28            # spatial size fixed by fc1 = 32*28*28
WP = H + 2            # 30: padded height/width
NP = WP * WP          # 900: flattened padded spatial size
J = (H - 1) * WP + W  # 838: shifted output positions (incl. junk pad columns)
OFF0 = WP + 1         # 31: flattened offset of output (0,0) in the padded layout
C1, C2 = 16, 32       # conv channel counts fixed by the module


# ----------------------------------------------------------------------------
# Fused kernel: conv1 -> relu -> conv2 -> relu -> fc1 -> fc2 -> softmax
# One grid step per batch sample; everything stays resident in VMEM.
# ----------------------------------------------------------------------------
def _simple_cnn_kernel(x_ref, mask_ref, wc1_ref, b1_ref, wc2_ref, b2_ref,
                       wr_ref, diag_ref, b1fc_ref, w2fc_ref, out_ref,
                       taps2_ref, h1_ref):
    cin = x_ref.shape[1]
    k = b1fc_ref.shape[1]
    xp = x_ref[0]                                              # (Cin, 900) bf16

    # ---- conv1 + ReLU: taps are shifted lane-slices of the padded image -----
    a1 = None
    for kh in range(3):
        for kw in range(3):
            t = kh * 3 + kw
            off = kh * WP + kw
            d = jnp.dot(wc1_ref[:, t * cin:(t + 1) * cin],
                        xp[:, off:off + J],
                        preferred_element_type=jnp.float32)    # (16, 838)
            a1 = d if a1 is None else a1 + d
    h1 = jnp.maximum(a1 + b1_ref[...], 0.0) * mask_ref[...]    # zero junk cols

    # Repack h1 into its own zero-padded flattened (30x30) layout for conv2.
    # Zeroed every step (not just step 0): with "parallel" megacore sharding
    # each core has its own scratch and may never see program_id == 0.
    h1_ref[...] = jnp.zeros_like(h1_ref)
    h1_ref[:, OFF0:OFF0 + J] = h1.astype(h1_ref.dtype)

    # ---- conv2 + ReLU: stage all 9 taps (144, 838) then ONE MXU matmul ------
    for kh in range(3):
        for kw in range(3):
            t = kh * 3 + kw
            off = kh * WP + kw
            taps2_ref[t * C1:(t + 1) * C1, :] = h1_ref[:, off:off + J]
    a2 = jnp.dot(wc2_ref[...], taps2_ref[...],
                 preferred_element_type=jnp.float32)           # (32, 838)
    h2 = jnp.maximum(a2 + b2_ref[...], 0.0).astype(jnp.bfloat16)

    # ---- fc1 as ONE dense MXU matmul ----------------------------------------
    # q[c', c*k+o] = sum_j h2[c', j] * fc1_w[o, c, j]; only the c'==c block
    # diagonal is wanted.  Junk lanes of h2 hit zero rows of wr.
    q = jnp.dot(h2, wr_ref[...], preferred_element_type=jnp.float32)  # (32, 32k)
    v = jnp.sum(q * diag_ref[...], axis=0, keepdims=True)             # (1, 32k)
    # tree-sum the 32 contiguous groups of k lanes -> (1, k)
    g = C2
    while g > 1:
        half = g // 2
        v = v[:, :half * k] + v[:, half * k:g * k]
        g = half
    z1 = v + b1fc_ref[...]                                            # (1, k)

    # ---- fc2 (no bias) -> softmax -------------------------------------------
    z2 = jnp.dot(z1.astype(jnp.bfloat16), w2fc_ref[...],
                 preferred_element_type=jnp.float32)           # (1, C)
    m = jnp.max(z2, axis=1, keepdims=True)
    e = jnp.exp(z2 - m)
    out_ref[0] = e / jnp.sum(e, axis=1, keepdims=True)


# ----------------------------------------------------------------------------
# One-time (outside jit) repacking of the PyTorch-layout weights.
# ----------------------------------------------------------------------------
def prepare_params(params):
    cin = params["conv1_w"].shape[1]
    k = params["fc1_w"].shape[0]

    # conv weights -> (Cout, 9*Cin), column order (kh, kw, cin) to match taps
    wc1 = jnp.transpose(params["conv1_w"], (0, 2, 3, 1)).reshape(C1, 9 * cin)
    wc2 = jnp.transpose(params["conv2_w"], (0, 2, 3, 1)).reshape(C2, 9 * C1)

    # fc1 weight (k, 32*28*28), torch NCHW-flatten order -> block-column layout
    #   wr[j, c*k + o] = fc1_w[o, c*784 + h*28 + w]  with j = h*30 + w,
    # zero rows at junk lanes (j % 30 >= 28).
    w1 = params["fc1_w"].reshape(k, C2, H, W)
    w1 = jnp.transpose(w1, (2, 3, 1, 0)).reshape(H * W, C2, k)     # (784, 32, k)
    j_idx = (jnp.arange(H)[:, None] * WP + jnp.arange(W)[None, :]).reshape(-1)
    wr = jnp.zeros((J, C2, k), jnp.float32).at[j_idx].set(w1)
    wr = wr.reshape(J, C2 * k)

    # block-diagonal selector: diag[c, c*k:(c+1)*k] = 1
    diag = (jnp.arange(C2 * k)[None, :] // k == jnp.arange(C2)[:, None])

    # valid-column mask for the 838-lane conv output layout
    mask1 = ((jnp.arange(J) % WP) < W).astype(jnp.float32).reshape(1, J)

    return {
        "wc1": wc1.astype(jnp.bfloat16),
        "b1": params["conv1_b"].reshape(C1, 1).astype(jnp.float32),
        "wc2": wc2.astype(jnp.bfloat16),
        "b2": params["conv2_b"].reshape(C2, 1).astype(jnp.float32),
        "wr": wr.astype(jnp.bfloat16),
        "diag": diag.astype(jnp.float32),
        "b1fc": params["fc1_b"].reshape(1, k).astype(jnp.float32),
        "w2fc": params["fc2_w"].T.astype(jnp.bfloat16),            # (k, C)
        "mask1": mask1,
    }


# ----------------------------------------------------------------------------
# Full forward pass (equivalent to SimpleCNN.forward).
# ----------------------------------------------------------------------------
def simple_cnn_forward(x_nchw, prep):
    B, cin, hh, ww = x_nchw.shape
    assert (hh, ww) == (H, W), "fc1 hard-codes 32*28*28 input features"
    k = prep["b1fc"].shape[1]
    c_out = prep["w2fc"].shape[1]

    # NCHW already has channels leading -> pad + flatten spatial (lane dense).
    xp = jnp.pad(x_nchw, ((0, 0), (0, 0), (1, 1), (1, 1)))
    xp = xp.reshape(B, cin, NP).astype(jnp.bfloat16)

    out = pl.pallas_call(
        _simple_cnn_kernel,
        out_shape=jax.ShapeDtypeStruct((B, 1, c_out), jnp.float32),
        grid=(B,),
        in_specs=[
            pl.BlockSpec((1, cin, NP), lambda b: (b, 0, 0)),       # x (per sample)
            pl.BlockSpec((1, J), lambda b: (0, 0)),                # valid-col mask
            pl.BlockSpec((C1, 9 * cin), lambda b: (0, 0)),         # conv1 w
            pl.BlockSpec((C1, 1), lambda b: (0, 0)),               # conv1 b
            pl.BlockSpec((C2, 9 * C1), lambda b: (0, 0)),          # conv2 w
            pl.BlockSpec((C2, 1), lambda b: (0, 0)),               # conv2 b
            pl.BlockSpec((J, C2 * k), lambda b: (0, 0)),           # fc1 w (packed)
            pl.BlockSpec((C2, C2 * k), lambda b: (0, 0)),          # block-diag mask
            pl.BlockSpec((1, k), lambda b: (0, 0)),                # fc1 b
            pl.BlockSpec((k, c_out), lambda b: (0, 0)),            # fc2 w
        ],
        out_specs=pl.BlockSpec((1, 1, c_out), lambda b: (b, 0, 0)),
        scratch_shapes=[
            pltpu.VMEM((9 * C1, J), jnp.bfloat16),   # conv2 tap matrix (144, 838)
            pltpu.VMEM((C1, NP), jnp.bfloat16),      # zero-padded flattened h1
        ],
        compiler_params=pltpu.CompilerParams(
            dimension_semantics=("parallel",),
        ),
    )(xp, prep["mask1"], prep["wc1"], prep["b1"], prep["wc2"], prep["b2"],
      prep["wr"], prep["diag"], prep["b1fc"], prep["w2fc"])
    return out.reshape(B, c_out)


# ----------------------------------------------------------------------------
# Pure-JAX reference (matches the PyTorch module) and setup.
# ----------------------------------------------------------------------------
def reference_forward(x, params):
    dn = ("NCHW", "OIHW", "NCHW")
    h = jax.lax.conv_general_dilated(x, params["conv1_w"], (1, 1), "SAME",
                                     dimension_numbers=dn)
    h = jax.nn.relu(h + params["conv1_b"][None, :, None, None])
    h = jax.lax.conv_general_dilated(h, params["conv2_w"], (1, 1), "SAME",
                                     dimension_numbers=dn)
    h = jax.nn.relu(h + params["conv2_b"][None, :, None, None])
    flat = h.reshape(x.shape[0], -1)
    z = flat @ params["fc1_w"].T + params["fc1_b"]
    z = z @ params["fc2_w"].T
    return jax.nn.softmax(z, axis=1)


def init_params(key, input_channels, output_channels, k):
    ks = jax.random.split(key, 7)
    feat = C2 * H * W
    return {
        "conv1_w": 0.05 * jax.random.normal(ks[0], (C1, input_channels, 3, 3), jnp.float32),
        "conv1_b": 0.05 * jax.random.normal(ks[1], (C1,), jnp.float32),
        "conv2_w": 0.05 * jax.random.normal(ks[2], (C2, C1, 3, 3), jnp.float32),
        "conv2_b": 0.05 * jax.random.normal(ks[3], (C2,), jnp.float32),
        "fc1_w": 0.01 * jax.random.normal(ks[4], (k, feat), jnp.float32),
        "fc1_b": 0.01 * jax.random.normal(ks[5], (k,), jnp.float32),
        "fc2_w": 0.05 * jax.random.normal(ks[6], (output_channels, k), jnp.float32),
    }


if __name__ == "__main__":
    # fc1 hard-codes 32*28*28 input features, so spatial size must be 28x28.
    B, Cin = 2, 3
    output_channels, k = 10, 32

    key = jax.random.PRNGKey(0)
    kx, kp = jax.random.split(key)
    x = jax.random.normal(kx, (B, Cin, H, W), jnp.float32)
    params = init_params(kp, Cin, output_channels, k)

    prep = prepare_params(params)          # one-time weight repack, outside jit

    fwd = jax.jit(simple_cnn_forward)
    probs = jax.block_until_ready(fwd(x, prep))

    assert probs.shape == (B, output_channels)
    assert bool(jnp.all(jnp.isfinite(probs)))
    assert bool(jnp.allclose(jnp.sum(probs, axis=1), 1.0, atol=1e-5))

    ref = jax.block_until_ready(jax.jit(reference_forward)(x, params))
    assert bool(jnp.allclose(probs, ref, atol=3e-2)), (
        "max abs diff %.4g" % float(jnp.max(jnp.abs(probs - ref))))

    print("KERNEL_OK")
</pallas_src>

<mosaic_0001>
module attributes {stable_mosaic.version = 11 : i64} {
  func.func @_simple_cnn_kernel(%arg0: i32, %arg1: memref<1x3x900xbf16, #tpu.memory_space<vmem>>, %arg2: memref<1x838xf32, #tpu.memory_space<vmem>>, %arg3: memref<16x27xbf16, #tpu.memory_space<vmem>>, %arg4: memref<16x1xf32, #tpu.memory_space<vmem>>, %arg5: memref<32x144xbf16, #tpu.memory_space<vmem>>, %arg6: memref<32x1xf32, #tpu.memory_space<vmem>>, %arg7: memref<838x1024xbf16, #tpu.memory_space<vmem>>, %arg8: memref<32x1024xf32, #tpu.memory_space<vmem>>, %arg9: memref<1x32xf32, #tpu.memory_space<vmem>>, %arg10: memref<32x10xbf16, #tpu.memory_space<vmem>>, %arg11: memref<1x1x10xf32, #tpu.memory_space<vmem>>, %arg12: memref<144x838xbf16, #tpu.memory_space<vmem>>, %arg13: memref<16x900xbf16, #tpu.memory_space<vmem>>) attributes {dimension_semantics = [#tpu.dimension_semantics<parallel>], iteration_bounds = array<i64: 2>, scalar_prefetch = 0 : i64, scratch_operands = 2 : i64, tpu.core_type = #tpu.core_type<tc>, window_params = [{transform_indices = @transform_0, window_bounds = array<i64: 1, 3, 900>}, {pipeline_mode = #tpu.pipeline_mode<synchronous>, transform_indices = @transform_1, window_bounds = array<i64: 1, 838>}, {pipeline_mode = #tpu.pipeline_mode<synchronous>, transform_indices = @transform_2, window_bounds = array<i64: 16, 27>}, {pipeline_mode = #tpu.pipeline_mode<synchronous>, transform_indices = @transform_3, window_bounds = array<i64: 16, 1>}, {pipeline_mode = #tpu.pipeline_mode<synchronous>, transform_indices = @transform_4, window_bounds = array<i64: 32, 144>}, {pipeline_mode = #tpu.pipeline_mode<synchronous>, transform_indices = @transform_5, window_bounds = array<i64: 32, 1>}, {pipeline_mode = #tpu.pipeline_mode<synchronous>, transform_indices = @transform_6, window_bounds = array<i64: 838, 1024>}, {pipeline_mode = #tpu.pipeline_mode<synchronous>, transform_indices = @transform_7, window_bounds = array<i64: 32, 1024>}, {pipeline_mode = #tpu.pipeline_mode<synchronous>, transform_indices = @transform_8, window_bounds = array<i64: 1, 32>}, {pipeline_mode = #tpu.pipeline_mode<synchronous>, transform_indices = @transform_9, window_bounds = array<i64: 32, 10>}, {transform_indices = @transform_10, window_bounds = array<i64: 1, 1, 10>}]} {
    %c0 = arith.constant 0 : index
    %c0_0 = arith.constant 0 : index
    %c0_1 = arith.constant 0 : index
    %0 = vector.load %arg1[%c0, %c0_0, %c0_1] : memref<1x3x900xbf16, #tpu.memory_space<vmem>>, vector<1x3x900xbf16>
    %1 = vector.shape_cast %0 : vector<1x3x900xbf16> to vector<3x900xbf16>
    %c0_2 = arith.constant 0 : index
    %c0_3 = arith.constant 0 : index
    %2 = vector.load %arg3[%c0_2, %c0_3] : memref<16x27xbf16, #tpu.memory_space<vmem>>, vector<16x3xbf16>
    %3 = vector.extract_strided_slice %1 {offsets = [0, 0], sizes = [3, 838], strides = [1, 1]} : vector<3x900xbf16> to vector<3x838xbf16>
    %cst = arith.constant dense<0.000000e+00> : vector<16x838xf32>
    %4 = tpu.matmul %2, %3, %cst {dimension_numbers = #tpu.dot_dimension_numbers<[1], [0], [0], [1], [0, 0, 1, 1], [], []>} : vector<16x3xbf16>, vector<3x838xbf16>, vector<16x838xf32> -> vector<16x838xf32>
    %c0_4 = arith.constant 0 : index
    %c3 = arith.constant 3 : index
    %5 = vector.load %arg3[%c0_4, %c3] : memref<16x27xbf16, #tpu.memory_space<vmem>>, vector<16x3xbf16>
    %6 = vector.extract_strided_slice %1 {offsets = [0, 1], sizes = [3, 838], strides = [1, 1]} : vector<3x900xbf16> to vector<3x838xbf16>
    %cst_5 = arith.constant dense<0.000000e+00> : vector<16x838xf32>
    %7 = tpu.matmul %5, %6, %cst_5 {dimension_numbers = #tpu.dot_dimension_numbers<[1], [0], [0], [1], [0, 0, 1, 1], [], []>} : vector<16x3xbf16>, vector<3x838xbf16>, vector<16x838xf32> -> vector<16x838xf32>
    %8 = arith.addf %4, %7 : vector<16x838xf32>
    %c0_6 = arith.constant 0 : index
    %c6 = arith.constant 6 : index
    %9 = vector.load %arg3[%c0_6, %c6] : memref<16x27xbf16, #tpu.memory_space<vmem>>, vector<16x3xbf16>
    %10 = vector.extract_strided_slice %1 {offsets = [0, 2], sizes = [3, 838], strides = [1, 1]} : vector<3x900xbf16> to vector<3x838xbf16>
    %cst_7 = arith.constant dense<0.000000e+00> : vector<16x838xf32>
    %11 = tpu.matmul %9, %10, %cst_7 {dimension_numbers = #tpu.dot_dimension_numbers<[1], [0], [0], [1], [0, 0, 1, 1], [], []>} : vector<16x3xbf16>, vector<3x838xbf16>, vector<16x838xf32> -> vector<16x838xf32>
    %12 = arith.addf %8, %11 : vector<16x838xf32>
    %c0_8 = arith.constant 0 : index
    %c9 = arith.constant 9 : index
    %13 = vector.load %arg3[%c0_8, %c9] : memref<16x27xbf16, #tpu.memory_space<vmem>>, vector<16x3xbf16>
    %14 = vector.extract_strided_slice %1 {offsets = [0, 30], sizes = [3, 838], strides = [1, 1]} : vector<3x900xbf16> to vector<3x838xbf16>
    %cst_9 = arith.constant dense<0.000000e+00> : vector<16x838xf32>
    %15 = tpu.matmul %13, %14, %cst_9 {dimension_numbers = #tpu.dot_dimension_numbers<[1], [0], [0], [1], [0, 0, 1, 1], [], []>} : vector<16x3xbf16>, vector<3x838xbf16>, vector<16x838xf32> -> vector<16x838xf32>
    %16 = arith.addf %12, %15 : vector<16x838xf32>
    %c0_10 = arith.constant 0 : index
    %c12 = arith.constant 12 : index
    %17 = vector.load %arg3[%c0_10, %c12] : memref<16x27xbf16, #tpu.memory_space<vmem>>, vector<16x3xbf16>
    %18 = vector.extract_strided_slice %1 {offsets = [0, 31], sizes = [3, 838], strides = [1, 1]} : vector<3x900xbf16> to vector<3x838xbf16>
    %cst_11 = arith.constant dense<0.000000e+00> : vector<16x838xf32>
    %19 = tpu.matmul %17, %18, %cst_11 {dimension_numbers = #tpu.dot_dimension_numbers<[1], [0], [0], [1], [0, 0, 1, 1], [], []>} : vector<16x3xbf16>, vector<3x838xbf16>, vector<16x838xf32> -> vector<16x838xf32>
    %20 = arith.addf %16, %19 : vector<16x838xf32>
    %c0_12 = arith.constant 0 : index
    %c15 = arith.constant 15 : index
    %21 = vector.load %arg3[%c0_12, %c15] : memref<16x27xbf16, #tpu.memory_space<vmem>>, vector<16x3xbf16>
    %22 = vector.extract_strided_slice %1 {offsets = [0, 32], sizes = [3, 838], strides = [1, 1]} : vector<3x900xbf16> to vector<3x838xbf16>
    %cst_13 = arith.constant dense<0.000000e+00> : vector<16x838xf32>
    %23 = tpu.matmul %21, %22, %cst_13 {dimension_numbers = #tpu.dot_dimension_numbers<[1], [0], [0], [1], [0, 0, 1, 1], [], []>} : vector<16x3xbf16>, vector<3x838xbf16>, vector<16x838xf32> -> vector<16x838xf32>
    %24 = arith.addf %20, %23 : vector<16x838xf32>
    %c0_14 = arith.constant 0 : index
    %c18 = arith.constant 18 : index
    %25 = vector.load %arg3[%c0_14, %c18] : memref<16x27xbf16, #tpu.memory_space<vmem>>, vector<16x3xbf16>
    %26 = vector.extract_strided_slice %1 {offsets = [0, 60], sizes = [3, 838], strides = [1, 1]} : vector<3x900xbf16> to vector<3x838xbf16>
    %cst_15 = arith.constant dense<0.000000e+00> : vector<16x838xf32>
    %27 = tpu.matmul %25, %26, %cst_15 {dimension_numbers = #tpu.dot_dimension_numbers<[1], [0], [0], [1], [0, 0, 1, 1], [], []>} : vector<16x3xbf16>, vector<3x838xbf16>, vector<16x838xf32> -> vector<16x838xf32>
    %28 = arith.addf %24, %27 : vector<16x838xf32>
    %c0_16 = arith.constant 0 : index
    %c21 = arith.constant 21 : index
    %29 = vector.load %arg3[%c0_16, %c21] : memref<16x27xbf16, #tpu.memory_space<vmem>>, vector<16x3xbf16>
    %30 = vector.extract_strided_slice %1 {offsets = [0, 61], sizes = [3, 838], strides = [1, 1]} : vector<3x900xbf16> to vector<3x838xbf16>
    %cst_17 = arith.constant dense<0.000000e+00> : vector<16x838xf32>
    %31 = tpu.matmul %29, %30, %cst_17 {dimension_numbers = #tpu.dot_dimension_numbers<[1], [0], [0], [1], [0, 0, 1, 1], [], []>} : vector<16x3xbf16>, vector<3x838xbf16>, vector<16x838xf32> -> vector<16x838xf32>
    %32 = arith.addf %28, %31 : vector<16x838xf32>
    %c0_18 = arith.constant 0 : index
    %c24 = arith.constant 24 : index
    %33 = vector.load %arg3[%c0_18, %c24] : memref<16x27xbf16, #tpu.memory_space<vmem>>, vector<16x3xbf16>
    %34 = vector.extract_strided_slice %1 {offsets = [0, 62], sizes = [3, 838], strides = [1, 1]} : vector<3x900xbf16> to vector<3x838xbf16>
    %cst_19 = arith.constant dense<0.000000e+00> : vector<16x838xf32>
    %35 = tpu.matmul %33, %34, %cst_19 {dimension_numbers = #tpu.dot_dimension_numbers<[1], [0], [0], [1], [0, 0, 1, 1], [], []>} : vector<16x3xbf16>, vector<3x838xbf16>, vector<16x838xf32> -> vector<16x838xf32>
    %36 = arith.addf %32, %35 : vector<16x838xf32>
    %c0_20 = arith.constant 0 : index
    %c0_21 = arith.constant 0 : index
    %37 = vector.load %arg4[%c0_20, %c0_21] : memref<16x1xf32, #tpu.memory_space<vmem>>, vector<16x1xf32>
    %38 = vector.broadcast %37 : vector<16x1xf32> to vector<16x838xf32>
    %39 = arith.addf %36, %38 : vector<16x838xf32>
    %cst_22 = arith.constant 0.000000e+00 : f32
    %40 = vector.broadcast %cst_22 : f32 to vector<16x838xf32>
    %41 = arith.maximumf %39, %40 : vector<16x838xf32>
    %c0_23 = arith.constant 0 : index
    %c0_24 = arith.constant 0 : index
    %42 = vector.load %arg2[%c0_23, %c0_24] : memref<1x838xf32, #tpu.memory_space<vmem>>, vector<1x838xf32>
    %43 = vector.broadcast %42 : vector<1x838xf32> to vector<16x838xf32>
    %44 = arith.mulf %41, %43 : vector<16x838xf32>
    %cst_25 = arith.constant 0.000000e+00 : bf16
    %45 = vector.broadcast %cst_25 : bf16 to vector<16x900xbf16>
    %c0_26 = arith.constant 0 : index
    %c0_27 = arith.constant 0 : index
    %46 = vector.load %arg13[%c0_26, %c0_27] : memref<16x900xbf16, #tpu.memory_space<vmem>>, vector<16x900xbf16>
    tpu.vector_store %arg13[%c0_26, %c0_27], %45 {strides = array<i32>} : memref<16x900xbf16, #tpu.memory_space<vmem>>, vector<16x900xbf16>,
    %47 = arith.truncf %44 : vector<16x838xf32> to vector<16x838xbf16>
    %c0_28 = arith.constant 0 : index
    %c31 = arith.constant 31 : index
    %48 = vector.load %arg13[%c0_28, %c31] : memref<16x900xbf16, #tpu.memory_space<vmem>>, vector<16x838xbf16>
    tpu.vector_store %arg13[%c0_28, %c31], %47 {strides = array<i32>} : memref<16x900xbf16, #tpu.memory_space<vmem>>, vector<16x838xbf16>,
    %c0_29 = arith.constant 0 : index
    %c0_30 = arith.constant 0 : index
    %49 = vector.load %arg13[%c0_29, %c0_30] : memref<16x900xbf16, #tpu.memory_space<vmem>>, vector<16x838xbf16>
    %c0_31 = arith.constant 0 : index
    %c0_32 = arith.constant 0 : index
    %50 = vector.load %arg12[%c0_31, %c0_32] : memref<144x838xbf16, #tpu.memory_space<vmem>>, vector<16x838xbf16>
    tpu.vector_store %arg12[%c0_31, %c0_32], %49 {strides = array<i32>} : memref<144x838xbf16, #tpu.memory_space<vmem>>, vector<16x838xbf16>,
    %c0_33 = arith.constant 0 : index
    %c1 = arith.constant 1 : index
    %51 = vector.load %arg13[%c0_33, %c1] : memref<16x900xbf16, #tpu.memory_space<vmem>>, vector<16x838xbf16>
    %c16 = arith.constant 16 : index
    %c0_34 = arith.constant 0 : index
    %52 = vector.load %arg12[%c16, %c0_34] : memref<144x838xbf16, #tpu.memory_space<vmem>>, vector<16x838xbf16>
    tpu.vector_store %arg12[%c16, %c0_34], %51 {strides = array<i32>} : memref<144x838xbf16, #tpu.memory_space<vmem>>, vector<16x838xbf16>,
    %c0_35 = arith.constant 0 : index
    %c2 = arith.constant 2 : index
    %53 = vector.load %arg13[%c0_35, %c2] : memref<16x900xbf16, #tpu.memory_space<vmem>>, vector<16x838xbf16>
    %c32 = arith.constant 32 : index
    %c0_36 = arith.constant 0 : index
    %54 = vector.load %arg12[%c32, %c0_36] : memref<144x838xbf16, #tpu.memory_space<vmem>>, vector<16x838xbf16>
    tpu.vector_store %arg12[%c32, %c0_36], %53 {strides = array<i32>} : memref<144x838xbf16, #tpu.memory_space<vmem>>, vector<16x838xbf16>,
    %c0_37 = arith.constant 0 : index
    %c30 = arith.constant 30 : index
    %55 = vector.load %arg13[%c0_37, %c30] : memref<16x900xbf16, #tpu.memory_space<vmem>>, vector<16x838xbf16>
    %c48 = arith.constant 48 : index
    %c0_38 = arith.constant 0 : index
    %56 = vector.load %arg12[%c48, %c0_38] : memref<144x838xbf16, #tpu.memory_space<vmem>>, vector<16x838xbf16>
    tpu.vector_store %arg12[%c48, %c0_38], %55 {strides = array<i32>} : memref<144x838xbf16, #tpu.memory_space<vmem>>, vector<16x838xbf16>,
    %c0_39 = arith.constant 0 : index
    %c31_40 = arith.constant 31 : index
    %57 = vector.load %arg13[%c0_39, %c31_40] : memref<16x900xbf16, #tpu.memory_space<vmem>>, vector<16x838xbf16>
    %c64 = arith.constant 64 : index
    %c0_41 = arith.constant 0 : index
    %58 = vector.load %arg12[%c64, %c0_41] : memref<144x838xbf16, #tpu.memory_space<vmem>>, vector<16x838xbf16>
    tpu.vector_store %arg12[%c64, %c0_41], %57 {strides = array<i32>} : memref<144x838xbf16, #tpu.memory_space<vmem>>, vector<16x838xbf16>,
    %c0_42 = arith.constant 0 : index
    %c32_43 = arith.constant 32 : index
    %59 = vector.load %arg13[%c0_42, %c32_43] : memref<16x900xbf16, #tpu.memory_space<vmem>>, vector<16x838xbf16>
    %c80 = arith.constant 80 : index
    %c0_44 = arith.constant 0 : index
    %60 = vector.load %arg12[%c80, %c0_44] : memref<144x838xbf16, #tpu.memory_space<vmem>>, vector<16x838xbf16>
    tpu.vector_store %arg12[%c80, %c0_44], %59 {strides = array<i32>} : memref<144x838xbf16, #tpu.memory_space<vmem>>, vector<16x838xbf16>,
    %c0_45 = arith.constant 0 : index
    %c60 = arith.constant 60 : index
    %61 = vector.load %arg13[%c0_45, %c60] : memref<16x900xbf16, #tpu.memory_space<vmem>>, vector<16x838xbf16>
    %c96 = arith.constant 96 : index
    %c0_46 = arith.constant 0 : index
    %62 = vector.load %arg12[%c96, %c0_46] : memref<144x838xbf16, #tpu.memory_space<vmem>>, vector<16x838xbf16>
    tpu.vector_store %arg12[%c96, %c0_46], %61 {strides = array<i32>} : memref<144x838xbf16, #tpu.memory_space<vmem>>, vector<16x838xbf16>,
    %c0_47 = arith.constant 0 : index
    %c61 = arith.constant 61 : index
    %63 = vector.load %arg13[%c0_47, %c61] : memref<16x900xbf16, #tpu.memory_space<vmem>>, vector<16x838xbf16>
    %c112 = arith.constant 112 : index
    %c0_48 = arith.constant 0 : index
    %64 = vector.load %arg12[%c112, %c0_48] : memref<144x838xbf16, #tpu.memory_space<vmem>>, vector<16x838xbf16>
    tpu.vector_store %arg12[%c112, %c0_48], %63 {strides = array<i32>} : memref<144x838xbf16, #tpu.memory_space<vmem>>, vector<16x838xbf16>,
    %c0_49 = arith.constant 0 : index
    %c62 = arith.constant 62 : index
    %65 = vector.load %arg13[%c0_49, %c62] : memref<16x900xbf16, #tpu.memory_space<vmem>>, vector<16x838xbf16>
    %c128 = arith.constant 128 : index
    %c0_50 = arith.constant 0 : index
    %66 = vector.load %arg12[%c128, %c0_50] : memref<144x838xbf16, #tpu.memory_space<vmem>>, vector<16x838xbf16>
    tpu.vector_store %arg12[%c128, %c0_50], %65 {strides = array<i32>} : memref<144x838xbf16, #tpu.memory_space<vmem>>, vector<16x838xbf16>,
    %c0_51 = arith.constant 0 : index
    %c0_52 = arith.constant 0 : index
    %67 = vector.load %arg5[%c0_51, %c0_52] : memref<32x144xbf16, #tpu.memory_space<vmem>>, vector<32x144xbf16>
    %c0_53 = arith.constant 0 : index
    %c0_54 = arith.constant 0 : index
    %68 = vector.load %arg12[%c0_53, %c0_54] : memref<144x838xbf16, #tpu.memory_space<vmem>>, vector<144x838xbf16>
    %cst_55 = arith.constant dense<0.000000e+00> : vector<32x838xf32>
    %69 = tpu.matmul %67, %68, %cst_55 {dimension_numbers = #tpu.dot_dimension_numbers<[1], [0], [0], [1], [0, 0, 1, 1], [], []>} : vector<32x144xbf16>, vector<144x838xbf16>, vector<32x838xf32> -> vector<32x838xf32>
    %c0_56 = arith.constant 0 : index
    %c0_57 = arith.constant 0 : index
    %70 = vector.load %arg6[%c0_56, %c0_57] : memref<32x1xf32, #tpu.memory_space<vmem>>, vector<32x1xf32>
    %71 = vector.broadcast %70 : vector<32x1xf32> to vector<32x838xf32>
    %72 = arith.addf %69, %71 : vector<32x838xf32>
    %cst_58 = arith.constant 0.000000e+00 : f32
    %73 = vector.broadcast %cst_58 : f32 to vector<32x838xf32>
    %74 = arith.maximumf %72, %73 : vector<32x838xf32>
    %75 = arith.truncf %74 : vector<32x838xf32> to vector<32x838xbf16>
    %c0_59 = arith.constant 0 : index
    %c0_60 = arith.constant 0 : index
    %76 = vector.load %arg7[%c0_59, %c0_60] : memref<838x1024xbf16, #tpu.memory_space<vmem>>, vector<838x1024xbf16>
    %cst_61 = arith.constant dense<0.000000e+00> : vector<32x1024xf32>
    %77 = tpu.matmul %75, %76, %cst_61 {dimension_numbers = #tpu.dot_dimension_numbers<[1], [0], [0], [1], [0, 0, 1, 1], [], []>} : vector<32x838xbf16>, vector<838x1024xbf16>, vector<32x1024xf32> -> vector<32x1024xf32>
    %c0_62 = arith.constant 0 : index
    %c0_63 = arith.constant 0 : index
    %78 = vector.load %arg8[%c0_62, %c0_63] : memref<32x1024xf32, #tpu.memory_space<vmem>>, vector<32x1024xf32>
    %79 = arith.mulf %77, %78 : vector<32x1024xf32>
    %cst_64 = arith.constant dense<0.000000e+00> : vector<1024xf32>
    %80 = vector.multi_reduction <add>, %79, %cst_64 [0] : vector<32x1024xf32> to vector<1024xf32>
    %81 = vector.shape_cast %80 : vector<1024xf32> to vector<1x1024xf32>
    %82 = vector.extract_strided_slice %81 {offsets = [0, 0], sizes = [1, 512], strides = [1, 1]} : vector<1x1024xf32> to vector<1x512xf32>
    %83 = vector.extract_strided_slice %81 {offsets = [0, 512], sizes = [1, 512], strides = [1, 1]} : vector<1x1024xf32> to vector<1x512xf32>
    %84 = arith.addf %82, %83 : vector<1x512xf32>
    %85 = vector.extract_strided_slice %84 {offsets = [0, 0], sizes = [1, 256], strides = [1, 1]} : vector<1x512xf32> to vector<1x256xf32>
    %86 = vector.extract_strided_slice %84 {offsets = [0, 256], sizes = [1, 256], strides = [1, 1]} : vector<1x512xf32> to vector<1x256xf32>
    %87 = arith.addf %85, %86 : vector<1x256xf32>
    %88 = vector.extract_strided_slice %87 {offsets = [0, 0], sizes = [1, 128], strides = [1, 1]} : vector<1x256xf32> to vector<1x128xf32>
    %89 = vector.extract_strided_slice %87 {offsets = [0, 128], sizes = [1, 128], strides = [1, 1]} : vector<1x256xf32> to vector<1x128xf32>
    %90 = arith.addf %88, %89 : vector<1x128xf32>
    %91 = vector.extract_strided_slice %90 {offsets = [0, 0], sizes = [1, 64], strides = [1, 1]} : vector<1x128xf32> to vector<1x64xf32>
    %92 = vector.extract_strided_slice %90 {offsets = [0, 64], sizes = [1, 64], strides = [1, 1]} : vector<1x128xf32> to vector<1x64xf32>
    %93 = arith.addf %91, %92 : vector<1x64xf32>
    %94 = vector.extract_strided_slice %93 {offsets = [0, 0], sizes = [1, 32], strides = [1, 1]} : vector<1x64xf32> to vector<1x32xf32>
    %95 = vector.extract_strided_slice %93 {offsets = [0, 32], sizes = [1, 32], strides = [1, 1]} : vector<1x64xf32> to vector<1x32xf32>
    %96 = arith.addf %94, %95 : vector<1x32xf32>
    %c0_65 = arith.constant 0 : index
    %c0_66 = arith.constant 0 : index
    %97 = vector.load %arg9[%c0_65, %c0_66] : memref<1x32xf32, #tpu.memory_space<vmem>>, vector<1x32xf32>
    %98 = arith.addf %96, %97 : vector<1x32xf32>
    %99 = arith.truncf %98 : vector<1x32xf32> to vector<1x32xbf16>
    %c0_67 = arith.constant 0 : index
    %c0_68 = arith.constant 0 : index
    %100 = vector.load %arg10[%c0_67, %c0_68] : memref<32x10xbf16, #tpu.memory_space<vmem>>, vector<32x10xbf16>
    %cst_69 = arith.constant dense<0.000000e+00> : vector<1x10xf32>
    %101 = tpu.matmul %99, %100, %cst_69 {dimension_numbers = #tpu.dot_dimension_numbers<[1], [0], [0], [1], [0, 0, 1, 1], [], []>} : vector<1x32xbf16>, vector<32x10xbf16>, vector<1x10xf32> -> vector<1x10xf32>
    %cst_70 = arith.constant dense<0xFF800000> : vector<1xf32>
    %102 = vector.multi_reduction <maximumf>, %101, %cst_70 [1] : vector<1x10xf32> to vector<1xf32>
    %103 = vector.shape_cast %102 : vector<1xf32> to vector<1x1xf32>
    %104 = vector.broadcast %103 : vector<1x1xf32> to vector<1x10xf32>
    %105 = arith.subf %101, %104 : vector<1x10xf32>
    %106 = math.exp %105 : vector<1x10xf32>
    %cst_71 = arith.constant dense<0.000000e+00> : vector<1xf32>
    %107 = vector.multi_reduction <add>, %106, %cst_71 [1] : vector<1x10xf32> to vector<1xf32>
    %108 = vector.shape_cast %107 : vector<1xf32> to vector<1x1xf32>
    %109 = vector.broadcast %108 : vector<1x1xf32> to vector<1x10xf32>
    %110 = arith.divf %106, %109 : vector<1x10xf32>
    %c0_72 = arith.constant 0 : index
    %c0_73 = arith.constant 0 : index
    %c0_74 = arith.constant 0 : index
    %111 = vector.load %arg11[%c0_72, %c0_73, %c0_74] : memref<1x1x10xf32, #tpu.memory_space<vmem>>, vector<1x1x10xf32>
    %112 = vector.shape_cast %111 : vector<1x1x10xf32> to vector<1x10xf32>
    %113 = vector.shape_cast %110 : vector<1x10xf32> to vector<1x1x10xf32>
    tpu.vector_store %arg11[%c0_72, %c0_73, %c0_74], %113 {strides = array<i32>} : memref<1x1x10xf32, #tpu.memory_space<vmem>>, vector<1x1x10xf32>,
    return
  }
  func.func @transform_0(%arg0: i32) -> (i32, i32, i32) {
    %c0_i32 = arith.constant 0 : i32
    %c0_i32_0 = arith.constant 0 : i32
    %c0_i32_1 = arith.constant 0 : i32
    return %arg0, %c0_i32, %c0_i32_0 : i32, i32, i32
  }
  func.func @transform_1(%arg0: i32) -> (i32, i32) {
    %c0_i32 = arith.constant 0 : i32
    %c0_i32_0 = arith.constant 0 : i32
    %c0_i32_1 = arith.constant 0 : i32
    return %c0_i32, %c0_i32_0 : i32, i32
  }
  func.func @transform_2(%arg0: i32) -> (i32, i32) {
    %c0_i32 = arith.constant 0 : i32
    %c0_i32_0 = arith.constant 0 : i32
    %c0_i32_1 = arith.constant 0 : i32
    return %c0_i32, %c0_i32_0 : i32, i32
  }
  func.func @transform_3(%arg0: i32) -> (i32, i32) {
    %c0_i32 = arith.constant 0 : i32
    %c0_i32_0 = arith.constant 0 : i32
    %c0_i32_1 = arith.constant 0 : i32
    return %c0_i32, %c0_i32_0 : i32, i32
  }
  func.func @transform_4(%arg0: i32) -> (i32, i32) {
    %c0_i32 = arith.constant 0 : i32
    %c0_i32_0 = arith.constant 0 : i32
    %c0_i32_1 = arith.constant 0 : i32
    return %c0_i32, %c0_i32_0 : i32, i32
  }
  func.func @transform_5(%arg0: i32) -> (i32, i32) {
    %c0_i32 = arith.constant 0 : i32
    %c0_i32_0 = arith.constant 0 : i32
    %c0_i32_1 = arith.constant 0 : i32
    return %c0_i32, %c0_i32_0 : i32, i32
  }
  func.func @transform_6(%arg0: i32) -> (i32, i32) {
    %c0_i32 = arith.constant 0 : i32
    %c0_i32_0 = arith.constant 0 : i32
    %c0_i32_1 = arith.constant 0 : i32
    return %c0_i32, %c0_i32_0 : i32, i32
  }
  func.func @transform_7(%arg0: i32) -> (i32, i32) {
    %c0_i32 = arith.constant 0 : i32
    %c0_i32_0 = arith.constant 0 : i32
    %c0_i32_1 = arith.constant 0 : i32
    return %c0_i32, %c0_i32_0 : i32, i32
  }
  func.func @transform_8(%arg0: i32) -> (i32, i32) {
    %c0_i32 = arith.constant 0 : i32
    %c0_i32_0 = arith.constant 0 : i32
    %c0_i32_1 = arith.constant 0 : i32
    return %c0_i32, %c0_i32_0 : i32, i32
  }
  func.func @transform_9(%arg0: i32) -> (i32, i32) {
    %c0_i32 = arith.constant 0 : i32
    %c0_i32_0 = arith.constant 0 : i32
    %c0_i32_1 = arith.constant 0 : i32
    return %c0_i32, %c0_i32_0 : i32, i32
  }
  func.func @transform_10(%arg0: i32) -> (i32, i32, i32) {
    %c0_i32 = arith.constant 0 : i32
    %c0_i32_0 = arith.constant 0 : i32
    %c0_i32_1 = arith.constant 0 : i32
    return %arg0, %c0_i32, %c0_i32_0 : i32, i32, i32
  }
}

</mosaic_0001>

<bundles_post_ra>
// kernel: simple_cnn_forward.1
= control target key start
LH: loop header
LB: loop body
LE: loop exit
PB: predicated region body
PF: predicated region fallthrough
CT: control target
= control target key end

     0   :  { %15 = vsyncpa [#allocation5], 0  ;;  %s10748_s0 = inlined_call_operand.vmem [shape: bf16[2,3,900], index: 0, kind: input, shape index: {}]   ;;  %s10749_s1 = inlined_call_operand.hbm [shape: f32[1,838], index: 1, kind: input, shape index: {}]   ;;  %s10750_s2 = inlined_call_operand.hbm [shape: bf16[16,27], index: 2, kind: input, shape index: {}]   ;;  %s10751_s3 = inlined_call_operand.vmem [shape: f32[16,1], index: 3, kind: input, shape index: {}]   ;;  %s10752_s4 = inlined_call_operand.hbm [shape: bf16[32,144], index: 4, kind: input, shape index: {}]   ;;  %s10753_s5 = inlined_call_operand.vmem [shape: f32[32,1], index: 5, kind: input, shape index: {}]   ;;  %s10754_s6 = inlined_call_operand.hbm [shape: bf16[838,1024], index: 6, kind: input, shape index: {}]   ;;  %s10755_s7 = inlined_call_operand.hbm [shape: f32[32,1024], index: 7, kind: input, shape index: {}]   ;;  %s10756_s8 = inlined_call_operand.hbm [shape: f32[1,32], index: 8, kind: input, shape index: {}]   ;;  %s10757_s9 = inlined_call_operand.vmem [shape: bf16[32,10], index: 9, kind: input, shape index: {}]   ;;  %s10758_s10 = inlined_call_operand.hbm [shape: f32[2,1,10], index: 10, kind: output, shape index: {}]  }
   0x1   :  { %16 = vsyncpa [#allocation8], 0 }
   0x2   :  { %17 = vsyncpa [#allocation11], 0 }
   0x3   :  { %18 = vsyncpa [#allocation14], 0 }
   0x4   :  { %19 = vsyncpa [#allocation6], 0 }
   0x5   :  { %21 = vsyncpa [#allocation6 + $0x1], 0  ;;  %s8978_s13 = smov 0   ;;  %s8980_s14 = smov 0  }
   0x6   :  { %s8982_s15 = smov 0   ;;  %s8984_s16 = smov 0  }
   0x7 LB: > { %10769 = sst [smem:[#allocation21_spill]] %s8880_s15  ;;  %s8999_s17 = sadd.s32 4294967295, %s8884_s16   ;;  %s8884_s16 = sphi %s8984_s16, %s10833_s16   ;;  %s8880_s15 = sphi %s8982_s15, %s10835_s15   ;;  %s8876_s14 = sphi %s8980_s14, %s10837_s14   ;;  %s8872_s13 = sphi %s8978_s13, %s10836_s13  }
   0x8   : > { %s7795_s18 = sadd.s32 4294967294, %s8884_s16   ;;  %s9003_s19 = sadd.s32 1, %s8884_s16  }
   0x9   : > { %10770 = sst [smem:[#allocation22_spill]] %s9003_s19  ;;  %s249_s20 = sadd.s32 1, %s8880_s15 }
   0xa   : > { %s246_s21 = ssub.s32 %s8884_s16, %s9003_s19  ;;  %p259_p0 = scmp.ne.s32.totalorder %s8880_s15, %s8876_s14 }
   0xb   : > { %p247_p1 = scmp.eq.s32.totalorder %s246_s21, 0  ;;  %p260_p2 = scmp.eq.s32.totalorder %s8999_s17, 1 }
   0xc   : > { %p265_p3 = scmp.ne.s32.totalorder %s8876_s14, %s8872_s13  ;;  %p266_p4 = scmp.eq.s32.totalorder %s7795_s18, 1 }
   0xd   : > { %s9014_s22 = scalar_select %p247_p1, %s8880_s15, %s249_s20  }
   0xe   : > { %p9016_p5 = por %p260_p2, %p259_p0  ;;  %p9020_p6 = por %p266_p4, %p265_p3 }
   0xf   : > { %10771 = sst [smem:[#allocation23_spill]] %s9014_s22  ;;  %p7796_p7 = scmp.ge.s32.totalorder %s8884_s16, 1 }
  0x10   : > { %s10772_s23 = scalar_select %p9016_p5, 1, 0 }
  0x11   : > { %s10773_s24 = scalar_select %p9020_p6, 1, 0 }
  0x12   : > { %p273_p8 = scmp.lt.s32.totalorder %s8884_s16, 3  ;;  %p10759_p9 = scmp.eq.s32.totalorder %s8999_s17, 0 }
  0x13   : > { %s8886_s26 = smov [#allocation7]   ;;  %s8887_s29 = smov [#allocation10]  }
  0x14   : > { %p9027_p10 = pnand %p7796_p7, %p273_p8  ;;  %s296_s27 = sshll.u32 %s8886_s26, 4  ;;  %s297_s27 = int_to_ptr.vmem [resolvable:$true] %s296_s27 }
  0x15   : > { %s328_s30 = sshll.u32 %s8887_s29, 4  ;;  %s8663_s12 = scalar_lea.vmem %s297_s27, 128  ;;  %s329_s30 = int_to_ptr.vmem [resolvable:$true] %s328_s30 }
  0x16   : > { %s10774_s25 = scalar_select %p9027_p10, 1, 0 }
  0x17   : > { %p8500_p11 = pneg %p9027_p10  ;;  %p8664_p0 = scmp.ne.s32.totalorder %s297_s27, %s8663_s12 }
  0x18   : > { %p8671_p3 = scmp.lt.s32.totalorder %s297_s27, %s297_s27  ;;  %p8672_p4 = scmp.lt.s32.totalorder %s8663_s12, %s8663_s12 }
  0x19   : > { %p9035_p12 = pnand %p10759_p9, %p8500_p11 }
  0x1a   : > { %p8673_p7 = por %p8672_p4, %p8671_p3 }
  0x1b   : > { %p9041_p13 = pneg %p9035_p12 }
  0x1d   : > { %p8666_p1 = pnand %p8664_p0, %p9041_p13 }
  0x1f   : > { %p8667_p2 = pneg %p8666_p1 }
  0x21   : > { %p8674_p8 = pnand %p8673_p7, %p8667_p2 }
  0x23   : > { %8677 = shalt.err (!%p8674_p8)
}
  0x24   : > { %s10763_s18 = smov 64   ;;  %s8889_s20 = smov 4  }
  0x25   : > { %8506 = dma.hbm_to_vmem [thread:$0]  (!%p9035_p12), %s10750_s2, 128, %s297_s27, [#allocation8], %s10763_s18, %s10763_s18, %s8889_s20  }
  0x26   : > { %s8689_s29 = scalar_lea.vmem %s329_s30, 53760  ;;  %p8697_p9 = scmp.lt.s32.totalorder %s329_s30, %s329_s30 }
  0x27   : > { %p8690_p11 = scmp.ne.s32.totalorder %s329_s30, %s8689_s29  ;;  %p8698_p3 = scmp.lt.s32.totalorder %s8689_s29, %s8689_s29 }
  0x29   : > { %p8692_p0 = pnand %p8690_p11, %p9041_p13  ;;  %p8699_p2 = por %p8698_p3, %p8697_p9 }
  0x2b   : > { %p8693_p1 = pneg %p8692_p0 }
  0x2d   : > { %p8700_p4 = pnand %p8699_p2, %p8693_p1 }
  0x2f   : > { %8703 = shalt.err (!%p8700_p4)
}
  0x30   : > { %s8890_s12 = smov 512   ;;  %s8891_s22 = smov 32  }
  0x31   : > { %8512 = dma.hbm_to_vmem [thread:$0]  (!%p9035_p12), %s10754_s6, 53760, %s329_s30, [#allocation11], %s8890_s12, %s8890_s12, %s8891_s22  }
  0x32   : > { %s8892_s27 = smov [#allocation4]   ;;  %s8893_s21 = smov [#allocation9]  }
  0x33   : > { %s286_s20 = sshll.u32 %s8892_s27, 4  ;;  %s312_s26 = sshll.u32 %s8893_s21, 4  ;;  %s287_s20 = int_to_ptr.vmem [resolvable:$true] %s286_s20  ;;  %s313_s26 = int_to_ptr.vmem [resolvable:$true] %s312_s26 }
  0x34   : > { %s8715_s18 = scalar_lea.vmem %s287_s20, 112  ;;  %s8722_s29 = scalar_lea.vmem %s287_s20, 128 }
  0x35   : > { %p8716_p7 = scmp.ne.s32.totalorder %s287_s20, %s8715_s18  ;;  %p8723_p11 = scmp.lt.s32.totalorder %s287_s20, %s287_s20 }
  0x36   : > { %p8724_p0 = scmp.lt.s32.totalorder %s8722_s29, %s8715_s18 }
  0x37   : > { %p8718_p9 = pnand %p8716_p7, %p9041_p13 }
  0x38   : > { %p8725_p1 = por %p8724_p0, %p8723_p11 }
  0x39   : > { %p8719_p8 = pneg %p8718_p9 }
  0x3b   : > { %p8726_p3 = pnand %p8725_p1, %p8719_p8 }
  0x3d   : > { %8729 = shalt.err (!%p8726_p3)
}
  0x3e   : > { %8503 = dma.hbm_to_vmem [thread:$0]  (!%p9035_p12), %s10749_s1, 112, %s287_s20, [#allocation5]  }
  0x3f   : > { %s8741_s22 = scalar_lea.vmem %s313_s26, 512  ;;  %p8749_p7 = scmp.lt.s32.totalorder %s313_s26, %s313_s26 }
  0x40   : > { %p8742_p2 = scmp.ne.s32.totalorder %s313_s26, %s8741_s22  ;;  %p8750_p9 = scmp.lt.s32.totalorder %s8741_s22, %s8741_s22 }
  0x42   : > { %p8744_p4 = pnand %p8742_p2, %p9041_p13  ;;  %p8751_p5 = por %p8750_p9, %p8749_p7 }
  0x44   : > { %p8745_p6 = pneg %p8744_p4 }
  0x46   : > { %p8752_p10 = pnand %p8751_p5, %p8745_p6 }
  0x48   : > { %8755 = shalt.err (!%p8752_p10)
}
  0x49   : > { %s8894_s30 = smov 128   ;;  %s8895_s18 = smov 8  }
  0x4a   : > { %8509 = dma.hbm_to_vmem [thread:$0]  (!%p9035_p12), %s10752_s4, 512, %s313_s26, [#allocation8], %s8894_s30, %s8894_s30, %s8895_s18  }
  0x4b   : > { %s8896_s20 = smov [#allocation12]   ;;  %s8897_s29 = smov [#allocation13]  }
  0x4c   : > { %s341_s21 = sshll.u32 %s8896_s20, 4  ;;  %s355_s15 = sshll.u32 %s8897_s29, 4  ;;  %s342_s21 = int_to_ptr.vmem [resolvable:$true] %s341_s21  ;;  %s356_s15 = int_to_ptr.vmem [resolvable:$true] %s355_s15 }
  0x4d   : > { %s8767_s19 = scalar_lea.vmem %s342_s21, 4096  ;;  %p8775_p6 = scmp.lt.s32.totalorder %s342_s21, %s342_s21 }
  0x4e   : > { %p8768_p8 = scmp.ne.s32.totalorder %s342_s21, %s8767_s19  ;;  %p8776_p10 = scmp.lt.s32.totalorder %s8767_s19, %s8767_s19 }
  0x50   : > { %p8770_p11 = pnand %p8768_p8, %p9041_p13  ;;  %p8777_p0 = por %p8776_p10, %p8775_p6 }
  0x52   : > { %p8771_p5 = pneg %p8770_p11 }
  0x54   : > { %p8778_p1 = pnand %p8777_p0, %p8771_p5 }
  0x56   : > { %8781 = shalt.err (!%p8778_p1)
}
  0x57   : > { %s8898_s22 = smov 1024   ;;  %s10777_s12 = smov 64  }
  0x58   : > { %8515 = dma.hbm_to_vmem [thread:$0]  (!%p9035_p12), %s10755_s7, 4096, %s342_s21, [#allocation11], %s8898_s22, %s8898_s22, %s10777_s12  }
  0x59   : > { %s8793_s18 = scalar_lea.vmem %s356_s15, 16  ;;  %s8800_s27 = scalar_lea.vmem %s356_s15, 32 }
  0x5a   : > { %p8794_p3 = scmp.ne.s32.totalorder %s356_s15, %s8793_s18  ;;  %p8801_p7 = scmp.lt.s32.totalorder %s356_s15, %s356_s15 }
  0x5b   : > { %p8802_p9 = scmp.lt.s32.totalorder %s8800_s27, %s8793_s18 }
  0x5c   : > { %p8796_p2 = pnand %p8794_p3, %p9041_p13 }
  0x5d   : > { %p8803_p8 = por %p8802_p9, %p8801_p7 }
  0x5e   : > { %p8797_p4 = pneg %p8796_p2 }
  0x60   : > { %p8804_p11 = pnand %p8803_p8, %p8797_p4 }
  0x62   : > { %8807 = shalt.err (!%p8804_p11)
}
  0x63   : > { %8518 = dma.hbm_to_vmem [thread:$0]  (!%p9035_p12), %s10756_s8, 16, %s356_s15, [#allocation14]  }
  0x64   : > { %p10778_p5 = scmp.ne.s32.totalorder %s10774_s25, 0 }
  0x66   : > { %379 = sbr.rel (%p10778_p5) target bundleno = 2512 (0x9d0), region = 60 }
  0x6b   : > { %p10779_p6 = scmp.eq.s32.totalorder %s8999_s17, 0 }
  0x6d   : > { %8851 = dma.done.wait (%p10779_p6), [#allocation5], 112   ;;  %p10780_p13 = pmov %p10779_p6 }
  0x6e   : > { %p10781_p10 = pmov %p10779_p6 }
  0x6f   : > { %8853 = vsyncadd (%p10780_p13), [#allocation5], 4294967184 }
  0x70   : > { %8855 = dma.done.wait (%p10781_p10), [#allocation8], 640   ;;  %p10782_p0 = pmov %p10779_p6 }
  0x72   : > { %8857 = vsyncadd (%p10782_p0), [#allocation8], 4294966656  ;;  %p10783_p1 = pmov %p10782_p0 }
  0x73   : > { %p10784_p12 = pmov %p10782_p0 }
  0x74   : > { %8859 = dma.done.wait (%p10783_p1), [#allocation11], 57856  }
  0x75   : > { %8861 = vsyncadd (%p10784_p12), [#allocation11], 4294909440  ;;  %p10785_p3 = pmov %p10782_p0 }
  0x76   : > { %p10786_p2 = pmov %p10782_p0 }
  0x77   : > { %8863 = dma.done.wait (%p10785_p3), [#allocation14], 16  }
  0x78   : > { %8865 = vsyncadd (%p10786_p2), [#allocation14], 4294967280  ;;  %p436_p4 = scmp.lt.s32.totalorder %s8999_s17, 1  ;;  %v459_v0 = vlaneseq  ;;  %v8899_v1 = vmov 1983009808   ;;  %s8900_s19 = smov 127  }
  0x79   : > { %v457_v2 = vunpack.c.l.s4 %v8899_v1  ;;  %v9124_v10 = vld [vmem:[#allocation7] sm:$0xff]   ;;  %v8901_v13 = vmov 0   ;;  %s8902_s22 = smov 125   ;;  %s8903_s12 = smov 126   ;;  %vm513_vm0 = vcmask 1040384   ;;  %vm502_vm1 = vcmask 1039360  }
  0x7a   : > { %s437_s25 = scalar_select %p436_p4, %s8999_s17, 1  ;;  %v9110_v3 = vshrl.u32 %v459_v0, 7  ;;  %570 = vmatprep.mubr.bf16.mxu0 %v8901_v13  ;;  %2669 = vst [vmem:[#allocation3] sm:$0xff] %v8901_v13  ;;  %2676 = vst [vmem:[#allocation3 + $0x20] sm:$0xff] %v8901_v13  ;;  %613 = vmatprep.mubr.bf16.mxu1 %v8901_v13  ;;  %v8609_v19 = vld [vmem:[#allocation7] sm:$0xff]   ;;  %vm514_vm2 = vcmask 1041408  }
  0x7b   : > { %v458_v4 = vunpack.c.0.s8 %v457_v2  ;;  %8605 = vset.pattern.permute.xlu0 %v8901_v13  ;;  %8604 = vset.pattern.permute.xlu1 %v8901_v13  ;;  %s8904_s26 = smov 122   ;;  %s8905_s30 = smov 98   ;;  %v8610_v20 = vld [vmem:[#allocation7] sm:$0xff]   ;;  %v8916_v29 = vmov 65535   ;;  %vm509_vm3 = vcmask 23552   ;;  %v10766_v50 = vmov 0.0  }
  0x7c   : > { %s8382_s28 = sshll.u32 %s437_s25, 4  ;;  %s8906_s18 = smov 119   ;;  %v8611_v21 = vld [vmem:[#allocation7] sm:$0xff]   ;;  %v515_v30 = vsel %vm513_vm0, 4294967295, %v8916_v29  ;;  %vm8919_vm4 = vmmov 0   ;;  %vm925_vm5 = vcmask 1031168  }
  0x7d   : > { %s440_s15 = scalar_lea.vmem %s10748_s0, %s8382_s28  ;;  %v461_v5 = vsub.s32 %v458_v4, %v9110_v3  ;;  %s8907_s27 = smov 97   ;;  %v8612_v22 = vld [vmem:[#allocation7] sm:$0xff]   ;;  %v9257_v33 = vsel %vm514_vm2, %v515_v30, 0  ;;  %vm1163_vm6 = vcmask 801792   ;;  %vm1401_vm7 = vcmask 793600  }
  0x7e   : > { %v442_v6 = vld [vmem:[%s440_s15] sm:$0xff]  ;;  %v443_v11 = vld [vmem:[%s440_s15 + $0x8] sm:$0xff]  ;;  %s8908_s20 = smov 116   ;;  %s8909_s29 = smov 96   ;;  %vm1639_vm8 = vcmask 785408   ;;  %vm1880_vm9 = vcmask 556032  }
  0x7f   : > { %v9116_v7 = vrot.slane %v442_v6, %v461_v5  ;;  %v455_v8 = vcombine.high %v442_v6, %v442_v6  ;;  %v9135_v14 = vrot.slane %v443_v11, %v461_v5  ;;  %v472_v15 = vcombine.high %v443_v11, %v443_v11  ;;  %s8910_s25 = smov 113   ;;  %s8911_s28 = smov 68   ;;  %v8613_v23 = vld [vmem:[#allocation7] sm:$0xff]  }
  0x80   : > { %s8912_s11 = smov 110   ;;  %s8913_s21 = smov 67   ;;  %v8614_v25 = vld [vmem:[#allocation7] sm:$0xff]   ;;  %vm2121_vm10 = vcmask 547840   ;;  %vm2362_vm11 = vcmask 539648   ;;  %vm2672_vm12 = vcmask 1043456  }
  0x81   : > { %488 = vrot.lane.b32.xlu1 %v9116_v7, %s8900_s19  ;;  %v9122_v9 = vcombine.high %v9116_v7, %v9116_v7  ;;  %v9128_v12 = vrot.slane %v455_v8, %v461_v5  ;;  %v9147_v17 = vrot.slane %v472_v15, %v461_v5  ;;  %v9153_v18 = vcombine.high %v9135_v14, %v9135_v14  ;;  %s8914_s15 = smov 107   ;;  %v8615_v28 = vld [vmem:[#allocation7] sm:$0xff]   ;;  %p10831_p9 = scmp.ne.s32.totalorder %s10772_s23, 0 }
  0x82   : > { %v712_v56 = vand.u32 %v9257_v33, %v9116_v7  ;;  %v724_v0 = vand.u32 %v9257_v33, %v9135_v14  ;;  %vm2673_vm13 = vcmask 31748   ;;  %vm2760_vm15 = vcmask 1043704  }
  0x83   : > { %490 = vrot.lane.b32.xlu0 %v9122_v9, %s8900_s19  ;;  %v9143_v16 = vcombine.high %v9128_v12, %v9128_v12  ;;  %v9235_v24 = vcombine.high %v9147_v17, %v9147_v17  ;;  %v715_v52 = vand.u32 %v9257_v33, %v9122_v9  ;;  %v727_v58 = vand.u32 %v9257_v33, %v9153_v18  ;;  %vm2674_vm14 = vmor %vm2673_vm13, %vm2672_vm12 }
  0x84   : > { %v718_v60 = vand.u32 %v9257_v33, %v9128_v12  ;;  %v730_v6 = vand.u32 %v9257_v33, %v9147_v17  ;;  %vm2761_vm0 = vcmask 1047556   ;;  %vm2738_vm2 = vcmask 252928  }
  0x85   : > { %451 = vrot.lane.b32.xlu1 %v9124_v10, %s8902_s22  ;;  %s8915_s22 = smov 66   ;;  %v721_v54 = vand.u32 %v9257_v33, %v9143_v16  ;;  %vm2766_vm13 = vcmask 822272  }
  0x87   : > { %492 = vrot.lane.b32.xlu0 %v9128_v12, %s8900_s19 }
  0x89   : > { %496 = vrot.lane.b32.xlu1 %v9135_v14, %s8900_s19 }
  0x8b   : > { %494 = vrot.lane.b32.xlu0 %v9143_v16, %s8900_s19 }
  0x8d   : > { %500 = vrot.lane.b32.xlu1 %v9147_v17, %s8900_s19 }
  0x8f   : > { %498 = vrot.lane.b32.xlu0 %v9153_v18, %s8900_s19 }
  0x91   : > { %915 = vrot.lane.b32.xlu1 %v9128_v12, %s8903_s12 }
  0x93   : > { %913 = vrot.lane.b32.xlu0 %v9122_v9, %s8903_s12 }
  0x95   : > { %909 = vrot.lane.b32.xlu1 %v8609_v19, %s8904_s26  ;;  %s8917_s26 = smov 104  }
  0x97   : > { %911 = vrot.lane.b32.xlu0 %v9116_v7, %s8903_s12 }
  0x99   : > { %919 = vrot.lane.b32.xlu1 %v9135_v14, %s8903_s12 }
  0x9b   : > { %917 = vrot.lane.b32.xlu0 %v9143_v16, %s8903_s12 }
  0x9d   : > { %923 = vrot.lane.b32.xlu1 %v9147_v17, %s8903_s12 }
  0x9f   : > { %921 = vrot.lane.b32.xlu0 %v9153_v18, %s8903_s12 }
  0xa1   : > { %1153 = vrot.lane.b32.xlu1 %v9128_v12, %s8905_s30 }
  0xa3   : > { %1151 = vrot.lane.b32.xlu0 %v9122_v9, %s8905_s30 }
  0xa5   : > { %1147 = vrot.lane.b32.xlu1 %v8610_v20, %s8906_s18 }
  0xa7   : > { %1149 = vrot.lane.b32.xlu0 %v9116_v7, %s8905_s30 }
  0xa9   : > { %1157 = vrot.lane.b32.xlu1 %v9135_v14, %s8905_s30 }
  0xab   : > { %1155 = vrot.lane.b32.xlu0 %v9143_v16, %s8905_s30 }
  0xad   : > { %1161 = vrot.lane.b32.xlu1 %v9147_v17, %s8905_s30 }
  0xaf   : > { %1159 = vrot.lane.b32.xlu0 %v9153_v18, %s8905_s30 }
  0xb1   : > { %1391 = vrot.lane.b32.xlu1 %v9128_v12, %s8907_s27 }
  0xb3   : > { %1389 = vrot.lane.b32.xlu0 %v9122_v9, %s8907_s27 }
  0xb5   : > { %1385 = vrot.lane.b32.xlu1 %v8611_v21, %s8908_s20 }
  0xb7   : > { %1387 = vrot.lane.b32.xlu0 %v9116_v7, %s8907_s27 }
  0xb9   : > { %1395 = vrot.lane.b32.xlu1 %v9135_v14, %s8907_s27 }
  0xbb   : > { %1393 = vrot.lane.b32.xlu0 %v9143_v16, %s8907_s27 }
  0xbd   : > { %1399 = vrot.lane.b32.xlu1 %v9147_v17, %s8907_s27 }
  0xbf   : > { %1397 = vrot.lane.b32.xlu0 %v9153_v18, %s8907_s27 }
  0xc1   : > { %1629 = vrot.lane.b32.xlu1 %v9128_v12, %s8909_s29 }
  0xc3   : > { %1627 = vrot.lane.b32.xlu0 %v9122_v9, %s8909_s29 }
  0xc5   : > { %1623 = vrot.lane.b32.xlu1 %v8612_v22, %s8910_s25  ;;  %s8921_s25 = smov 64  }
  0xc7   : > { %1625 = vrot.lane.b32.xlu0 %v9116_v7, %s8909_s29 }
  0xc9   : > { %1633 = vrot.lane.b32.xlu1 %v9135_v14, %s8909_s29 }
  0xcb   : > { %1631 = vrot.lane.b32.xlu0 %v9143_v16, %s8909_s29 }
  0xcd   : > { %1637 = vrot.lane.b32.xlu1 %v9147_v17, %s8909_s29 }
  0xcf   : > { %1635 = vrot.lane.b32.xlu0 %v9153_v18, %s8909_s29 }
  0xd1   : > { %1868 = vrot.lane.b32.xlu1 %v9128_v12, %s8911_s28 }
  0xd3   : > { %1866 = vrot.lane.b32.xlu0 %v9122_v9, %s8911_s28 }
  0xd5   : > { %1861 = vrot.lane.b32.xlu1 %v8613_v23, %s8912_s11 }
  0xd7   : > { %1864 = vrot.lane.b32.xlu0 %v9116_v7, %s8911_s28 }
  0xd9   : > { %1872 = vrot.lane.b32.xlu1 %v9135_v14, %s8911_s28 }
  0xdb   : > { %1870 = vrot.lane.b32.xlu0 %v9143_v16, %s8911_s28 }
  0xdd   : > { %1876 = vrot.lane.b32.xlu1 %v9147_v17, %s8911_s28 }
  0xdf   : > { %1874 = vrot.lane.b32.xlu0 %v9153_v18, %s8911_s28 }
  0xe1   : > { %2109 = vrot.lane.b32.xlu1 %v9128_v12, %s8913_s21 }
  0xe3   : > { %2107 = vrot.lane.b32.xlu0 %v9122_v9, %s8913_s21 }
  0xe5   : > { %2105 = vrot.lane.b32.xlu1 %v9116_v7, %s8913_s21 }
  0xe7   : > { %1878 = vrot.lane.b32.xlu0 %v9235_v24, %s8911_s28 }
  0xe9   : > { %2111 = vrot.lane.b32.xlu1 %v9143_v16, %s8913_s21 }
  0xeb   : > { %2103 = vrot.lane.b32.xlu0 %v8614_v25, %s8914_s15  ;;  %s8920_s15 = smov 31  }
  0xed   : > { %2115 = vrot.lane.b32.xlu1 %v9153_v18, %s8913_s21 }
  0xef   : > { %2113 = vrot.lane.b32.xlu0 %v9135_v14, %s8913_s21 }
  0xf1   : > { %2348 = vrot.lane.b32.xlu1 %v9122_v9, %s8915_s22 }
  0xf3   : > { %v489_v26 = vpop.permute.xlu1 %488  ;;  %2117 = vrot.lane.b32.xlu0 %v9147_v17, %s8913_s21 }
  0xf5   : > { %v491_v27 = vpop.permute.xlu0 %490  ;;  %2119 = vrot.lane.b32.xlu1 %v9235_v24, %s8913_s21 }
  0xf6   : > { %v503_v34 = vsel %vm502_vm1, %v489_v26, %v491_v27 }
  0xf7   : > { %v9253_v31 = vpop.permute.xlu1 %451  ;;  %2350 = vrot.lane.b32.xlu0 %v9128_v12, %s8915_s22  ;;  %v518_v38 = vand.u32 %v9257_v33, %v503_v34 }
  0xf9   : > { %v493_v32 = vpop.permute.xlu0 %492  ;;  %2344 = vrot.lane.b32.xlu1 %v8615_v28, %s8917_s26 }
  0xfa   : > { %v504_v35 = vsel %vm502_vm1, %v491_v27, %v493_v32 }
  0xfb   : > { %v497_v36 = vpop.permute.xlu1 %496  ;;  %v521_v37 = vand.u32 %v9257_v33, %v504_v35  ;;  %2346 = vrot.lane.b32.xlu0 %v9116_v7, %s8915_s22 }
  0xfd   : > { %552 = vmatprep.subr.bf16.mxu0 %v521_v37  ;;  %v495_v39 = vpop.permute.xlu0 %494  ;;  %2354 = vrot.lane.b32.xlu1 %v9135_v14, %s8915_s22 }
  0xfe   : > { %553 = vmatpush1.bf16.msra.mxu0 %v518_v38  ;;  %v506_v40 = vsel %vm502_vm1, %v495_v39, %v497_v36  ;;  %v505_v41 = vsel %vm502_vm1, %v493_v32, %v495_v39 }
  0xff   : > { %v501_v42 = vpop.permute.xlu1 %500  ;;  %v527_v43 = vand.u32 %v9257_v33, %v506_v40  ;;  %v524_v44 = vand.u32 %v9257_v33, %v505_v41  ;;  %2352 = vrot.lane.b32.xlu0 %v9143_v16, %s8915_s22 }
 0x100   : > { %v536_v53 = vand.u32 %v9257_v33, %v501_v42 }
 0x101   : > { %7814 = vmatmul.mubr.msk.bf16.vlgmr.msra.gmra.mxu0 %vm509_vm3, %v9253_v31  ;;  %595 = vmatprep.subr.bf16.mxu1 %v527_v43  ;;  %v499_v45 = vpop.permute.xlu0 %498 }
 0x102   : > { %v507_v46 = vsel %vm502_vm1, %v497_v36, %v499_v45  ;;  %v508_v47 = vsel %vm502_vm1, %v499_v45, %v501_v42  ;;  %596 = vmatpush1.bf16.msra.mxu1 %v524_v44  ;;  %656 = vmatprep.mubr.bf16.mxu0 %v8901_v13 }
 0x103   : > { %v530_v48 = vand.u32 %v9257_v33, %v507_v46  ;;  %v533_v49 = vand.u32 %v9257_v33, %v508_v47  ;;  %8412 = vmatprep.subr.bf16.mxu1 %v10766_v50  ;;  %v916_v51 = vpop.permute.xlu1 %915  ;;  %2358 = vrot.lane.b32.xlu1 %v9147_v17, %s8915_s22 }
 0x104   : > { %2356 = vrot.lane.b32.xlu0 %v9153_v18, %s8915_s22 }
 0x105   : > { %7815 = vmatmul.mubr.msk.bf16.vlgmr.msra.gmra.mxu1 %vm509_vm3, %v9253_v31  ;;  %638 = vmatprep.subr.bf16.mxu0 %v533_v49  ;;  %v914_v55 = vpop.permute.xlu0 %913 }
 0x106   : > { %639 = vmatpush1.bf16.msra.mxu0 %v530_v48  ;;  %8413 = vmatpush3.bf16.msra.mxu1 %v536_v53  ;;  %v927_v62 = vsel %vm925_vm5, %v914_v55, %v916_v51 }
 0x107   : > { %8414 = vmatprep.mubr.msk.bf16.mxu1 %vm8919_vm4, %v10766_v50  ;;  %v9296_v57 = vpop.permute.xlu1 %909  ;;  %746 = vmatprep.subr.bf16.mxu0 %v715_v52  ;;  %v939_v2 = vand.u32 %v927_v62, %v9257_v33 }
 0x108   : > { %789 = vmatprep.subr.bf16.mxu1 %v721_v54  ;;  %2360 = vrot.lane.b32.xlu0 %v9235_v24, %s8915_s22 }
 0x109   : > { %7816 = vmatmul.mubr.msk.bf16.vlgmr.msra.gmra.mxu0 %vm509_vm3, %v9253_v31  ;;  %v912_v59 = vpop.permute.xlu0 %911 }
 0x10a   : > { %747 = vmatpush1.bf16.msra.mxu0 %v712_v56  ;;  %764 = vmatprep.mubr.bf16.mxu0 %v8901_v13  ;;  %v926_v11 = vsel %vm925_vm5, %v912_v59, %v914_v55 }
 0x10b   : > { %v920_v61 = vpop.permute.xlu1 %919  ;;  %832 = vmatprep.subr.bf16.mxu0 %v727_v58  ;;  %v936_v16 = vand.u32 %v926_v11, %v9257_v33 }
 0x10d   : > { %8415 = vmatmul.mubr.msk.bf16.vlgmr.msra.gmra.mxu1 %vm509_vm3, %v9253_v31  ;;  %v918_v63 = vpop.permute.xlu0 %917 }
 0x10e   : > { %790 = vmatpush1.bf16.msra.mxu1 %v718_v60  ;;  %807 = vmatprep.mubr.bf16.mxu1 %v8901_v13  ;;  %v929_v4 = vsel %vm925_vm5, %v918_v63, %v920_v61  ;;  %v928_v17 = vsel %vm925_vm5, %v916_v51, %v918_v63 }
 0x10f   : > { %v924_v1 = vpop.permute.xlu1 %923  ;;  %8418 = vmatprep.subr.bf16.mxu1 %v10766_v50  ;;  %v945_v8 = vand.u32 %v929_v4, %v9257_v33  ;;  %v942_v20 = vand.u32 %v928_v17, %v9257_v33 }
 0x110   : > { %v954_v30 = vand.u32 %v924_v1, %v9257_v33 }
 0x111   : > { %7818 = vmatmul.mubr.msk.bf16.vlgmr.msra.gmra.mxu0 %vm509_vm3, %v9124_v10  ;;  %v922_v5 = vpop.permute.xlu0 %921 }
 0x112   : > { %833 = vmatpush1.bf16.msra.mxu0 %v724_v0  ;;  %850 = vmatprep.mubr.bf16.mxu0 %v8901_v13  ;;  %v931_v9 = vsel %vm925_vm5, %v922_v5, %v924_v1  ;;  %v930_v22 = vsel %vm925_vm5, %v920_v61, %v922_v5 }
 0x113   : > { %970 = vmatprep.subr.bf16.mxu0 %v939_v2  ;;  %v1154_v7 = vpop.permute.xlu1 %1153  ;;  %v951_v15 = vand.u32 %v931_v9, %v9257_v33  ;;  %v948_v26 = vand.u32 %v930_v22, %v9257_v33 }
 0x115   : > { %7819 = vmatmul.mubr.msk.bf16.vlgmr.msra.gmra.mxu1 %vm509_vm3, %v9124_v10  ;;  %v1152_v12 = vpop.permute.xlu0 %1151 }
 0x116   : > { %8419 = vmatpush3.bf16.msra.mxu1 %v730_v6  ;;  %8420 = vmatprep.mubr.msk.bf16.mxu1 %vm8919_vm4, %v10766_v50  ;;  %v1165_v21 = vsel %vm1163_vm6, %v1152_v12, %v1154_v7 }
 0x117   : > { %1013 = vmatprep.subr.bf16.mxu1 %v945_v8  ;;  %v9328_v14 = vpop.permute.xlu1 %1147  ;;  %v1177_v25 = vand.u32 %v1165_v21, %v9257_v33 }
 0x119   : > { %7820 = vmatmul.mubr.msk.bf16.vlgmr.msra.gmra.mxu0 %vm509_vm3, %v9124_v10  ;;  %v1150_v18 = vpop.permute.xlu0 %1149 }
 0x11a   : > { %971 = vmatpush1.bf16.msra.mxu0 %v936_v16  ;;  %988 = vmatprep.mubr.bf16.mxu0 %v8901_v13  ;;  %v1164_v32 = vsel %vm1163_vm6, %v1150_v18, %v1152_v12 }
 0x11b   : > { %1056 = vmatprep.subr.bf16.mxu0 %v951_v15  ;;  %v1158_v19 = vpop.permute.xlu1 %1157  ;;  %v1174_v37 = vand.u32 %v1164_v32, %v9257_v33 }
 0x11d   : > { %8421 = vmatmul.mubr.msk.bf16.vlgmr.msra.gmra.mxu1 %vm509_vm3, %v9124_v10  ;;  %v1156_v23 = vpop.permute.xlu0 %1155 }
 0x11e   : > { %1014 = vmatpush1.bf16.msra.mxu1 %v942_v20  ;;  %1031 = vmatprep.mubr.bf16.mxu1 %v8901_v13  ;;  %v1167_v27 = vsel %vm1163_vm6, %v1156_v23, %v1158_v19  ;;  %v1166_v38 = vsel %vm1163_vm6, %v1154_v7, %v1156_v23 }
 0x11f   : > { %8424 = vmatprep.subr.bf16.mxu1 %v10766_v50  ;;  %v1162_v24 = vpop.permute.xlu1 %1161  ;;  %v1183_v29 = vand.u32 %v1167_v27, %v9257_v33  ;;  %v1180_v41 = vand.u32 %v1166_v38, %v9257_v33 }
 0x120   : > { %v1192_v53 = vand.u32 %v1162_v24, %v9257_v33 }
 0x121   : > { %7823 = vmatmul.mubr.msk.bf16.vlgmr.msra.gmra.mxu0 %vm509_vm3, %v9296_v57  ;;  %v1160_v28 = vpop.permute.xlu0 %1159 }
 0x122   : > { %1057 = vmatpush1.bf16.msra.mxu0 %v948_v26  ;;  %1074 = vmatprep.mubr.bf16.mxu0 %v8901_v13  ;;  %v1169_v31 = vsel %vm1163_vm6, %v1160_v28, %v1162_v24  ;;  %v1168_v43 = vsel %vm1163_vm6, %v1158_v19, %v1160_v28  ;;  %v2578_v19 = vld [vmem:[%s10751_s3] sm:$0xff]  ;;  %v2579_v24 = vld [vmem:[%s10751_s3 + $0x8] sm:$0xff] }
 0x123   : > { %1208 = vmatprep.subr.bf16.mxu0 %v1177_v25  ;;  %v1392_v10 = vpop.permute.xlu1 %1391  ;;  %v1189_v36 = vand.u32 %v1169_v31, %v9257_v33  ;;  %v1186_v47 = vand.u32 %v1168_v43, %v9257_v33  ;;  %2582 = vperm.xlu1 %8604, %v2578_v19  }
 0x124   : > { %2587 = vperm.xlu0 %8605, %v2579_v24  }
 0x125   : > { %7824 = vmatmul.mubr.msk.bf16.vlgmr.msra.gmra.mxu1 %vm509_vm3, %v9296_v57  ;;  %v1390_v34 = vpop.permute.xlu0 %1389 }
 0x126   : > { %8425 = vmatpush3.bf16.msra.mxu1 %v954_v30  ;;  %8426 = vmatprep.mubr.msk.bf16.mxu1 %vm8919_vm4, %v10766_v50  ;;  %v1403_v42 = vsel %vm1401_vm7, %v1390_v34, %v1392_v10 }
 0x127   : > { %1251 = vmatprep.subr.bf16.mxu1 %v1183_v29  ;;  %v9357_v35 = vpop.permute.xlu1 %1385  ;;  %v1415_v46 = vand.u32 %v1403_v42, %v9257_v33 }
 0x129   : > { %7825 = vmatmul.mubr.msk.bf16.vlgmr.msra.gmra.mxu0 %vm509_vm3, %v9296_v57  ;;  %v1388_v39 = vpop.permute.xlu0 %1387 }
 0x12a   : > { %1209 = vmatpush1.bf16.msra.mxu0 %v1174_v37  ;;  %1226 = vmatprep.mubr.bf16.mxu0 %v8901_v13  ;;  %v1402_v55 = vsel %vm1401_vm7, %v1388_v39, %v1390_v34 }
 0x12b   : > { %1294 = vmatprep.subr.bf16.mxu0 %v1189_v36  ;;  %v1396_v40 = vpop.permute.xlu1 %1395  ;;  %v1412_v59 = vand.u32 %v1402_v55, %v9257_v33 }
 0x12d   : > { %8427 = vmatmul.mubr.msk.bf16.vlgmr.msra.gmra.mxu1 %vm509_vm3, %v9296_v57  ;;  %v1394_v44 = vpop.permute.xlu0 %1393 }
 0x12e   : > { %1252 = vmatpush1.bf16.msra.mxu1 %v1180_v41  ;;  %1269 = vmatprep.mubr.bf16.mxu1 %v8901_v13  ;;  %v1405_v48 = vsel %vm1401_vm7, %v1394_v44, %v1396_v40  ;;  %v1404_v60 = vsel %vm1401_vm7, %v1392_v10, %v1394_v44 }
 0x12f   : > { %8430 = vmatprep.subr.bf16.mxu1 %v10766_v50  ;;  %v1400_v45 = vpop.permute.xlu1 %1399  ;;  %v1421_v52 = vand.u32 %v1405_v48, %v9257_v33  ;;  %v1418_v63 = vand.u32 %v1404_v60, %v9257_v33 }
 0x130   : > { %v1430_v12 = vand.u32 %v1400_v45, %v9257_v33 }
 0x131   : > { %7828 = vmatmul.mubr.msk.bf16.vlgmr.msra.gmra.mxu0 %vm509_vm3, %v9328_v14  ;;  %v1398_v49 = vpop.permute.xlu0 %1397 }
 0x132   : > { %1295 = vmatpush1.bf16.msra.mxu0 %v1186_v47  ;;  %1312 = vmatprep.mubr.bf16.mxu0 %v8901_v13  ;;  %v1407_v54 = vsel %vm1401_vm7, %v1398_v49, %v1400_v45  ;;  %v1406_v1 = vsel %vm1401_vm7, %v1396_v40, %v1398_v49 }
 0x133   : > { %1446 = vmatprep.subr.bf16.mxu0 %v1415_v46  ;;  %v1630_v51 = vpop.permute.xlu1 %1629  ;;  %v1427_v58 = vand.u32 %v1407_v54, %v9257_v33  ;;  %v1424_v6 = vand.u32 %v1406_v1, %v9257_v33 }
 0x135   : > { %7829 = vmatmul.mubr.msk.bf16.vlgmr.msra.gmra.mxu1 %vm509_vm3, %v9328_v14  ;;  %v1628_v56 = vpop.permute.xlu0 %1627 }
 0x136   : > { %8431 = vmatpush3.bf16.msra.mxu1 %v1192_v53  ;;  %8432 = vmatprep.mubr.msk.bf16.mxu1 %vm8919_vm4, %v10766_v50  ;;  %v1641_v0 = vsel %vm1639_vm8, %v1628_v56, %v1630_v51 }
 0x137   : > { %1489 = vmatprep.subr.bf16.mxu1 %v1421_v52  ;;  %v9386_v57 = vpop.permute.xlu1 %1623  ;;  %v1653_v5 = vand.u32 %v1641_v0, %v9257_v33 }
 0x139   : > { %7830 = vmatmul.mubr.msk.bf16.vlgmr.msra.gmra.mxu0 %vm509_vm3, %v9328_v14  ;;  %v1626_v61 = vpop.permute.xlu0 %1625 }
 0x13a   : > { %1447 = vmatpush1.bf16.msra.mxu0 %v1412_v59  ;;  %1464 = vmatprep.mubr.bf16.mxu0 %v8901_v13  ;;  %v1640_v15 = vsel %vm1639_vm8, %v1626_v61, %v1628_v56 }
 0x13b   : > { %1532 = vmatprep.subr.bf16.mxu0 %v1427_v58  ;;  %v1634_v62 = vpop.permute.xlu1 %1633  ;;  %v1650_v20 = vand.u32 %v1640_v15, %v9257_v33 }
 0x13d   : > { %8433 = vmatmul.mubr.msk.bf16.vlgmr.msra.gmra.mxu1 %vm509_vm3, %v9328_v14  ;;  %v1632_v2 = vpop.permute.xlu0 %1631 }
 0x13e   : > { %1490 = vmatpush1.bf16.msra.mxu1 %v1418_v63  ;;  %1507 = vmatprep.mubr.bf16.mxu1 %v8901_v13  ;;  %v1643_v7 = vsel %vm1639_vm8, %v1632_v2, %v1634_v62  ;;  %v1642_v21 = vsel %vm1639_vm8, %v1630_v51, %v1632_v2 }
 0x13f   : > { %8436 = vmatprep.subr.bf16.mxu1 %v10766_v50  ;;  %v1638_v4 = vpop.permute.xlu1 %1637  ;;  %v1659_v11 = vand.u32 %v1643_v7, %v9257_v33  ;;  %v1656_v25 = vand.u32 %v1642_v21, %v9257_v33 }
 0x140   : > { %v1668_v36 = vand.u32 %v1638_v4, %v9257_v33 }
 0x141   : > { %7833 = vmatmul.mubr.msk.bf16.vlgmr.msra.gmra.mxu0 %vm509_vm3, %v9357_v35  ;;  %v1636_v8 = vpop.permute.xlu0 %1635 }
 0x142   : > { %1533 = vmatpush1.bf16.msra.mxu0 %v1424_v6  ;;  %1550 = vmatprep.mubr.bf16.mxu0 %v8901_v13  ;;  %v1645_v14 = vsel %vm1639_vm8, %v1636_v8, %v1638_v4  ;;  %v1644_v27 = vsel %vm1639_vm8, %v1634_v62, %v1636_v8 }
 0x143   : > { %1684 = vmatprep.subr.bf16.mxu0 %v1653_v5  ;;  %v1869_v9 = vpop.permute.xlu1 %1868  ;;  %v1665_v18 = vand.u32 %v1645_v14, %v9257_v33  ;;  %v1662_v30 = vand.u32 %v1644_v27, %v9257_v33 }
 0x145   : > { %7834 = vmatmul.mubr.msk.bf16.vlgmr.msra.gmra.mxu1 %vm509_vm3, %v9357_v35  ;;  %v1867_v16 = vpop.permute.xlu0 %1866 }
 0x146   : > { %8437 = vmatpush3.bf16.msra.mxu1 %v1430_v12  ;;  %8438 = vmatprep.mubr.msk.bf16.mxu1 %vm8919_vm4, %v10766_v50  ;;  %v1882_v26 = vsel %vm1880_vm9, %v1867_v16, %v1869_v9 }
 0x147   : > { %1727 = vmatprep.subr.bf16.mxu1 %v1659_v11  ;;  %v9415_v17 = vpop.permute.xlu1 %1861  ;;  %v1895_v29 = vand.u32 %v1882_v26, %v9257_v33 }
 0x149   : > { %7835 = vmatmul.mubr.msk.bf16.vlgmr.msra.gmra.mxu0 %vm509_vm3, %v9357_v35  ;;  %v1865_v22 = vpop.permute.xlu0 %1864 }
 0x14a   : > { %1685 = vmatpush1.bf16.msra.mxu0 %v1650_v20  ;;  %1702 = vmatprep.mubr.bf16.mxu0 %v8901_v13  ;;  %v1881_v38 = vsel %vm1880_vm9, %v1865_v22, %v1867_v16 }
 0x14b   : > { %1770 = vmatprep.subr.bf16.mxu0 %v1665_v18  ;;  %v1873_v23 = vpop.permute.xlu1 %1872  ;;  %v1892_v42 = vand.u32 %v1881_v38, %v9257_v33 }
 0x14d   : > { %8439 = vmatmul.mubr.msk.bf16.vlgmr.msra.gmra.mxu1 %vm509_vm3, %v9357_v35  ;;  %v1871_v28 = vpop.permute.xlu0 %1870 }
 0x14e   : > { %1728 = vmatpush1.bf16.msra.mxu1 %v1656_v25  ;;  %1745 = vmatprep.mubr.bf16.mxu1 %v8901_v13  ;;  %v1884_v31 = vsel %vm1880_vm9, %v1871_v28, %v1873_v23  ;;  %v1883_v43 = vsel %vm1880_vm9, %v1869_v9, %v1871_v28 }
 0x14f   : > { %8442 = vmatprep.subr.bf16.mxu1 %v10766_v50  ;;  %v1877_v10 = vpop.permute.xlu1 %1876  ;;  %v1901_v35 = vand.u32 %v1884_v31, %v9257_v33  ;;  %v1898_v46 = vand.u32 %v1883_v43, %v9257_v33 }
 0x151   : > { %7838 = vmatmul.mubr.msk.bf16.vlgmr.msra.gmra.mxu0 %vm509_vm3, %v9386_v57  ;;  %v1875_v32 = vpop.permute.xlu0 %1874 }
 0x152   : > { %1771 = vmatpush1.bf16.msra.mxu0 %v1662_v30  ;;  %1788 = vmatprep.mubr.bf16.mxu0 %v8901_v13  ;;  %v1886_v37 = vsel %vm1880_vm9, %v1875_v32, %v1877_v10  ;;  %v1885_v48 = vsel %vm1880_vm9, %v1873_v23, %v1875_v32 }
 0x153   : > { %1926 = vmatprep.subr.bf16.mxu0 %v1895_v29  ;;  %v2110_v34 = vpop.permute.xlu1 %2109  ;;  %v1907_v41 = vand.u32 %v1886_v37, %v9257_v33  ;;  %v1904_v53 = vand.u32 %v1885_v48, %v9257_v33 }
 0x155   : > { %7839 = vmatmul.mubr.msk.bf16.vlgmr.msra.gmra.mxu1 %vm509_vm3, %v9386_v57  ;;  %v2108_v39 = vpop.permute.xlu0 %2107 }
 0x156   : > { %8443 = vmatpush3.bf16.msra.mxu1 %v1668_v36  ;;  %8444 = vmatprep.mubr.msk.bf16.mxu1 %vm8919_vm4, %v10766_v50  ;;  %v2123_v47 = vsel %vm2121_vm10, %v2108_v39, %v2110_v34 }
 0x157   : > { %1969 = vmatprep.subr.bf16.mxu1 %v1901_v35  ;;  %v2106_v40 = vpop.permute.xlu1 %2105  ;;  %v2136_v51 = vand.u32 %v2123_v47, %v9257_v33 }
 0x158   : > { %v2122_v60 = vsel %vm2121_vm10, %v2106_v40, %v2108_v39 }
 0x159   : > { %7840 = vmatmul.mubr.msk.bf16.vlgmr.msra.gmra.mxu0 %vm509_vm3, %v9386_v57  ;;  %v1879_v44 = vpop.permute.xlu0 %1878  ;;  %v2133_v1 = vand.u32 %v2122_v60, %v9257_v33 }
 0x15a   : > { %1927 = vmatpush1.bf16.msra.mxu0 %v1892_v42  ;;  %1944 = vmatprep.mubr.bf16.mxu0 %v8901_v13  ;;  %v1887_v54 = vsel %vm1880_vm9, %v1877_v10, %v1879_v44 }
 0x15b   : > { %2012 = vmatprep.subr.bf16.mxu0 %v1907_v41  ;;  %v2112_v45 = vpop.permute.xlu1 %2111  ;;  %v1910_v59 = vand.u32 %v1887_v54, %v9257_v33 }
 0x15c   : > { %v2124_v2 = vsel %vm2121_vm10, %v2110_v34, %v2112_v45 }
 0x15d   : > { %8445 = vmatmul.mubr.msk.bf16.vlgmr.msra.gmra.mxu1 %vm509_vm3, %v9386_v57  ;;  %v9461_v49 = vpop.permute.xlu0 %2103  ;;  %v2139_v7 = vand.u32 %v2124_v2, %v9257_v33 }
 0x15e   : > { %1970 = vmatpush1.bf16.msra.mxu1 %v1898_v46  ;;  %1987 = vmatprep.mubr.bf16.mxu1 %v8901_v13 }
 0x15f   : > { %8448 = vmatprep.subr.bf16.mxu1 %v10766_v50  ;;  %v2116_v52 = vpop.permute.xlu1 %2115 }
 0x161   : > { %7843 = vmatmul.mubr.msk.bf16.vlgmr.msra.gmra.mxu0 %vm509_vm3, %v9415_v17  ;;  %v2114_v55 = vpop.permute.xlu0 %2113 }
 0x162   : > { %2013 = vmatpush1.bf16.msra.mxu0 %v1904_v53  ;;  %v2125_v56 = vsel %vm2121_vm10, %v2112_v45, %v2114_v55  ;;  %2030 = vmatprep.mubr.bf16.mxu0 %v8901_v13  ;;  %v2126_v5 = vsel %vm2121_vm10, %v2114_v55, %v2116_v52 }
 0x163   : > { %2167 = vmatprep.subr.bf16.mxu0 %v2136_v51  ;;  %v2142_v57 = vand.u32 %v2125_v56, %v9257_v33  ;;  %v2349_v58 = vpop.permute.xlu1 %2348  ;;  %v2145_v11 = vand.u32 %v2126_v5, %v9257_v33 }
 0x165   : > { %7844 = vmatmul.mubr.msk.bf16.vlgmr.msra.gmra.mxu1 %vm509_vm3, %v9415_v17  ;;  %v2118_v61 = vpop.permute.xlu0 %2117 }
 0x166   : > { %8449 = vmatpush3.bf16.msra.mxu1 %v1910_v59  ;;  %v2127_v62 = vsel %vm2121_vm10, %v2116_v52, %v2118_v61  ;;  %8450 = vmatprep.mubr.msk.bf16.mxu1 %vm8919_vm4, %v10766_v50 }
 0x167   : > { %v2148_v63 = vand.u32 %v2127_v62, %v9257_v33  ;;  %2210 = vmatprep.subr.bf16.mxu1 %v2142_v57  ;;  %v2120_v0 = vpop.permute.xlu1 %2119 }
 0x168   : > { %v2128_v14 = vsel %vm2121_vm10, %v2118_v61, %v2120_v0 }
 0x169   : > { %7845 = vmatmul.mubr.msk.bf16.vlgmr.msra.gmra.mxu0 %vm509_vm3, %v9415_v17  ;;  %v2351_v4 = vpop.permute.xlu0 %2350  ;;  %v2151_v18 = vand.u32 %v2128_v14, %v9257_v33 }
 0x16a   : > { %2168 = vmatpush1.bf16.msra.mxu0 %v2133_v1  ;;  %2185 = vmatprep.mubr.bf16.mxu0 %v8901_v13  ;;  %v2364_v8 = vsel %vm2362_vm11, %v2349_v58, %v2351_v4 }
 0x16b   : > { %2253 = vmatprep.subr.bf16.mxu0 %v2148_v63  ;;  %v2345_v6 = vpop.permute.xlu1 %2344  ;;  %v2377_v12 = vand.u32 %v2364_v8, %v9257_v33 }
 0x16d   : > { %8451 = vmatmul.mubr.msk.bf16.vlgmr.msra.gmra.mxu1 %vm509_vm3, %v9415_v17  ;;  %v2347_v9 = vpop.permute.xlu0 %2346 }
 0x16e   : > { %2211 = vmatpush1.bf16.msra.mxu1 %v2139_v7  ;;  %2228 = vmatprep.mubr.bf16.mxu1 %v8901_v13  ;;  %v2363_v20 = vsel %vm2362_vm11, %v2347_v9, %v2349_v58 }
 0x16f   : > { %8454 = vmatprep.subr.bf16.mxu1 %v10766_v50  ;;  %v2355_v15 = vpop.permute.xlu1 %2354  ;;  %v2374_v24 = vand.u32 %v2363_v20, %v9257_v33 }
 0x171   : > { %7848 = vmatmul.mubr.msk.bf16.vlgmr.msra.gmra.mxu0 %vm509_vm3, %v9461_v49  ;;  %v2353_v16 = vpop.permute.xlu0 %2352 }
 0x172   : > { %2254 = vmatpush1.bf16.msra.mxu0 %v2145_v11  ;;  %v2366_v17 = vsel %vm2362_vm11, %v2353_v16, %v2355_v15  ;;  %2271 = vmatprep.mubr.bf16.mxu0 %v8901_v13  ;;  %v2365_v26 = vsel %vm2362_vm11, %v2351_v4, %v2353_v16 }
 0x173   : > { %2408 = vmatprep.subr.bf16.mxu0 %v2377_v12  ;;  %v2383_v19 = vand.u32 %v2366_v17, %v9257_v33  ;;  %v2380_v28 = vand.u32 %v2365_v26, %v9257_v33 }
 0x175   : > { %7849 = vmatmul.mubr.msk.bf16.vlgmr.msra.gmra.mxu1 %vm509_vm3, %v9461_v49  ;;  %v2359_v21 = vpop.permute.xlu1 %2358 }
 0x176   : > { %8455 = vmatpush3.bf16.msra.mxu1 %v2151_v18  ;;  %v2357_v22 = vpop.permute.xlu0 %2356  ;;  %8456 = vmatprep.mubr.msk.bf16.mxu1 %vm8919_vm4, %v10766_v50 }
 0x177   : > { %v2368_v23 = vsel %vm2362_vm11, %v2357_v22, %v2359_v21  ;;  %2451 = vmatprep.subr.bf16.mxu1 %v2383_v19  ;;  %v2367_v27 = vsel %vm2362_vm11, %v2355_v15, %v2357_v22 }
 0x178   : > { %v2389_v25 = vand.u32 %v2368_v23, %v9257_v33  ;;  %v2386_v29 = vand.u32 %v2367_v27, %v9257_v33 }
 0x179   : > { %7850 = vmatmul.mubr.msk.bf16.vlgmr.msra.gmra.mxu0 %vm509_vm3, %v9461_v49 }
 0x17a   : > { %2409 = vmatpush1.bf16.msra.mxu0 %v2374_v24  ;;  %2426 = vmatprep.mubr.bf16.mxu0 %v8901_v13  ;;  %v2361_v10 = vpop.permute.xlu0 %2360 }
 0x17b   : > { %2494 = vmatprep.subr.bf16.mxu0 %v2389_v25  ;;  %v2369_v30 = vsel %vm2362_vm11, %v2359_v21, %v2361_v10 }
 0x17c   : > { %v2392_v31 = vand.u32 %v2369_v30, %v9257_v33 }
 0x17d   : > { %8457 = vmatmul.mubr.msk.bf16.vlgmr.msra.gmra.mxu1 %vm509_vm3, %v9461_v49 }
 0x17e   : > { %2452 = vmatpush1.bf16.msra.mxu1 %v2380_v28  ;;  %2469 = vmatprep.mubr.bf16.mxu1 %v8901_v13 }
 0x17f   : > { %8460 = vmatprep.subr.bf16.mxu1 %v10766_v50 }
 0x181   : > { %7853 = vmatmul.mubr.msk.bf16.vlgmr.msra.gmra.mxu0 %vm509_vm3, %v2345_v6 }
 0x182   : > { %2495 = vmatpush1.bf16.msra.mxu0 %v2386_v29  ;;  %2512 = vmatprep.mubr.bf16.mxu0 %v8901_v13 }
 0x185   : > { %7854 = vmatmul.mubr.msk.bf16.vlgmr.msra.gmra.mxu1 %vm509_vm3, %v2345_v6 }
 0x186   : > { %8461 = vmatpush3.bf16.msra.mxu1 %v2392_v31  ;;  %8462 = vmatprep.mubr.msk.bf16.mxu1 %vm8919_vm4, %v10766_v50 }
 0x189   : > { %7855 = vmatmul.mubr.msk.bf16.vlgmr.msra.gmra.mxu0 %vm509_vm3, %v2345_v6 }
 0x18d   : > { %8463 = vmatmul.mubr.msk.bf16.vlgmr.msra.gmra.mxu1 %vm509_vm3, %v2345_v6  ;;  %vm9837_vm3 = vmor %vm2761_vm0, %vm2760_vm15  ;;  %vm3781_vm15 = vcmask 130048  }
 0x1c1   : > { %v572_v32 = vpop.f32.mrf.mxu0 }
 0x1c3   : > { %v574_v34 = vpop.f32.mrf.mxu0 }
 0x1c5   : > { %v576_v35 = vpop.f32.mrf.mxu0  ;;  %v615_v36 = vpop.f32.mrf.mxu1 }
 0x1c7   : > { %v9530_v37 = vpop.f32.mrf.mxu0  ;;  %v617_v38 = vpop.f32.mrf.mxu1 }
 0x1c9   : > { %v619_v33 = vpop.f32.mrf.mxu1  ;;  %v658_v39 = vpop.f32.mrf.mxu0 }
 0x1cb   : > { %v9532_v13 = vpop.f32.mrf.mxu1  ;;  %v660_v40 = vpop.f32.mrf.mxu0 }
 0x1cd   : > { %v662_v41 = vpop.f32.mrf.mxu0  ;;  %v701_v42 = vpop.f32.mrf.mxu1 }
 0x1cf   : > { %v9534_v43 = vpop.f32.mrf.mxu0  ;;  %v8416_v44 = vpop.f32.mrf.mxu1 }
 0x1d1   : > { %v704_v45 = vpop.f32.mrf.mxu1  ;;  %v766_v46 = vpop.f32.mrf.mxu0 }
 0x1d2   : > { %v767_v47 = vadd.f32 %v766_v46, %v572_v32 }
 0x1d3   : > { %v8417_v48 = vpop.f32.mrf.mxu1  ;;  %v768_v49 = vpop.f32.mrf.mxu0 }
 0x1d4   : > { %v769_v51 = vadd.f32 %v768_v49, %v574_v34 }
 0x1d5   : > { %v770_v52 = vpop.f32.mrf.mxu0  ;;  %v809_v53 = vpop.f32.mrf.mxu1 }
 0x1d6   : > { %v771_v54 = vadd.f32 %v770_v52, %v576_v35  ;;  %v810_v55 = vadd.f32 %v809_v53, %v615_v36 }
 0x1d7   : > { %v9536_v56 = vpop.f32.mrf.mxu0  ;;  %v811_v57 = vpop.f32.mrf.mxu1 }
 0x1d8   : > { %v812_v58 = vadd.f32 %v811_v57, %v617_v38 }
 0x1d9   : > { %v813_v59 = vpop.f32.mrf.mxu1  ;;  %v852_v60 = vpop.f32.mrf.mxu0 }
 0x1da   : > { %v814_v61 = vadd.f32 %v813_v59, %v619_v33  ;;  %v853_v62 = vadd.f32 %v852_v60, %v658_v39 }
 0x1db   : > { %v9538_v63 = vpop.f32.mrf.mxu1  ;;  %v854_v0 = vpop.f32.mrf.mxu0 }
 0x1dc   : > { %v855_v1 = vadd.f32 %v854_v0, %v660_v40 }
 0x1dd   : > { %v856_v2 = vpop.f32.mrf.mxu0  ;;  %v895_v4 = vpop.f32.mrf.mxu1 }
 0x1de   : > { %v857_v5 = vadd.f32 %v856_v2, %v662_v41  ;;  %v896_v6 = vadd.f32 %v895_v4, %v701_v42 }
 0x1df   : > { %v9540_v7 = vpop.f32.mrf.mxu0  ;;  %v8422_v8 = vpop.f32.mrf.mxu1 }
 0x1e1   : > { %v898_v9 = vpop.f32.mrf.mxu1  ;;  %v990_v11 = vpop.f32.mrf.mxu0 }
 0x1e2   : > { %v899_v12 = vadd.f32 %v898_v9, %v704_v45  ;;  %v1126_v14 = vadd.f32 %v990_v11, %v767_v47 }
 0x1e3   : > { %v8423_v15 = vpop.f32.mrf.mxu1  ;;  %v992_v16 = vpop.f32.mrf.mxu0 }
 0x1e4   : > { %v1127_v18 = vadd.f32 %v992_v16, %v769_v51 }
 0x1e5   : > { %v994_v17 = vpop.f32.mrf.mxu0  ;;  %v1033_v19 = vpop.f32.mrf.mxu1 }
 0x1e6   : > { %v1133_v20 = vadd.f32 %v994_v17, %v771_v54  ;;  %v1128_v21 = vadd.f32 %v1033_v19, %v810_v55 }
 0x1e7   : > { %v9542_v22 = vpop.f32.mrf.mxu0  ;;  %v1035_v23 = vpop.f32.mrf.mxu1 }
 0x1e8   : > { %v1129_v24 = vadd.f32 %v1035_v23, %v812_v58 }
 0x1e9   : > { %v1037_v25 = vpop.f32.mrf.mxu1  ;;  %v1076_v26 = vpop.f32.mrf.mxu0 }
 0x1ea   : > { %v1135_v27 = vadd.f32 %v1037_v25, %v814_v61  ;;  %v1130_v28 = vadd.f32 %v1076_v26, %v853_v62 }
 0x1eb   : > { %v9544_v10 = vpop.f32.mrf.mxu1  ;;  %v1078_v29 = vpop.f32.mrf.mxu0 }
 0x1ec   : > { %v1131_v30 = vadd.f32 %v1078_v29, %v855_v1 }
 0x1ed   : > { %v1080_v31 = vpop.f32.mrf.mxu0  ;;  %v1119_v32 = vpop.f32.mrf.mxu1 }
 0x1ee   : > { %v1137_v34 = vadd.f32 %v1080_v31, %v857_v5  ;;  %v1132_v35 = vadd.f32 %v1119_v32, %v896_v6 }
 0x1ef   : > { %v9546_v36 = vpop.f32.mrf.mxu0  ;;  %v8428_v38 = vpop.f32.mrf.mxu1 }
 0x1f1   : > { %v1122_v33 = vpop.f32.mrf.mxu1  ;;  %v1228_v39 = vpop.f32.mrf.mxu0 }
 0x1f2   : > { %v1139_v40 = vadd.f32 %v1122_v33, %v899_v12  ;;  %v9548_v41 = vadd.f32 %v1228_v39, %v1126_v14 }
 0x1f3   : > { %v8429_v42 = vpop.f32.mrf.mxu1  ;;  %v1230_v44 = vpop.f32.mrf.mxu0 }
 0x1f4   : > { %v9550_v45 = vadd.f32 %v1230_v44, %v1127_v18 }
 0x1f5   : > { %v1232_v46 = vpop.f32.mrf.mxu0  ;;  %v1271_v47 = vpop.f32.mrf.mxu1 }
 0x1f6   : > { %v9552_v48 = vadd.f32 %v1232_v46, %v1133_v20  ;;  %v9554_v49 = vadd.f32 %v1271_v47, %v1128_v21 }
 0x1f7   : > { %v9556_v51 = vpop.f32.mrf.mxu0  ;;  %v1273_v52 = vpop.f32.mrf.mxu1 }
 0x1f8   : > { %v9558_v53 = vadd.f32 %v1273_v52, %v1129_v24 }
 0x1f9   : > { %v1275_v54 = vpop.f32.mrf.mxu1  ;;  %v1314_v55 = vpop.f32.mrf.mxu0 }
 0x1fa   : > { %v9560_v57 = vadd.f32 %v1275_v54, %v1135_v27  ;;  %v9562_v58 = vadd.f32 %v1314_v55, %v1130_v28 }
 0x1fb   : > { %v9564_v59 = vpop.f32.mrf.mxu1  ;;  %v1316_v60 = vpop.f32.mrf.mxu0 }
 0x1fc   : > { %v9566_v61 = vadd.f32 %v1316_v60, %v1131_v30 }
 0x1fd   : > { %v1318_v62 = vpop.f32.mrf.mxu0  ;;  %v1357_v0 = vpop.f32.mrf.mxu1 }
 0x1fe   : > { %v9568_v1 = vadd.f32 %v1318_v62, %v1137_v34  ;;  %v9570_v2 = vadd.f32 %v1357_v0, %v1132_v35 }
 0x1ff   : > { %v9572_v4 = vpop.f32.mrf.mxu0  ;;  %v8434_v5 = vpop.f32.mrf.mxu1 }
 0x201   : > { %v1360_v6 = vpop.f32.mrf.mxu1  ;;  %v9574_v8 = vpop.f32.mrf.mxu0 }
 0x202   : > { %v9576_v9 = vadd.f32 %v1360_v6, %v1139_v40 }
 0x203   : > { %v8435_v11 = vpop.f32.mrf.mxu1  ;;  %v9578_v12 = vpop.f32.mrf.mxu0 }
 0x205   : > { %v9580_v14 = vpop.f32.mrf.mxu0  ;;  %v9582_v15 = vpop.f32.mrf.mxu1 }
 0x207   : > { %v9584_v16 = vpop.f32.mrf.mxu0  ;;  %v9586_v18 = vpop.f32.mrf.mxu1 }
 0x209   : > { %v9588_v17 = vpop.f32.mrf.mxu1  ;;  %v9590_v19 = vpop.f32.mrf.mxu0 }
 0x20b   : > { %v9592_v20 = vpop.f32.mrf.mxu1  ;;  %v9594_v21 = vpop.f32.mrf.mxu0 }
 0x20d   : > { %v9596_v23 = vpop.f32.mrf.mxu0  ;;  %v9598_v24 = vpop.f32.mrf.mxu1 }
 0x20f   : > { %v9600_v25 = vpop.f32.mrf.mxu0  ;;  %v8440_v26 = vpop.f32.mrf.mxu1 }
 0x211   : > { %v9602_v27 = vpop.f32.mrf.mxu1  ;;  %v9604_v28 = vpop.f32.mrf.mxu0 }
 0x213   : > { %v8441_v29 = vpop.f32.mrf.mxu1  ;;  %v9606_v30 = vpop.f32.mrf.mxu0 }
 0x215   : > { %v9608_v31 = vpop.f32.mrf.mxu0  ;;  %v9610_v32 = vpop.f32.mrf.mxu1 }
 0x217   : > { %v9612_v34 = vpop.f32.mrf.mxu0  ;;  %v9614_v35 = vpop.f32.mrf.mxu1 }
 0x219   : > { %v9616_v38 = vpop.f32.mrf.mxu1  ;;  %v9618_v33 = vpop.f32.mrf.mxu0 }
 0x21b   : > { %v9620_v39 = vpop.f32.mrf.mxu1  ;;  %v9622_v40 = vpop.f32.mrf.mxu0 }
 0x21c   : > { %10787 = vst [vmem:[#allocation24_spill] sm:$0xff] %v9622_v40 }
 0x21d   : > { %v9624_v42 = vpop.f32.mrf.mxu0  ;;  %v9626_v44 = vpop.f32.mrf.mxu1 }
 0x21e   : > { %10788 = vst [vmem:[#allocation25_spill] sm:$0xff] %v9624_v42  ;;  %10789 = vst [vmem:[#allocation26_spill] sm:$0xff] %v9626_v44 }
 0x21f   : > { %v9628_v46 = vpop.f32.mrf.mxu0  ;;  %v8446_v47 = vpop.f32.mrf.mxu1 }
 0x220   : > { %10790 = vst [vmem:[#allocation27_spill] sm:$0xff] %v9628_v46 }
 0x221   : > { %v9630_v52 = vpop.f32.mrf.mxu1  ;;  %v9632_v54 = vpop.f32.mrf.mxu0 }
 0x222   : > { %10791 = vst [vmem:[#allocation28_spill] sm:$0xff] %v9630_v52 }
 0x223   : > { %v8447_v55 = vpop.f32.mrf.mxu1  ;;  %v9634_v60 = vpop.f32.mrf.mxu0 }
 0x224   : > { %10792 = vst [vmem:[#allocation29_spill] sm:$0xff] %v9634_v60 }
 0x225   : > { %v9636_v62 = vpop.f32.mrf.mxu0  ;;  %v9638_v0 = vpop.f32.mrf.mxu1 }
 0x226   : > { %10793 = vst [vmem:[#allocation30_spill] sm:$0xff] %v9636_v62  ;;  %10794 = vst [vmem:[#allocation31_spill] sm:$0xff] %v9638_v0 }
 0x227   : > { %v9640_v5 = vpop.f32.mrf.mxu0  ;;  %v9642_v6 = vpop.f32.mrf.mxu1 }
 0x228   : > { %10795 = vst [vmem:[#allocation32_spill] sm:$0xff] %v9640_v5  ;;  %10796 = vst [vmem:[#allocation33_spill] sm:$0xff] %v9642_v6  ;;  %v2622_v6 = vsub.s32 0, %v9110_v3 }
 0x229   : > { %v9644_v11 = vpop.f32.mrf.mxu1  ;;  %v9646_v26 = vpop.f32.mrf.mxu0 }
 0x22a   : > { %10797 = vst [vmem:[#allocation34_spill] sm:$0xff] %v9644_v11  ;;  %10798 = vst [vmem:[#allocation35_spill] sm:$0xff] %v9646_v26  ;;  %v9665_v26 = vld [vmem:[#allocation4] sm:$0x7f] }
 0x22b   : > { %v9648_v29 = vpop.f32.mrf.mxu1  ;;  %v9650_v47 = vpop.f32.mrf.mxu0 }
 0x22c   : > { %10799 = vst [vmem:[#allocation36_spill] sm:$0xff] %v9648_v29  ;;  %10800 = vst [vmem:[#allocation37_spill] sm:$0xff] %v9650_v47  ;;  %v2626_v47 = vsub.s32 1, %v9110_v3  ;;  %v859_v29 = vadd.f32 %v9540_v7, %v9534_v43 }
 0x22d   : > { %v9652_v50 = vpop.f32.mrf.mxu0  ;;  %v9654_v55 = vpop.f32.mrf.mxu1 }
 0x22e   : > { %10801 = vst [vmem:[#allocation38_spill] sm:$0xff] %v9652_v50  ;;  %10802 = vst [vmem:[#allocation39_spill] sm:$0xff] %v9654_v55  ;;  %v2630_v50 = vsub.s32 2, %v9110_v3  ;;  %v773_v55 = vadd.f32 %v9536_v56, %v9530_v37  ;;  %v9684_v37 = vrot.slane %v9665_v26, %v2622_v6  ;;  %v1138_v44 = vadd.f32 %v9546_v36, %v859_v29 }
 0x22f   : > { %v9656_v52 = vpop.f32.mrf.mxu0  ;;  %v8452_v62 = vpop.f32.mrf.mxu1  ;;  %v1602_v29 = vadd.f32 %v9574_v8, %v9548_v41  ;;  %v1605_v41 = vadd.f32 %v9586_v18, %v9558_v53  ;;  %v1611_v8 = vadd.f32 %v9588_v17, %v9560_v57  ;;  %v1608_v53 = vadd.f32 %v9598_v24, %v9570_v2 }
 0x230   : > { %10803 = vst [vmem:[#allocation40_spill] sm:$0xff] %v9656_v52  ;;  %v2634_v62 = vsub.s32 3, %v9110_v3  ;;  %v2642_v52 = vsub.s32 5, %v9110_v3  ;;  %v1134_v60 = vadd.f32 %v9542_v22, %v773_v55  ;;  %v9696_v43 = vrot.slane %v9665_v26, %v2630_v50 }
 0x231   : > { %v9658_v0 = vpop.f32.mrf.mxu1  ;;  %v9660_v5 = vpop.f32.mrf.mxu0  ;;  %v1376_v6 = vadd.f32 %v9572_v4, %v1138_v44  ;;  %v1606_v44 = vadd.f32 %v9590_v19, %v9562_v58  ;;  %v1840_v57 = vadd.f32 %v9604_v28, %v1602_v29  ;;  %v1615_v58 = vadd.f32 %v9602_v27, %v9576_v9  ;;  %v10808_v28 = vld [vmem:[#allocation25_spill] sm:$0xff] }
 0x232   : > { %10804 = vst [vmem:[#allocation41_spill] sm:$0xff] %v9658_v0  ;;  %10805 = vst [vmem:[#allocation42_spill] sm:$0xff] %v9660_v5  ;;  %v2638_v0 = vsub.s32 4, %v9110_v3  ;;  %v9700_v7 = vrot.slane %v9665_v26, %v2634_v62  ;;  %v1843_v2 = vadd.f32 %v9614_v35, %v1605_v41 }
 0x233   : > { %v8453_v11 = vpop.f32.mrf.mxu1  ;;  %v9663_v46 = vpop.f32.mrf.mxu0  ;;  %v2082_v19 = vadd.f32 %v9632_v54, %v1840_v57 }
 0x234   : > { %10806 = vst [vmem:[#allocation43_spill] sm:$0xff] %v9663_v46  ;;  %v816_v11 = vadd.f32 %v9538_v63, %v9532_v13  ;;  %v9693_v13 = vrot.slane %v9665_v26, %v2626_v47  ;;  %v1372_v63 = vadd.f32 %v9556_v51, %v1134_v60  ;;  %v9703_v22 = vrot.slane %v9665_v26, %v2638_v0  ;;  %v9763_v54 = vpop.permute.xlu1 %2582 }
 0x235   : > { %v9678_v46 = vpop.f32.mrf.mxu0  ;;  %v9680_v5 = vpop.f32.mrf.mxu1  ;;  %v2646_v51 = vsub.s32 6, %v9110_v3  ;;  %v1603_v60 = vadd.f32 %v9578_v12, %v9550_v45 }
 0x236   : > { %v1136_v56 = vadd.f32 %v9544_v10, %v816_v11  ;;  %v9706_v10 = vrot.slane %v9665_v26, %v2642_v52  ;;  %v1609_v52 = vadd.f32 %v9580_v14, %v9552_v48  ;;  %v1610_v4 = vadd.f32 %v9584_v16, %v1372_v63 }
 0x237   : > { %v9688_v42 = vpop.f32.mrf.mxu0  ;;  %v9690_v40 = vpop.f32.mrf.mxu1  ;;  %v1607_v48 = vadd.f32 %v9594_v21, %v9566_v61  ;;  %v1614_v14 = vadd.f32 %v9600_v25, %v1376_v6  ;;  %v1844_v21 = vadd.f32 %v9618_v33, %v1606_v44  ;;  %v10813_v33 = vld [vmem:[#allocation28_spill] sm:$0xff] }
 0x238   : > { %v1374_v36 = vadd.f32 %v9564_v59, %v1136_v56  ;;  %v1604_v59 = vadd.f32 %v9582_v15, %v9554_v49  ;;  %v1613_v49 = vadd.f32 %v9596_v23, %v9568_v1  ;;  %v1841_v15 = vadd.f32 %v9606_v30, %v1603_v60  ;;  %v10807_v23 = vld [vmem:[#allocation24_spill] sm:$0xff] }
 0x239   : > { %v9712_v50 = vpop.f32.mrf.mxu1  ;;  %v9714_v47 = vpop.f32.mrf.mxu0  ;;  %v1847_v16 = vadd.f32 %v9608_v31, %v1609_v52  ;;  %v1848_v1 = vadd.f32 %v9612_v34, %v1610_v4  ;;  %v1845_v24 = vadd.f32 %v10807_v23, %v1607_v48  ;;  %v10809_v31 = vld [vmem:[#allocation26_spill] sm:$0xff]  ;;  %v10810_v34 = vld [vmem:[#allocation29_spill] sm:$0xff]  ;;  %v1853_v56 = vadd.f32 %v10813_v33, %v1615_v58  ;;  %v10816_v52 = vld [vmem:[#allocation32_spill] sm:$0xff] }
 0x23a   : > { %v1612_v0 = vadd.f32 %v9592_v20, %v1374_v36  ;;  %v1842_v61 = vadd.f32 %v9610_v32, %v1604_v59  ;;  %v1849_v20 = vadd.f32 %v9616_v38, %v1611_v8  ;;  %v1851_v30 = vadd.f32 %v10808_v28, %v1613_v49  ;;  %v10811_v35 = vld [vmem:[#allocation42_spill] sm:$0xff]  ;;  %v10812_v38 = vld [vmem:[#allocation27_spill] sm:$0xff]  ;;  %v10817_v4 = vld [vmem:[#allocation33_spill] sm:$0xff] }
 0x23b   : > { %v9731_v45 = vpop.f32.mrf.mxu1  ;;  %v9733_v12 = vpop.f32.mrf.mxu0  ;;  %v1846_v32 = vadd.f32 %v10809_v31, %v1608_v53  ;;  %v2083_v55 = vadd.f32 %v10810_v34, %v1841_v15  ;;  %v2323_v62 = vadd.f32 %v10811_v35, %v2082_v19  ;;  %v1852_v11 = vadd.f32 %v10812_v38, %v1614_v14  ;;  %v10815_v36 = vld [vmem:[#allocation31_spill] sm:$0xff]  ;;  %v10819_v48 = vld [vmem:[#allocation34_spill] sm:$0xff]  ;;  %v10821_v14 = vld [vmem:[#allocation36_spill] sm:$0xff] }
 0x23c   : > { %v1850_v9 = vadd.f32 %v9620_v39, %v1612_v0  ;;  %v10814_v39 = vld [vmem:[#allocation30_spill] sm:$0xff]  ;;  %v2084_v6 = vadd.f32 %v10815_v36, %v1842_v61  ;;  %v2090_v59 = vadd.f32 %v10816_v52, %v1848_v1  ;;  %v2085_v41 = vadd.f32 %v10817_v4, %v1843_v2  ;;  %v10818_v8 = vld [vmem:[#allocation43_spill] sm:$0xff]  ;;  %v10822_v15 = vld [vmem:[#allocation37_spill] sm:$0xff] }
 0x23d   : > { %v2277_v18 = vpop.f32.mrf.mxu0  ;;  %v9747_v17 = vpop.f32.mrf.mxu1  ;;  %v2089_v63 = vadd.f32 %v10814_v39, %v1847_v16  ;;  %v2324_v44 = vadd.f32 %v10818_v8, %v2083_v55  ;;  %v2091_v49 = vadd.f32 %v10819_v48, %v1849_v20  ;;  %v10820_v53 = vld [vmem:[#allocation35_spill] sm:$0xff]  ;;  %v2087_v16 = vadd.f32 %v10822_v15, %v1845_v24  ;;  %v10823_v28 = vld [vmem:[#allocation38_spill] sm:$0xff]  ;;  %v10825_v20 = vld [vmem:[#allocation40_spill] sm:$0xff] }
 0x23e   : > { %v2086_v57 = vadd.f32 %v10820_v53, %v1844_v21  ;;  %v2092_v58 = vadd.f32 %v10821_v14, %v1850_v9  ;;  %v2093_v31 = vadd.f32 %v10823_v28, %v1851_v30  ;;  %v10824_v34 = vld [vmem:[#allocation39_spill] sm:$0xff]  ;;  %v2094_v35 = vadd.f32 %v10825_v20, %v1852_v11  ;;  %v10826_v39 = vld [vmem:[#allocation41_spill] sm:$0xff] }
 0x23f   : > { %v9757_v25 = vpop.f32.mrf.mxu0  ;;  %v8458_v27 = vpop.f32.mrf.mxu1  ;;  %v2330_v23 = vadd.f32 %v9678_v46, %v2089_v63  ;;  %v2088_v55 = vadd.f32 %v10824_v34, %v1846_v32  ;;  %v2331_v21 = vadd.f32 %v9688_v42, %v2090_v59  ;;  %v2326_v24 = vadd.f32 %v9690_v40, %v2085_v41 }
 0x240   : > { %v2325_v27 = vadd.f32 %v9680_v5, %v2084_v6  ;;  %v9787_v5 = vpop.permute.xlu0 %2587  ;;  %v2095_v63 = vadd.f32 %v10826_v39, %v1853_v56  ;;  %v2332_v30 = vadd.f32 %v9712_v50, %v2091_v49  ;;  %v2327_v32 = vadd.f32 %v9714_v47, %v2086_v57 }
 0x241   : > { %v9769_v29 = vpop.f32.mrf.mxu1  ;;  %v2428_v60 = vpop.f32.mrf.mxu0  ;;  %v2333_v59 = vadd.f32 %v9731_v45, %v2092_v58  ;;  %v2328_v4 = vadd.f32 %v9733_v12, %v2087_v16  ;;  %v2334_v41 = vadd.f32 %v2277_v18, %v2093_v31  ;;  %v2329_v49 = vadd.f32 %v9747_v17, %v2088_v55 }
 0x242   : > { %v2564_v0 = vadd.f32 %v2428_v60, %v2323_v62  ;;  %v2335_v18 = vadd.f32 %v9757_v25, %v2094_v35 }
 0x243   : > { %v8459_v19 = vpop.f32.mrf.mxu1  ;;  %v2430_v61 = vpop.f32.mrf.mxu0 }
 0x244   : > { %v2565_v1 = vadd.f32 %v2430_v61, %v2324_v44  ;;  %v2590_v2 = vadd.f32 %v9763_v54, %v2564_v0 }
 0x245   : > { %v2432_v9 = vpop.f32.mrf.mxu0  ;;  %v2471_v62 = vpop.f32.mrf.mxu1 }
 0x246   : > { %v2591_v38 = vadd.f32 %v9763_v54, %v2565_v1  ;;  %v2571_v46 = vadd.f32 %v2432_v9, %v2330_v23  ;;  %v2566_v33 = vadd.f32 %v2471_v62, %v2325_v27  ;;  %v2604_v6 = vmax.f32 %v2590_v2, 0.0 }
 0x247   : > { %v2434_v36 = vpop.f32.mrf.mxu0  ;;  %v2473_v11 = vpop.f32.mrf.mxu1  ;;  %v2336_v62 = vadd.f32 %v9769_v29, %v2095_v63 }
 0x248   : > { %v2605_v42 = vmax.f32 %v2591_v38, 0.0  ;;  %v2592_v60 = vadd.f32 %v9763_v54, %v2566_v33  ;;  %v2572_v52 = vadd.f32 %v2434_v36, %v2331_v21  ;;  %v2567_v40 = vadd.f32 %v2473_v11, %v2326_v24 }
 0x249   : > { %v2475_v8 = vpop.f32.mrf.mxu1  ;;  %v2514_v44 = vpop.f32.mrf.mxu0  ;;  %v2597_v56 = vadd.f32 %v9787_v5, %v2571_v46  ;;  %v2655_v45 = vmul.f32 %v9684_v37, %v2604_v6  ;;  %v2647_v36 = vrot.slane %v9665_v26, %v2646_v51 }
 0x24a   : > { %v2656_v50 = vmul.f32 %v9693_v13, %v2605_v42  ;;  %v2606_v47 = vmax.f32 %v2592_v60, 0.0  ;;  %v2593_v0 = vadd.f32 %v9763_v54, %v2567_v40  ;;  %v2573_v48 = vadd.f32 %v2475_v8, %v2332_v30 }
 0x24b   : > { %v2568_v53 = vadd.f32 %v2514_v44, %v2327_v32  ;;  %v2477_v57 = vpop.f32.mrf.mxu1  ;;  %v2516_v14 = vpop.f32.mrf.mxu0  ;;  %v2598_v12 = vadd.f32 %v9787_v5, %v2572_v52  ;;  %v2611_v16 = vmax.f32 %v2597_v56, 0.0 }
 0x24c   : > { %v2607_v58 = vmax.f32 %v2593_v0, 0.0  ;;  %v2574_v15 = vadd.f32 %v2477_v57, %v2333_v59  ;;  %v2657_v19 = vmul.f32 %v9696_v43, %v2606_v47  ;;  %v2569_v23 = vadd.f32 %v2516_v14, %v2328_v4 }
 0x24d   : > { %v2594_v61 = vadd.f32 %v9763_v54, %v2568_v53  ;;  %v2518_v27 = vpop.f32.mrf.mxu0  ;;  %v2557_v1 = vpop.f32.mrf.mxu1  ;;  %v8383_v17 = vpack.c.bf16 %v2656_v50, %v2655_v45  ;;  %v2599_v28 = vadd.f32 %v9787_v5, %v2573_v48  ;;  %v2612_v9 = vmax.f32 %v2598_v12, 0.0 }
 0x24e   : > { %v2658_v2 = vmul.f32 %v9700_v7, %v2607_v58  ;;  %v2600_v31 = vadd.f32 %v9787_v5, %v2574_v15  ;;  %v2575_v34 = vadd.f32 %v2518_v27, %v2334_v41  ;;  %v2595_v25 = vadd.f32 %v9763_v54, %v2569_v23 }
 0x24f   : > { %v2608_v55 = vmax.f32 %v2594_v61, 0.0  ;;  %v2570_v20 = vadd.f32 %v2557_v1, %v2329_v49  ;;  %2716 = vrot.lane.b32.xlu1 %v8383_v17, %s8920_s15  ;;  %v2520_v35 = vpop.f32.mrf.mxu0  ;;  %v8464_v21 = vpop.f32.mrf.mxu1  ;;  %v2613_v11 = vmax.f32 %v2599_v28, 0.0  ;;  %v2663_v40 = vmul.f32 %v9693_v13, %v2612_v9  ;;  %v9829_v13 = vld [vmem:[#allocation3] sm:$0xff] }
 0x250   : > { %v2614_v24 = vmax.f32 %v2600_v31, 0.0  ;;  %v2601_v38 = vadd.f32 %v9787_v5, %v2575_v34  ;;  %v2576_v46 = vadd.f32 %v2520_v35, %v2335_v18  ;;  %v2609_v33 = vmax.f32 %v2595_v25, 0.0  ;;  %2675 = vst.msk [vmem:[#allocation3 + $0x18] sm:$0xff] %vm2674_vm14, %v9829_v13  ;;  %2679 = vst.msk [vmem:[#allocation3 + $0x38] sm:$0xff] %vm2674_vm14, %v9829_v13 }
 0x251   : > { %v2596_v39 = vadd.f32 %v9763_v54, %v2570_v20  ;;  %v2560_v30 = vpop.f32.mrf.mxu1  ;;  %v8384_v32 = vpack.c.bf16 %v2658_v2, %v2657_v19  ;;  %v2659_v29 = vmul.f32 %v9703_v22, %v2608_v55  ;;  %v2662_v54 = vmul.f32 %v9684_v37, %v2611_v16 }
 0x252   : > { %v2615_v6 = vmax.f32 %v2601_v38, 0.0  ;;  %v2602_v42 = vadd.f32 %v9787_v5, %v2576_v46  ;;  %v2577_v60 = vadd.f32 %v2560_v30, %v2336_v62  ;;  %v2660_v63 = vmul.f32 %v9706_v10, %v2609_v33  ;;  %v9941_v46 = vld [vmem:[#allocation9 + $0x4] ss:$8 sps:$4 sm:$0xff]  }
 0x253   : > { %2718 = vrot.lane.b32.xlu1 %v8384_v32, %s8920_s15  ;;  %v8465_v52 = vpop.f32.mrf.mxu1  ;;  %v2665_v3 = vmul.f32 %v9700_v7, %v2614_v24  ;;  %v2610_v51 = vmax.f32 %v2596_v39, 0.0  ;;  %v8387_v41 = vpack.c.bf16 %v2663_v40, %v2662_v54  ;;  %v2664_v37 = vmul.f32 %v9696_v43, %v2613_v11  ;;  %7934 = vmatprep.mubr.msk.bf16.mxu1 %vm3781_vm15, %v9941_v46 }
 0x254   : > { %v2616_v59 = vmax.f32 %v2602_v42, 0.0  ;;  %v2603_v26 = vadd.f32 %v9787_v5, %v2577_v60  ;;  %v8385_v4 = vpack.c.bf16 %v2660_v63, %v2659_v29  ;;  %v2666_v8 = vmul.f32 %v9703_v22, %v2615_v6  ;;  %7932 = vmatprep.mubr.msk.bf16.mxu0 %vm3781_vm15, %v9941_v46 }
 0x255   : > { %v8388_v5 = vpack.c.bf16 %v2665_v3, %v2664_v37  ;;  %v2661_v22 = vmul.f32 %v2647_v36, %v2610_v51  ;;  %vm2783_vm14 = vcmask 568320   ;;  %v3415_v3 = vld [vmem:[%s10753_s5] sm:$0xff] }
 0x256   : > { %v2667_v44 = vmul.f32 %v9706_v10, %v2616_v59  ;;  %v2617_v56 = vmax.f32 %v2603_v26, 0.0  ;;  %2720 = vrot.lane.b32.xlu0 %v8385_v4, %s8920_s15  ;;  %v3417_v4 = vld [vmem:[%s10753_s5 + $0x10] sm:$0xff] }
 0x257   : > { %2724 = vrot.lane.b32.xlu1 %v8387_v41, %s8920_s15  ;;  %v8386_v10 = vpack.c.bf16 %v2661_v22, %v2661_v22 }
 0x258   : > { %v8389_v7 = vpack.c.bf16 %v2667_v44, %v2666_v8  ;;  %v2668_v50 = vmul.f32 %v2647_v36, %v2617_v56  ;;  %v3416_v44 = vld [vmem:[%s10753_s5 + $0x8] sm:$0xff] }
 0x25a   : > { %2726 = vrot.lane.b32.xlu0 %v8388_v5, %s8920_s15  ;;  %v8390_v43 = vpack.c.bf16 %v2668_v50, %v2668_v50  ;;  %v3418_v50 = vld [vmem:[%s10753_s5 + $0x18] sm:$0xff] }
 0x25b   : > { %2728 = vrot.lane.b32.xlu1 %v8389_v7, %s8920_s15 }
 0x25e   : > { %2722 = vrot.lane.b32.xlu0 %v8386_v10, %s8920_s15 }
 0x25f   : > { %2730 = vrot.lane.b32.xlu1 %v8390_v43, %s8920_s15 }
 0x2c1   : > { %v2717_v47 = vpop.permute.xlu1 %2716 }
 0x2c2   : > { %v2732_v48 = vrot.slane %v2717_v47, 4 }
 0x2c4   : > { %v2739_v49 = vsel %vm2738_vm2, %v2732_v48, %v2717_v47 }
 0x2c5   : > { %2763 = vst.msk [vmem:[#allocation3] sm:$0xff] %vm9837_vm3, %v2739_v49  ;;  %v2719_v53 = vpop.permute.xlu1 %2718 }
 0x2c6   : > { %v2733_v57 = vrot.slane %v2719_v53, 4 }
 0x2c8   : > { %v2741_v14 = vsel %vm2672_vm12, %v2732_v48, %v2733_v57  ;;  %v2721_v12 = vpop.permute.xlu0 %2720 }
 0x2c9   : > { %v9846_v45 = vsel %vm2738_vm2, %v2741_v14, %v2719_v53  ;;  %v2725_v18 = vpop.permute.xlu1 %2724  ;;  %v2734_v58 = vrot.slane %v2721_v12, 4 }
 0x2ca   : > { %v2735_v15 = vrot.slane %v2725_v18, 4 }
 0x2cb   : > { %v2743_v19 = vsel %vm2672_vm12, %v2733_v57, %v2734_v58 }
 0x2cc   : > { %v9848_v16 = vld [vmem:[#allocation3] sm:$0xff]  ;;  %v2746_v61 = vsel %vm2738_vm2, %v2735_v15, %v2725_v18  ;;  %v2744_v23 = vsel %vm2738_vm2, %v2743_v19, %v2721_v12  ;;  %v2727_v27 = vpop.permute.xlu0 %2726 }
 0x2cd   : > { %2780 = vst [vmem:[#allocation2] sm:$0xff] %v9848_v16  ;;  %2768 = vst.msk [vmem:[#allocation3 + $0x20] sm:$0xff] %vm9837_vm3, %v2746_v61  ;;  %3215 = vrot.lane.b32.xlu0 %v9848_v16, %s8913_s21  ;;  %v2729_v1 = vpop.permute.xlu1 %2728  ;;  %v2736_v17 = vrot.slane %v2727_v27, 4 }
 0x2ce   : > { %2782 = vst [vmem:[#allocation2 + $0x10] sm:$0xff] %v2744_v23  ;;  %v2737_v2 = vrot.slane %v2729_v1, 4 }
 0x2cf   : > { %v2747_v28 = vsel %vm2672_vm12, %v2735_v15, %v2736_v17 }
 0x2d0   : > { %v2749_v31 = vsel %vm2672_vm12, %v2736_v17, %v2737_v2  ;;  %v9861_v34 = vsel %vm2738_vm2, %v2747_v28, %v2727_v27  ;;  %v2723_v25 = vpop.permute.xlu0 %2722 }
 0x2d1   : > { %v2750_v55 = vsel %vm2738_vm2, %v2749_v31, %v2729_v1  ;;  %3145 = vrot.lane.b32.xlu0 %v9848_v16, %s8911_s28  ;;  %v2731_v20 = vpop.permute.xlu1 %2730  ;;  %v2745_v35 = vsel %vm2738_vm2, %v2734_v58, %v2723_v25 }
 0x2d2   : > { %2787 = vst [vmem:[#allocation2 + $0x2c] sm:$0xff] %v2750_v55  ;;  %v2751_v21 = vsel %vm2738_vm2, %v2737_v2, %v2731_v20  ;;  %2767 = vst.msk [vmem:[#allocation3 + $0x18] sm:$0xf] %vm2766_vm13, %v2745_v35 }
 0x2d3   : > { %2771 = vst.msk [vmem:[#allocation3 + $0x38] sm:$0xf] %vm2766_vm13, %v2751_v21 }
 0x2d4   : > { %v9868_v9 = vld [vmem:[#allocation3 + $0x20] sm:$0xff] }
 0x2d5   : > { %2785 = vst [vmem:[#allocation2 + $0x1c] sm:$0xff] %v9868_v9  ;;  %3077 = vrot.lane.b32.xlu0 %v9848_v16, %s8909_s29  ;;  %3223 = vrot.lane.b32.xlu1 %v9868_v9, %s8913_s21 }
 0x2d9   : > { %3009 = vrot.lane.b32.xlu0 %v9848_v16, %s8907_s27  ;;  %3153 = vrot.lane.b32.xlu1 %v9868_v9, %s8911_s28  ;;  %v2775_v62 = vld [vmem:[#allocation3 + $0x18] sm:$0xf] }
 0x2da   : > { %v2779_v24 = vld [vmem:[#allocation3 + $0x38] sm:$0xf]  ;;  %2784 = vst.msk [vmem:[#allocation2 + $0x18] sm:$0xf] %vm2783_vm14, %v2775_v62 }
 0x2db   : > { %2788 = vst.msk [vmem:[#allocation2 + $0x34] sm:$0xf] %vm2783_vm14, %v2779_v24  ;;  %v3202_v38 = vld [vmem:[#allocation3 + $0x18] sm:$0xff] }
 0x2dc   : > { %v3206_v33 = vld [vmem:[#allocation3 + $0x38] sm:$0xff] }
 0x2dd   : > { %2941 = vrot.lane.b32.xlu0 %v9848_v16, %s8905_s30  ;;  %3085 = vrot.lane.b32.xlu1 %v9868_v9, %s8909_s29  ;;  %v3064_v39 = vld [vmem:[#allocation3 + $0x18] sm:$0xf] }
 0x2de   : > { %v2996_v30 = vld [vmem:[#allocation3 + $0x18] sm:$0xf] }
 0x2df   : > { %v2928_v32 = vld [vmem:[#allocation3 + $0x18] sm:$0xf] }
 0x2e0   : > { %v3068_v36 = vld [vmem:[#allocation3 + $0x38] sm:$0xf] }
 0x2e1   : > { %3217 = vrot.lane.b32.xlu0 %v9846_v45, %s8913_s21  ;;  %3017 = vrot.lane.b32.xlu1 %v9868_v9, %s8907_s27  ;;  %v2860_v6 = vld [vmem:[#allocation3 + $0x18] sm:$0xf] }
 0x2e2   : > { %v3000_v42 = vld [vmem:[#allocation3 + $0x38] sm:$0xf] }
 0x2e3   : > { %v2792_v29 = vld [vmem:[#allocation3 + $0x18] sm:$0xf] }
 0x2e4   : > { %v2932_v63 = vld [vmem:[#allocation3 + $0x38] sm:$0xf] }
 0x2e5   : > { %3147 = vrot.lane.b32.xlu0 %v9846_v45, %s8911_s28  ;;  %2949 = vrot.lane.b32.xlu1 %v9868_v9, %s8905_s30  ;;  %v2864_v40 = vld [vmem:[#allocation3 + $0x38] sm:$0xf] }
 0x2e6   : > { %v2796_v51 = vld [vmem:[#allocation3 + $0x38] sm:$0xf] }
 0x2e9   : > { %3079 = vrot.lane.b32.xlu0 %v9846_v45, %s8909_s29  ;;  %3219 = vrot.lane.b32.xlu1 %v2744_v23, %s8913_s21 }
 0x2ed   : > { %3011 = vrot.lane.b32.xlu0 %v9846_v45, %s8907_s27  ;;  %3149 = vrot.lane.b32.xlu1 %v2744_v23, %s8911_s28 }
 0x2f1   : > { %2943 = vrot.lane.b32.xlu0 %v9846_v45, %s8905_s30  ;;  %3081 = vrot.lane.b32.xlu1 %v2744_v23, %s8909_s29 }
 0x2f5   : > { %2875 = vrot.lane.b32.xlu0 %v9846_v45, %s8903_s12  ;;  %3013 = vrot.lane.b32.xlu1 %v2744_v23, %s8907_s27 }
 0x2f9   : > { %2807 = vrot.lane.b32.xlu0 %v9846_v45, %s8900_s19  ;;  %2945 = vrot.lane.b32.xlu1 %v2744_v23, %s8905_s30 }
 0x2fd   : > { %3287 = vrot.lane.b32.xlu0 %v9846_v45, %s8915_s22  ;;  %2877 = vrot.lane.b32.xlu1 %v2744_v23, %s8903_s12 }
 0x301   : > { %3225 = vrot.lane.b32.xlu0 %v9861_v34, %s8913_s21  ;;  %2809 = vrot.lane.b32.xlu1 %v2744_v23, %s8900_s19 }
 0x305   : > { %3155 = vrot.lane.b32.xlu0 %v9861_v34, %s8911_s28  ;;  %3289 = vrot.lane.b32.xlu1 %v2744_v23, %s8915_s22 }
 0x309   : > { %3087 = vrot.lane.b32.xlu0 %v9861_v34, %s8909_s29  ;;  %3227 = vrot.lane.b32.xlu1 %v2750_v55, %s8913_s21 }
 0x30d   : > { %3019 = vrot.lane.b32.xlu0 %v9861_v34, %s8907_s27  ;;  %3157 = vrot.lane.b32.xlu1 %v2750_v55, %s8911_s28 }
 0x311   : > { %2951 = vrot.lane.b32.xlu0 %v9861_v34, %s8905_s30  ;;  %3089 = vrot.lane.b32.xlu1 %v2750_v55, %s8909_s29 }
 0x315   : > { %2883 = vrot.lane.b32.xlu0 %v9861_v34, %s8903_s12  ;;  %3021 = vrot.lane.b32.xlu1 %v2750_v55, %s8907_s27 }
 0x319   : > { %2815 = vrot.lane.b32.xlu0 %v9861_v34, %s8900_s19  ;;  %2953 = vrot.lane.b32.xlu1 %v2750_v55, %s8905_s30 }
 0x31d   : > { %2873 = vrot.lane.b32.xlu0 %v9848_v16, %s8903_s12  ;;  %2885 = vrot.lane.b32.xlu1 %v2750_v55, %s8903_s12 }
 0x321   : > { %3295 = vrot.lane.b32.xlu0 %v9861_v34, %s8915_s22  ;;  %2817 = vrot.lane.b32.xlu1 %v2750_v55, %s8900_s19 }
 0x325   : > { %3221 = vrot.lane.b32.xlu0 %v3202_v38, %s8913_s21  ;;  %2881 = vrot.lane.b32.xlu1 %v9868_v9, %s8903_s12 }
 0x329   : > { %2805 = vrot.lane.b32.xlu0 %v9848_v16, %s8900_s19  ;;  %3297 = vrot.lane.b32.xlu1 %v2750_v55, %s8915_s22 }
 0x32d   : > { %3151 = vrot.lane.b32.xlu0 %v3202_v38, %s8911_s28  ;;  %3229 = vrot.lane.b32.xlu1 %v3206_v33, %s8913_s21 }
 0x331   : > { %3285 = vrot.lane.b32.xlu0 %v9848_v16, %s8915_s22  ;;  %2813 = vrot.lane.b32.xlu1 %v9868_v9, %s8900_s19 }
 0x335   : > { %3083 = vrot.lane.b32.xlu0 %v3064_v39, %s8909_s29  ;;  %3159 = vrot.lane.b32.xlu1 %v3206_v33, %s8911_s28  ;;  %s8379_s28 = sshll.u32 %s8999_s17, 4 }
 0x336   : > { %s7678_s26 = scalar_lea.hbm %s10758_s10, %s8379_s28 }
 0x339   : > { %3015 = vrot.lane.b32.xlu0 %v2996_v30, %s8907_s27  ;;  %3293 = vrot.lane.b32.xlu1 %v9868_v9, %s8915_s22 }
 0x33d   : > { %2947 = vrot.lane.b32.xlu0 %v2928_v32, %s8905_s30  ;;  %3091 = vrot.lane.b32.xlu1 %v3068_v36, %s8909_s29 }
 0x33f   : > { %v3216_v11 = vpop.permute.xlu0 %3215 }
 0x340   : > { %v3231_v7 = vrot.slane %v3216_v11, 4 }
 0x341   : > { %2879 = vrot.lane.b32.xlu0 %v2860_v6, %s8903_s12  ;;  %3023 = vrot.lane.b32.xlu1 %v3000_v42, %s8907_s27 }
 0x343   : > { %v3146_v60 = vpop.permute.xlu0 %3145 }
 0x344   : > { %v3161_v0 = vrot.slane %v3146_v60, 4 }
 0x345   : > { %2811 = vrot.lane.b32.xlu0 %v2792_v29, %s8900_s19  ;;  %2955 = vrot.lane.b32.xlu1 %v2932_v63, %s8905_s30 }
 0x347   : > { %v3078_v52 = vpop.permute.xlu0 %3077  ;;  %v9967_v54 = vpop.permute.xlu1 %3223 }
 0x348   : > { %v3093_v12 = vrot.slane %v3078_v52, 4 }
 0x349   : > { %3291 = vrot.lane.b32.xlu0 %v3202_v38, %s8915_s22  ;;  %2887 = vrot.lane.b32.xlu1 %v2864_v40, %s8903_s12 }
 0x34b   : > { %v3010_v59 = vpop.permute.xlu0 %3009  ;;  %v9974_v26 = vpop.permute.xlu1 %3153 }
 0x34c   : > { %v3025_v1 = vrot.slane %v3010_v59, 4 }
 0x34d   : > { %3421 = vperm.xlu0 %8605, %v3415_v3   ;;  %2819 = vrot.lane.b32.xlu1 %v2796_v51, %s8900_s19 }
 0x34f   : > { %v2942_v41 = vpop.permute.xlu0 %2941  ;;  %v9980_v8 = vpop.permute.xlu1 %3085 }
 0x350   : > { %v2957_v21 = vrot.slane %v2942_v41, 4 }
 0x351   : > { %3431 = vperm.xlu0 %8605, %v3417_v4   ;;  %3299 = vrot.lane.b32.xlu1 %v3206_v33, %s8915_s22  ;;  %s8922_s22 = smov [#allocation15]  }
 0x352   : > { %s8812_s20 = sshll.u32 %s8922_s22, 4  ;;  %s8813_s20 = int_to_ptr.vmem [resolvable:$false] %s8812_s20 }
 0x353   : > { %v3218_v56 = vpop.permute.xlu0 %3217  ;;  %v9986_v37 = vpop.permute.xlu1 %3017  ;;  %s8814_s17 = scalar_lea.vmem %s8813_s20, 32 }
 0x354   : > { %v3232_v5 = vrot.slane %v3218_v56, 4 }
 0x355   : > { %3426 = vperm.xlu1 %8604, %v3416_v44  }
 0x356   : > { %v3239_v22 = vsel %vm2672_vm12, %v3231_v7, %v3232_v5  ;;  %v3235_v7 = vrot.slane %v9967_v54, 4 }
 0x357   : > { %v9993_v10 = vsel %vm2121_vm10, %v3216_v11, %v3239_v22  ;;  %v3148_v43 = vpop.permute.xlu0 %3147  ;;  %v9995_v47 = vpop.permute.xlu1 %2949 }
 0x358   : > { %v3162_v48 = vrot.slane %v3148_v43, 4 }
 0x359   : > { %3436 = vperm.xlu1 %8604, %v3418_v50  }
 0x35a   : > { %v3169_v49 = vsel %vm2672_vm12, %v3161_v0, %v3162_v48 }
 0x35b   : > { %v9999_v53 = vsel %vm1880_vm9, %v3146_v60, %v3169_v49  ;;  %v3080_v57 = vpop.permute.xlu0 %3079  ;;  %v10001_v14 = vpop.permute.xlu1 %3219 }
 0x35c   : > { %v3094_v18 = vrot.slane %v3080_v57, 4  ;;  %v3233_v58 = vrot.slane %v10001_v14, 4 }
 0x35e   : > { %v3101_v15 = vsel %vm2672_vm12, %v3093_v12, %v3094_v18  ;;  %v3241_v16 = vsel %vm2672_vm12, %v3232_v5, %v3233_v58 }
 0x35f   : > { %v10009_v19 = vsel %vm1639_vm8, %v3078_v52, %v3101_v15  ;;  %v10012_v61 = vsel %vm2121_vm10, %v3218_v56, %v3241_v16  ;;  %v3012_v23 = vpop.permute.xlu0 %3011  ;;  %v10014_v27 = vpop.permute.xlu1 %3149 }
 0x360   : > { %v3026_v17 = vrot.slane %v3012_v23, 4  ;;  %v3163_v2 = vrot.slane %v10014_v27, 4 }
 0x362   : > { %v3033_v28 = vsel %vm2672_vm12, %v3025_v1, %v3026_v17  ;;  %v3171_v31 = vsel %vm2672_vm12, %v3162_v48, %v3163_v2  ;;  %v3165_v48 = vrot.slane %v9974_v26, 4 }
 0x363   : > { %v10022_v55 = vsel %vm1401_vm7, %v3010_v59, %v3033_v28  ;;  %v10025_v25 = vsel %vm1880_vm9, %v3148_v43, %v3171_v31  ;;  %v2944_v20 = vpop.permute.xlu0 %2943  ;;  %v10027_v35 = vpop.permute.xlu1 %3081  ;;  %v3097_v31 = vrot.slane %v9980_v8, 4 }
 0x364   : > { %v2958_v9 = vrot.slane %v2944_v20, 4  ;;  %v3095_v62 = vrot.slane %v10027_v35, 4 }
 0x366   : > { %v2965_v24 = vsel %vm2672_vm12, %v2957_v21, %v2958_v9  ;;  %v3103_v38 = vsel %vm2672_vm12, %v3094_v18, %v3095_v62 }
 0x367   : > { %v10035_v33 = vsel %vm1163_vm6, %v2942_v41, %v2965_v24  ;;  %v10038_v39 = vsel %vm1639_vm8, %v3080_v57, %v3103_v38  ;;  %v10040_v30 = vpop.permute.xlu0 %2875  ;;  %v10042_v32 = vpop.permute.xlu1 %3013 }
 0x368   : > { %v3027_v36 = vrot.slane %v10042_v32, 4  ;;  %v2890_v59 = vrot.slane %v10040_v30, 4 }
 0x36a   : > { %v3035_v11 = vsel %vm2672_vm12, %v3026_v17, %v3027_v36 }
 0x36b   : > { %v10049_v6 = vsel %vm1401_vm7, %v3012_v23, %v3035_v11  ;;  %v10051_v42 = vpop.permute.xlu0 %2807  ;;  %v10053_v60 = vpop.permute.xlu1 %2945 }
 0x36c   : > { %v2959_v29 = vrot.slane %v10053_v60, 4  ;;  %v2822_v5 = vrot.slane %v10051_v42, 4 }
 0x36e   : > { %v2967_v63 = vsel %vm2672_vm12, %v2958_v9, %v2959_v29 }
 0x36f   : > { %v10060_v52 = vsel %vm1163_vm6, %v2944_v20, %v2967_v63  ;;  %v10062_v40 = vpop.permute.xlu0 %3287  ;;  %v10064_v3 = vpop.permute.xlu1 %2877 }
 0x370   : > { %v2891_v51 = vrot.slane %v10064_v3, 4  ;;  %v3302_v49 = vrot.slane %v10062_v40, 4 }
 0x372   : > { %v2899_v4 = vsel %vm2672_vm12, %v2890_v59, %v2891_v51 }
 0x373   : > { %v10075_v41 = vsel %vm925_vm5, %v10040_v30, %v2899_v4  ;;  %v3226_v44 = vpop.permute.xlu0 %3225  ;;  %v10077_v56 = vpop.permute.xlu1 %2809 }
 0x374   : > { %v3236_v22 = vrot.slane %v3226_v44, 4  ;;  %v2823_v50 = vrot.slane %v10077_v56, 4 }
 0x376   : > { %v3246_v43 = vsel %vm2672_vm12, %v3235_v7, %v3236_v22  ;;  %v2831_v0 = vsel %vm2672_vm12, %v2822_v5, %v2823_v50  ;;  %v3029_v7 = vrot.slane %v9986_v37, 4 }
 0x377   : > { %v3247_v57 = vsel %vm2121_vm10, %v9967_v54, %v3246_v43  ;;  %v10094_v12 = vsel %vm502_vm1, %v10051_v42, %v2831_v0  ;;  %v3156_v18 = vpop.permute.xlu0 %3155  ;;  %v10096_v15 = vpop.permute.xlu1 %3289 }
 0x378   : > { %v3166_v16 = vrot.slane %v3156_v18, 4  ;;  %v3303_v23 = vrot.slane %v10096_v15, 4  ;;  %v7918_v1 = vcombine.low %v9993_v10, %v3247_v57  ;;  %v7919_v17 = vcombine.high %v9993_v10, %v3247_v57 }
 0x37a   : > { %v3176_v28 = vsel %vm2672_vm12, %v3165_v48, %v3166_v16  ;;  %v3311_v54 = vsel %vm2672_vm12, %v3302_v49, %v3303_v23  ;;  %3788 = vmatprep.subr.bf16.mxu0 %v7919_v17 }
 0x37b   : > { %v3177_v20 = vsel %vm1880_vm9, %v9974_v26, %v3176_v28  ;;  %v10112_v21 = vsel %vm2362_vm11, %v10062_v40, %v3311_v54  ;;  %v3088_v9 = vpop.permute.xlu0 %3087  ;;  %v10114_v10 = vpop.permute.xlu1 %3227  ;;  %3789 = vmatpush1.bf16.msra.mxu0 %v7918_v1 }
 0x37c   : > { %v3098_v24 = vrot.slane %v3088_v9, 4  ;;  %v3237_v38 = vrot.slane %v10114_v10, 4  ;;  %v7911_v11 = vcombine.low %v9999_v53, %v3177_v20  ;;  %v7912_v63 = vcombine.high %v9999_v53, %v3177_v20 }
 0x37e   : > { %v3107_v4 = vsel %vm2672_vm12, %v3097_v31, %v3098_v24  ;;  %v3248_v26 = vsel %vm2672_vm12, %v3236_v22, %v3237_v38  ;;  %3790 = vmatprep.subr.bf16.mxu0 %v7912_v63 }
 0x37f   : > { %v3108_v43 = vsel %vm1639_vm8, %v9980_v8, %v3107_v4  ;;  %v3249_v0 = vsel %vm2121_vm10, %v3226_v44, %v3248_v26  ;;  %v3020_v48 = vpop.permute.xlu0 %3019  ;;  %v10127_v57 = vpop.permute.xlu1 %3157  ;;  %3791 = vmatpush1.bf16.msra.mxu0 %v7911_v11  ;;  %v2961_v44 = vrot.slane %v9995_v47, 4 }
 0x380   : > { %v3030_v1 = vrot.slane %v3020_v48, 4  ;;  %v3167_v53 = vrot.slane %v10127_v57, 4  ;;  %v7904_v17 = vcombine.low %v10009_v19, %v3108_v43  ;;  %v7905_v28 = vcombine.high %v10009_v19, %v3108_v43 }
 0x381   : > { %v7920_v22 = vcombine.low %v10012_v61, %v3249_v0  ;;  %v7921_v54 = vcombine.high %v10012_v61, %v3249_v0 }
 0x382   : > { %v3039_v31 = vsel %vm2672_vm12, %v3029_v7, %v3030_v1  ;;  %v3178_v8 = vsel %vm2672_vm12, %v3166_v16, %v3167_v53  ;;  %3792 = vmatprep.subr.bf16.mxu0 %v7905_v28 }
 0x383   : > { %v3040_v20 = vsel %vm1401_vm7, %v9986_v37, %v3039_v31  ;;  %v3179_v11 = vsel %vm1880_vm9, %v3156_v18, %v3178_v8  ;;  %v2952_v63 = vpop.permute.xlu0 %2951  ;;  %v10142_v19 = vpop.permute.xlu1 %3089  ;;  %3841 = vmatprep.subr.bf16.mxu1 %v7921_v54  ;;  %3793 = vmatpush1.bf16.msra.mxu0 %v7904_v17 }
 0x384   : > { %v2962_v61 = vrot.slane %v2952_v63, 4  ;;  %v3099_v4 = vrot.slane %v10142_v19, 4  ;;  %3842 = vmatpush1.bf16.msra.mxu1 %v7920_v22  ;;  %v7897_v26 = vcombine.low %v10022_v55, %v3040_v20  ;;  %v7898_v16 = vcombine.high %v10022_v55, %v3040_v20 }
 0x385   : > { %v7913_v7 = vcombine.low %v10025_v25, %v3179_v11  ;;  %v7914_v43 = vcombine.high %v10025_v25, %v3179_v11 }
 0x386   : > { %v2971_v37 = vsel %vm2672_vm12, %v2961_v44, %v2962_v61  ;;  %v3109_v18 = vsel %vm2672_vm12, %v3098_v24, %v3099_v4  ;;  %3794 = vmatprep.subr.bf16.mxu0 %v7898_v16 }
 0x387   : > { %v2972_v0 = vsel %vm1163_vm6, %v9995_v47, %v2971_v37  ;;  %v3110_v17 = vsel %vm1639_vm8, %v3088_v9, %v3109_v18  ;;  %v2884_v28 = vpop.permute.xlu0 %2883  ;;  %v10156_v22 = vpop.permute.xlu1 %3021  ;;  %3843 = vmatprep.subr.bf16.mxu1 %v7914_v43  ;;  %3795 = vmatpush1.bf16.msra.mxu0 %v7897_v26 }
 0x388   : > { %v3031_v55 = vrot.slane %v10156_v22, 4  ;;  %3844 = vmatpush1.bf16.msra.mxu1 %v7913_v7  ;;  %v7890_v25 = vcombine.low %v10035_v33, %v2972_v0  ;;  %v7891_v54 = vcombine.high %v10035_v33, %v2972_v0  ;;  %v7906_v24 = vcombine.low %v10038_v39, %v3110_v17 }
 0x389   : > { %v7907_v31 = vcombine.high %v10038_v39, %v3110_v17  ;;  %v2894_v11 = vrot.slane %v2884_v28, 4 }
 0x38a   : > { %v3041_v47 = vsel %vm2672_vm12, %v3030_v1, %v3031_v55  ;;  %3796 = vmatprep.subr.bf16.mxu0 %v7891_v54 }
 0x38b   : > { %v3042_v9 = vsel %vm1401_vm7, %v3020_v48, %v3041_v47  ;;  %v10167_v8 = vpop.permute.xlu0 %2815  ;;  %v10169_v44 = vpop.permute.xlu1 %2953  ;;  %3845 = vmatprep.subr.bf16.mxu1 %v7907_v31  ;;  %3797 = vmatpush1.bf16.msra.mxu0 %v7890_v25 }
 0x38c   : > { %v2963_v20 = vrot.slane %v10169_v44, 4  ;;  %3846 = vmatpush1.bf16.msra.mxu1 %v7906_v24  ;;  %v7899_v33 = vcombine.low %v10049_v6, %v3042_v9  ;;  %v7900_v39 = vcombine.high %v10049_v6, %v3042_v9  ;;  %v2826_v54 = vrot.slane %v10167_v8, 4 }
 0x38e   : > { %v2973_v1 = vsel %vm2672_vm12, %v2962_v61, %v2963_v20  ;;  %3847 = vmatprep.subr.bf16.mxu1 %v7900_v39 }
 0x38f   : > { %v2974_v48 = vsel %vm1163_vm6, %v2952_v63, %v2973_v1  ;;  %v2874_v26 = vpop.permute.xlu0 %2873  ;;  %v10178_v16 = vpop.permute.xlu1 %2885 }
 0x390   : > { %v2889_v7 = vrot.slane %v2874_v26, 4  ;;  %v2895_v43 = vrot.slane %v10178_v16, 4  ;;  %3848 = vmatpush1.bf16.msra.mxu1 %v7899_v33  ;;  %v7892_v37 = vcombine.low %v10060_v52, %v2974_v48  ;;  %v7893_v18 = vcombine.high %v10060_v52, %v2974_v48 }
 0x392   : > { %v2897_v6 = vsel %vm2672_vm12, %v2889_v7, %v2890_v59  ;;  %v2905_v61 = vsel %vm2672_vm12, %v2894_v11, %v2895_v43  ;;  %3849 = vmatprep.subr.bf16.mxu1 %v7893_v18 }
 0x393   : > { %v2898_v63 = vsel %vm925_vm5, %v2874_v26, %v2897_v6  ;;  %v2906_v0 = vsel %vm925_vm5, %v2884_v28, %v2905_v61  ;;  %v10191_v17 = vpop.permute.xlu0 %3295  ;;  %v10193_v25 = vpop.permute.xlu1 %2817 }
 0x394   : > { %v2827_v52 = vrot.slane %v10193_v25, 4  ;;  %3850 = vmatpush1.bf16.msra.mxu1 %v7892_v37  ;;  %v7885_v30 = vcombine.low %v10075_v41, %v2906_v0  ;;  %v7886_v59 = vcombine.high %v10075_v41, %v2906_v0  ;;  %v3306_v7 = vrot.slane %v10191_v17, 4 }
 0x396   : > { %v2837_v24 = vsel %vm2672_vm12, %v2826_v54, %v2827_v52  ;;  %3851 = vmatprep.subr.bf16.mxu1 %v7886_v59 }
 0x397   : > { %v2838_v28 = vsel %vm502_vm1, %v10167_v8, %v2837_v24  ;;  %v3222_v31 = vpop.permute.xlu0 %3221  ;;  %v2882_v47 = vpop.permute.xlu1 %2881  ;;  %v7871_v24 = vcombine.low %v9846_v45, %v9861_v34 }
 0x398   : > { %v3234_v9 = vrot.slane %v3222_v31, 4  ;;  %v2893_v33 = vrot.slane %v2882_v47, 4  ;;  %3852 = vmatpush1.bf16.msra.mxu1 %v7885_v30  ;;  %v7878_v39 = vcombine.low %v10094_v12, %v2838_v28  ;;  %v7879_v1 = vcombine.high %v10094_v12, %v2838_v28 }
 0x39a   : > { %v3243_v41 = vsel %vm2672_vm12, %v3233_v58, %v3234_v9  ;;  %v3245_v48 = vsel %vm2121_vm10, %v3222_v31, %v3234_v9  ;;  %v2903_v26 = vsel %vm2672_vm12, %v2893_v33, %v2894_v11  ;;  %3853 = vmatprep.subr.bf16.mxu1 %v7879_v1  ;;  %v7872_v58 = vcombine.high %v9846_v45, %v9861_v34 }
 0x39b   : > { %v10216_v37 = vsel %vm2121_vm10, %v10001_v14, %v3243_v41  ;;  %3264 = vst.msk [vmem:[#allocation2 + $0x1a0] sm:$0xf] %vm2783_vm14, %v3245_v48  ;;  %v2904_v18 = vsel %vm925_vm5, %v2882_v47, %v2903_v26  ;;  %v2806_v12 = vpop.permute.xlu0 %2805  ;;  %v10220_v6 = vpop.permute.xlu1 %3297  ;;  %v10258_v26 = vld [vmem:[#allocation9] ss:$8 sps:$4 sm:$0xff]  }
 0x39c   : > { %v2821_v61 = vrot.slane %v2806_v12, 4  ;;  %v3307_v11 = vrot.slane %v10220_v6, 4  ;;  %3854 = vmatpush1.bf16.msra.mxu1 %v7878_v39  ;;  %v7883_v0 = vcombine.low %v2898_v63, %v2904_v18  ;;  %v7884_v30 = vcombine.high %v2898_v63, %v2904_v18 }
 0x39d   : > { %3855 = vmatprep.subr.bf16.mxu1 %v7872_v58 }
 0x39e   : > { %v2829_v14 = vsel %vm2672_vm12, %v2821_v61, %v2822_v5  ;;  %v3318_v59 = vsel %vm2672_vm12, %v3306_v7, %v3307_v11  ;;  %3798 = vmatprep.subr.bf16.mxu0 %v7884_v30 }
 0x39f   : > { %v2830_v28 = vsel %vm502_vm1, %v2806_v12, %v2829_v14  ;;  %v3319_v63 = vsel %vm2362_vm11, %v10191_v17, %v3318_v59  ;;  %v3152_v31 = vpop.permute.xlu0 %3151  ;;  %v3230_v47 = vpop.permute.xlu1 %3229  ;;  %3799 = vmatpush1.bf16.msra.mxu0 %v7883_v0  ;;  %v10260_v12 = vld [vmem:[#allocation9 + $0x14] ss:$8 sps:$4 sm:$0xff]  }
 0x3a0   : > { %v3164_v42 = vrot.slane %v3152_v31, 4  ;;  %v3238_v5 = vrot.slane %v3230_v47, 4  ;;  %3856 = vmatpush1.bf16.msra.mxu1 %v7871_v24  ;;  %v7927_v9 = vcombine.low %v10112_v21, %v3319_v63  ;;  %v7928_v33 = vcombine.high %v10112_v21, %v3319_v63 }
 0x3a2   : > { %v3173_v45 = vsel %vm2672_vm12, %v3163_v2, %v3164_v42  ;;  %v3175_v34 = vsel %vm1880_vm9, %v3152_v31, %v3164_v42  ;;  %v3250_v39 = vsel %vm2672_vm12, %v3237_v38, %v3238_v5  ;;  %v3252_v1 = vsel %vm2121_vm10, %v3230_v47, %v3238_v5  ;;  %3871 = vmatprep.subr.bf16.mxu1 %v7928_v33  ;;  %v10291_v5 = vld [vmem:[#allocation9 + $0x10] ss:$8 sps:$4 sm:$0xff]  }
 0x3a3   : > { %v10250_v41 = vsel %vm1880_vm9, %v10014_v27, %v3173_v45  ;;  %3194 = vst.msk [vmem:[#allocation2 + $0x168] sm:$0xf] %vm2783_vm14, %v3175_v34  ;;  %v10255_v21 = vsel %vm2121_vm10, %v10114_v10, %v3250_v39  ;;  %3268 = vst.msk [vmem:[#allocation2 + $0x1bc] sm:$0xf] %vm2783_vm14, %v3252_v1  ;;  %v3286_v2 = vpop.permute.xlu0 %3285  ;;  %v2814_v48 = vpop.permute.xlu1 %2813  ;;  %v8620_v33 = vld [vmem:[#allocation2] ss:$28 sps:$4 sm:$0xff]  }
 0x3a4   : > { %v3301_v38 = vrot.slane %v3286_v2, 4  ;;  %v2825_v18 = vrot.slane %v2814_v48, 4  ;;  %3872 = vmatpush2.bf16.msra.mxu1 %v7927_v9 }
 0x3a5   : > { %3947 = vmatprep.subr.bf16.mxu1 %v9829_v13 }
 0x3a6   : > { %v3309_v27 = vsel %vm2672_vm12, %v3301_v38, %v3302_v49  ;;  %v2835_v10 = vsel %vm2672_vm12, %v2825_v18, %v2826_v54  ;;  %v8622_v49 = vld [vmem:[#allocation2 + $0x4] ss:$28 sps:$4 sm:$0xff]   ;;  %v7923_v18 = vcombine.high %v10216_v37, %v10255_v21 }
 0x3a7   : > { %v3310_v58 = vsel %vm2362_vm11, %v3286_v2, %v3309_v27  ;;  %v2836_v61 = vsel %vm502_vm1, %v2814_v48, %v2835_v10  ;;  %v3084_v0 = vpop.permute.xlu0 %3083  ;;  %v3160_v30 = vpop.permute.xlu1 %3159  ;;  %3874 = vmatmul.mubr.bf16.vlgmr.msra.gmra.mxu1 %v10258_v26 }
 0x3a8   : > { %v3096_v14 = vrot.slane %v3084_v0, 4  ;;  %3124 = vst.msk [vmem:[#allocation2 + $0x130] sm:$0xf] %vm2783_vm14, %v3084_v0  ;;  %v3168_v59 = vrot.slane %v3160_v30, 4  ;;  %v7876_v24 = vcombine.low %v2830_v28, %v2836_v61  ;;  %v7877_v40 = vcombine.high %v2830_v28, %v2836_v61  ;;  %7935 = vmatprep.mubr.msk.bf16.mxu1 %vm3781_vm15, %v10260_v12 }
 0x3aa   : > { %v3105_v8 = vsel %vm2672_vm12, %v3095_v62, %v3096_v14  ;;  %v3180_v54 = vsel %vm2672_vm12, %v3167_v53, %v3168_v59  ;;  %v3182_v63 = vsel %vm1880_vm9, %v3160_v30, %v3168_v59  ;;  %v8619_v31 = vld [vmem:[#allocation2 + $0x1a0] ss:$28 sps:$4 sm:$0xff]   ;;  %3800 = vmatprep.subr.bf16.mxu0 %v7877_v40 }
 0x3ab   : > { %v10284_v47 = vsel %vm1639_vm8, %v10027_v35, %v3105_v8  ;;  %v10288_v28 = vsel %vm1880_vm9, %v10127_v57, %v3180_v54  ;;  %3198 = vst.msk [vmem:[#allocation2 + $0x184] sm:$0xf] %vm2783_vm14, %v3182_v63  ;;  %v3016_v42 = vpop.permute.xlu0 %3015  ;;  %v3294_v62 = vpop.permute.xlu1 %3293  ;;  %3801 = vmatpush1.bf16.msra.mxu0 %v7876_v24  ;;  %3948 = vmatpush1.bf16.msra.mxu1 %v8619_v31 }
 0x3ac   : > { %v3028_v53 = vrot.slane %v3016_v42, 4  ;;  %3056 = vst.msk [vmem:[#allocation2 + $0xf8] sm:$0xf] %vm2783_vm14, %v3016_v42  ;;  %v3305_v9 = vrot.slane %v3294_v62, 4  ;;  %3802 = vmatprep.subr.bf16.mxu0 %v8622_v49  ;;  %3949 = vmatprep.subr.bf16.mxu1 %v9829_v13  ;;  %v7916_v30 = vcombine.high %v10250_v41, %v10288_v28 }
 0x3ae   : > { %v3037_v35 = vsel %vm2672_vm12, %v3027_v36, %v3028_v53  ;;  %v3316_v57 = vsel %vm2672_vm12, %v3305_v9, %v3306_v7 }
 0x3af   : > { %v10303_v45 = vsel %vm1401_vm7, %v10042_v32, %v3037_v35  ;;  %v3317_v34 = vsel %vm2362_vm11, %v3294_v62, %v3316_v57  ;;  %v2948_v39 = vpop.permute.xlu0 %2947  ;;  %v3092_v1 = vpop.permute.xlu1 %3091  ;;  %3884 = vmatmul.mubr.bf16.gmra.mxu1 %v10291_v5  ;;  %3803 = vmatpush1.bf16.msra.mxu0 %v8620_v33 }
 0x3b0   : > { %v2960_v2 = vrot.slane %v2948_v39, 4  ;;  %2988 = vst.msk [vmem:[#allocation2 + $0xc0] sm:$0xf] %vm2783_vm14, %v2948_v39  ;;  %v3100_v48 = vrot.slane %v3092_v1, 4  ;;  %3128 = vst.msk [vmem:[#allocation2 + $0x14c] sm:$0xf] %vm2783_vm14, %v3092_v1  ;;  %v7925_v36 = vcombine.low %v3310_v58, %v3317_v34  ;;  %v7926_v17 = vcombine.high %v3310_v58, %v3317_v34  ;;  %7938 = vmatprep.mubr.msk.bf16.mxu1 %vm3781_vm15, %v9941_v46 }
 0x3b2   : > { %v2969_v32 = vsel %vm2672_vm12, %v2959_v29, %v2960_v2  ;;  %v3111_v7 = vsel %vm2672_vm12, %v3099_v4, %v3100_v48  ;;  %v8625_v38 = vld [vmem:[#allocation2 + $0x168] ss:$28 sps:$4 sm:$0xff]   ;;  %3818 = vmatprep.subr.bf16.mxu0 %v7926_v17 }
 0x3b3   : > { %v10321_v27 = vsel %vm1163_vm6, %v10053_v60, %v2969_v32  ;;  %v3112_v10 = vsel %vm1639_vm8, %v10142_v19, %v3111_v7  ;;  %v2880_v58 = vpop.permute.xlu0 %2879  ;;  %v3024_v61 = vpop.permute.xlu1 %3023  ;;  %3819 = vmatpush2.bf16.msra.mxu0 %v7925_v36  ;;  %3950 = vmatpush1.bf16.msra.mxu1 %v8625_v38  ;;  %v7922_v60 = vcombine.low %v10216_v37, %v10255_v21  ;;  %v8632_v36 = vld [vmem:[#allocation2 + $0x18] ss:$28 sps:$4 sm:$0xff]   ;;  %v4222_v17 = vld [vmem:[#allocation10 + $0x5c0] sm:$0xff] }
 0x3b4   : > { %v2892_v29 = vrot.slane %v2880_v58, 4  ;;  %2920 = vst.msk [vmem:[#allocation2 + $0x88] sm:$0xf] %vm2783_vm14, %v2880_v58  ;;  %v3032_v0 = vrot.slane %v3024_v61, 4  ;;  %3060 = vst.msk [vmem:[#allocation2 + $0x114] sm:$0xf] %vm2783_vm14, %v3024_v61  ;;  %3894 = vmatprep.subr.bf16.mxu0 %v7923_v18  ;;  %3951 = vmatprep.subr.bf16.mxu1 %v9829_v13  ;;  %v7909_v49 = vcombine.high %v10284_v47, %v3112_v10 }
 0x3b5   : > { %v4226_v32 = vld [vmem:[#allocation10 + $0x5e0] sm:$0xff]  ;;  %v8636_v38 = vld [vmem:[#allocation2 + $0x14] ss:$28 sps:$4 sm:$0xff]  }
 0x3b6   : > { %v2901_v19 = vsel %vm2672_vm12, %v2891_v51, %v2892_v29  ;;  %v3043_v4 = vsel %vm2672_vm12, %v3031_v55, %v3032_v0  ;;  %3821 = vmatmul.mubr.bf16.vlgmr.msra.gmra.mxu0 %v10258_v26  ;;  %v8125_v18 = vcombine.high %v4222_v17, %v4226_v32  ;;  %v8634_v58 = vld [vmem:[#allocation2 + $0x10] ss:$28 sps:$4 sm:$0xff]   ;;  %v8124_v61 = vcombine.low %v4222_v17, %v4226_v32 }
 0x3b7   : > { %v10341_v14 = vsel %vm925_vm5, %v10064_v3, %v2901_v19  ;;  %v3044_v37 = vsel %vm1401_vm7, %v10156_v22, %v3043_v4  ;;  %v2812_v21 = vpop.permute.xlu0 %2811  ;;  %v2956_v59 = vpop.permute.xlu1 %2955  ;;  %v8627_v24 = vld [vmem:[#allocation2 + $0x130] ss:$28 sps:$4 sm:$0xff]   ;;  %3895 = vmatpush1.bf16.msra.mxu0 %v7922_v60  ;;  %7933 = vmatprep.mubr.msk.bf16.mxu0 %vm3781_vm15, %v10260_v12  ;;  %v7915_v3 = vcombine.low %v10250_v41, %v10288_v28 }
 0x3b8   : > { %v2824_v51 = vrot.slane %v2812_v21, 4  ;;  %2852 = vst.msk [vmem:[#allocation2 + $0x50] sm:$0xf] %vm2783_vm14, %v2812_v21  ;;  %v2964_v55 = vrot.slane %v2956_v59, 4  ;;  %2992 = vst.msk [vmem:[#allocation2 + $0xdc] sm:$0xf] %vm2783_vm14, %v2956_v59  ;;  %3896 = vmatprep.subr.bf16.mxu0 %v7916_v30  ;;  %3952 = vmatpush1.bf16.msra.mxu1 %v8627_v24  ;;  %v7902_v42 = vcombine.high %v10303_v45, %v3044_v37 }
 0x3b9   : > { %3953 = vmatprep.subr.bf16.mxu1 %v9829_v13  ;;  %v7901_v33 = vcombine.low %v10303_v45, %v3044_v37  ;;  %v4094_v29 = vld [vmem:[#allocation10 + $0x1c0] sm:$0xff] }
 0x3ba   : > { %v2833_v22 = vsel %vm2672_vm12, %v2823_v50, %v2824_v51  ;;  %v2975_v40 = vsel %vm2672_vm12, %v2963_v20, %v2964_v55  ;;  %v7908_v20 = vcombine.low %v10284_v47, %v3112_v10  ;;  %v4218_v10 = vld [vmem:[#allocation10 + $0x5a0] sm:$0xff] }
 0x3bb   : > { %v10361_v8 = vsel %vm502_vm1, %v10077_v56, %v2833_v22  ;;  %v2976_v54 = vsel %vm1163_vm6, %v10169_v44, %v2975_v40  ;;  %v3292_v41 = vpop.permute.xlu0 %3291  ;;  %v2888_v63 = vpop.permute.xlu1 %2887  ;;  %v8628_v31 = vld [vmem:[#allocation2 + $0xf8] ss:$28 sps:$4 sm:$0xff]   ;;  %3897 = vmatpush1.bf16.msra.mxu0 %v7915_v3  ;;  %v4098_v0 = vld [vmem:[#allocation10 + $0x1e0] sm:$0xff]  ;;  %vm7654_vm6 = vcmask 73728  }
 0x3bc   : > { %v3304_v50 = vrot.slane %v3292_v41, 4  ;;  %v2896_v28 = vrot.slane %v2888_v63, 4  ;;  %2924 = vst.msk [vmem:[#allocation2 + $0xa4] sm:$0xf] %vm2783_vm14, %v2888_v63  ;;  %3898 = vmatprep.subr.bf16.mxu0 %v7909_v49  ;;  %3954 = vmatpush1.bf16.msra.mxu1 %v8628_v31  ;;  %v7894_v39 = vcombine.low %v10321_v27, %v2976_v54  ;;  %v4206_v4 = vld [vmem:[#allocation10 + $0x540] sm:$0xff]  ;;  %v7996_v22 = vcombine.low %v4094_v29, %v4098_v0 }
 0x3bd   : > { %3955 = vmatprep.subr.bf16.mxu1 %v9829_v13  ;;  %v4210_v30 = vld [vmem:[#allocation10 + $0x560] sm:$0xff] }
 0x3be   : > { %v3313_v56 = vsel %vm2672_vm12, %v3303_v23, %v3304_v50  ;;  %v3315_v44 = vsel %vm2362_vm11, %v3292_v41, %v3304_v50  ;;  %v2907_v62 = vsel %vm2672_vm12, %v2895_v43, %v2896_v28  ;;  %3831 = vmatmul.mubr.bf16.gmra.mxu0 %v10291_v5  ;;  %v4086_v59 = vld [vmem:[#allocation10 + $0x180] sm:$0xff]  ;;  %v8109_v51 = vcombine.high %v4206_v4, %v4210_v30 }
 0x3bf   : > { %v10379_v53 = vsel %vm2362_vm11, %v10096_v15, %v3313_v56  ;;  %3334 = vst.msk [vmem:[#allocation2 + $0x1d8] sm:$0xf] %vm2783_vm14, %v3315_v44  ;;  %v2908_v47 = vsel %vm925_vm5, %v10178_v16, %v2907_v62  ;;  %v2820_v23 = vpop.permute.xlu1 %2819  ;;  %v8629_v9 = vld [vmem:[#allocation2 + $0xc0] ss:$28 sps:$4 sm:$0xff]   ;;  %3899 = vmatpush1.bf16.msra.mxu0 %v7908_v20  ;;  %7936 = vmatprep.mubr.msk.bf16.mxu0 %vm3781_vm15, %v9941_v46  ;;  %v4090_v24 = vld [vmem:[#allocation10 + $0x1a0] sm:$0xff]  ;;  %vm6558_vm5 = vcmask 572416  }
 0x3c0   : > { %v2828_v43 = vrot.slane %v2820_v23, 4  ;;  %2856 = vst.msk [vmem:[#allocation2 + $0x6c] sm:$0xf] %vm2783_vm14, %v2820_v23  ;;  %3900 = vmatprep.subr.bf16.mxu0 %v7902_v42  ;;  %3956 = vmatpush1.bf16.msra.mxu1 %v8629_v9  ;;  %v7895_v16 = vcombine.high %v10321_v27, %v2976_v54  ;;  %v7888_v1 = vcombine.high %v10341_v14, %v2908_v47  ;;  %v4214_v27 = vld [vmem:[#allocation10 + $0x580] sm:$0xff] }
 0x3c1   : > { %3957 = vmatprep.subr.bf16.mxu1 %v9829_v13  ;;  %v7887_v48 = vcombine.low %v10341_v14, %v2908_v47  ;;  %v8117_v19 = vcombine.high %v4214_v27, %v4218_v10  ;;  %v7997_v14 = vcombine.high %v4094_v29, %v4098_v0  ;;  %v8116_v21 = vcombine.low %v4214_v27, %v4218_v10  ;;  %v4198_v55 = vld [vmem:[#allocation10 + $0x500] sm:$0xff] }
 0x3c2   : > { %v2839_v15 = vsel %vm2672_vm12, %v2827_v52, %v2828_v43  ;;  %v4202_v3 = vld [vmem:[#allocation10 + $0x520] sm:$0xff]  ;;  %v7989_v40 = vcombine.high %v4086_v59, %v4090_v24  ;;  %v8108_v49 = vcombine.low %v4206_v4, %v4210_v30  ;;  %v7988_v50 = vcombine.low %v4086_v59, %v4090_v24 }
 0x3c3   : > { %v2840_v35 = vsel %vm502_vm1, %v10193_v25, %v2839_v15  ;;  %v3300_v57 = vpop.permute.xlu1 %3299  ;;  %v8630_v46 = vld [vmem:[#allocation2 + $0x88] ss:$28 sps:$4 sm:$0xff]   ;;  %3901 = vmatpush1.bf16.msra.mxu0 %v7901_v33  ;;  %v8101_v41 = vcombine.high %v4198_v55, %v4202_v3  ;;  %v8100_v20 = vcombine.low %v4198_v55, %v4202_v3  ;;  %vm6565_vm1 = vcmask 1042432  }
 0x3c4   : > { %v3308_v34 = vrot.slane %v3300_v57, 4  ;;  %3902 = vmatprep.subr.bf16.mxu0 %v7895_v16  ;;  %3958 = vmatpush1.bf16.msra.mxu1 %v8630_v46  ;;  %v4082_v54 = vld [vmem:[#allocation10 + $0x160] sm:$0xff] }
 0x3c5   : > { %3959 = vmatprep.subr.bf16.mxu1 %v9829_v13  ;;  %v4190_v63 = vld [vmem:[#allocation10 + $0x4c0] sm:$0xff] }
 0x3c6   : > { %v3320_v45 = vsel %vm2672_vm12, %v3307_v11, %v3308_v34  ;;  %v3322_v52 = vsel %vm2362_vm11, %v3300_v57, %v3308_v34  ;;  %v7881_v11 = vcombine.high %v10361_v8, %v2840_v35  ;;  %v4194_v31 = vld [vmem:[#allocation10 + $0x4e0] sm:$0xff] }
 0x3c7   : > { %v3321_v25 = vsel %vm2362_vm11, %v10220_v6, %v3320_v45  ;;  %3338 = vst.msk [vmem:[#allocation2 + $0x1f4] sm:$0xf] %vm2783_vm14, %v3322_v52  ;;  %v8631_v2 = vld [vmem:[#allocation2 + $0x50] ss:$28 sps:$4 sm:$0xff]   ;;  %3903 = vmatpush1.bf16.msra.mxu0 %v7894_v39  ;;  %v7880_v6 = vcombine.low %v10361_v8, %v2840_v35  ;;  %v8093_v44 = vcombine.high %v4190_v63, %v4194_v31 }
 0x3c8   : > { %3904 = vmatprep.subr.bf16.mxu0 %v7888_v1  ;;  %3960 = vmatpush1.bf16.msra.mxu1 %v8631_v2  ;;  %v7930_v60 = vcombine.high %v10379_v53, %v3321_v25  ;;  %v7929_v37 = vcombine.low %v10379_v53, %v3321_v25  ;;  %v4078_v8 = vld [vmem:[#allocation10 + $0x140] sm:$0xff]  ;;  %v8092_v47 = vcombine.low %v4190_v63, %v4194_v31 }
 0x3c9   : > { %3961 = vmatprep.subr.bf16.mxu1 %v9829_v13  ;;  %v7981_v28 = vcombine.high %v4078_v8, %v4082_v54  ;;  %v4070_v42 = vld [vmem:[#allocation10 + $0x100] sm:$0xff]  ;;  %v7980_v53 = vcombine.low %v4078_v8, %v4082_v54 }
 0x3ca   : > { %v4074_v56 = vld [vmem:[#allocation10 + $0x120] sm:$0xff] }
 0x3cb   : > { %3905 = vmatpush1.bf16.msra.mxu0 %v7887_v48  ;;  %v4186_v62 = vld [vmem:[#allocation10 + $0x4a0] sm:$0xff]  ;;  %v7972_v16 = vcombine.low %v4070_v42, %v4074_v56 }
 0x3cc   : > { %3906 = vmatprep.subr.bf16.mxu0 %v7881_v11  ;;  %3962 = vmatpush1.bf16.msra.mxu1 %v8632_v36  ;;  %v4062_v23 = vld [vmem:[#allocation10 + $0xc0] sm:$0xff] }
 0x3cd   : > { %3977 = vmatprep.subr.bf16.mxu1 %v9829_v13  ;;  %v4066_v9 = vld [vmem:[#allocation10 + $0xe0] sm:$0xff] }
 0x3ce   : > { %v8633_v7 = vld [vmem:[#allocation2 + $0x1d8] ss:$28 sps:$4 sm:$0xff]   ;;  %v4174_v33 = vld [vmem:[#allocation10 + $0x440] sm:$0xff]  ;;  %v7965_v35 = vcombine.high %v4062_v23, %v4066_v9  ;;  %v7964_v1 = vcombine.low %v4062_v23, %v4066_v9 }
 0x3cf   : > { %3907 = vmatpush1.bf16.msra.mxu0 %v7880_v6  ;;  %v4178_v15 = vld [vmem:[#allocation10 + $0x460] sm:$0xff] }
 0x3d0   : > { %3908 = vmatprep.subr.bf16.mxu0 %v8636_v38  ;;  %3978 = vmatpush2.bf16.msra.mxu1 %v8633_v7  ;;  %v4054_v46 = vld [vmem:[#allocation10 + $0x80] sm:$0xff]  ;;  %v8077_v39 = vcombine.high %v4174_v33, %v4178_v15  ;;  %v8076_v25 = vcombine.low %v4174_v33, %v4178_v15 }
 0x3d1   : > { %6643 = vmatprep.subr.bf16.mxu1 %v8125_v18  ;;  %v4058_v34 = vld [vmem:[#allocation10 + $0xa0] sm:$0xff] }
 0x3d2   : > { %v4166_v45 = vld [vmem:[#allocation10 + $0x400] sm:$0xff]  ;;  %v7956_v32 = vcombine.low %v4054_v46, %v4058_v34 }
 0x3d3   : > { %3909 = vmatpush1.bf16.msra.mxu0 %v8634_v58  ;;  %3980 = vmatmul.mubr.bf16.vlgmr.msra.gmra.mxu1 %v10258_v26  ;;  %v4170_v52 = vld [vmem:[#allocation10 + $0x420] sm:$0xff] }
 0x3d4   : > { %3924 = vmatprep.subr.bf16.mxu0 %v7930_v60  ;;  %7939 = vmatprep.mubr.msk.bf16.mxu1 %vm3781_vm15, %v10260_v12  ;;  %v4046_v2 = vld [vmem:[#allocation10 + $0x40] sm:$0xff]  ;;  %v8069_v11 = vcombine.high %v4166_v45, %v4170_v52  ;;  %v8068_v7 = vcombine.low %v4166_v45, %v4170_v52 }
 0x3d5   : > { %6644 = vmatpush1.bf16.msra.mxu1 %v8124_v61  ;;  %v4050_v48 = vld [vmem:[#allocation10 + $0x60] sm:$0xff] }
 0x3d6   : > { %6645 = vmatprep.subr.bf16.mxu1 %v8117_v19  ;;  %v4286_v36 = vld [vmem:[#allocation10 + $0x7c0] sm:$0xff]  ;;  %v7949_v6 = vcombine.high %v4046_v2, %v4050_v48  ;;  %v7948_v61 = vcombine.low %v4046_v2, %v4050_v48 }
 0x3d7   : > { %3925 = vmatpush2.bf16.msra.mxu0 %v7929_v37  ;;  %v4290_v17 = vld [vmem:[#allocation10 + $0x7e0] sm:$0xff] }
 0x3d8   : > { %6590 = vmatprep.subr.bf16.mxu0 %v7997_v14  ;;  %v4038_v38 = vld [vmem:[#allocation10] sm:$0xff]  ;;  %v8189_v27 = vcombine.high %v4286_v36, %v4290_v17  ;;  %v8188_v0 = vcombine.low %v4286_v36, %v4290_v17 }
 0x3d9   : > { %6646 = vmatpush1.bf16.msra.mxu1 %v8116_v21  ;;  %v4042_v18 = vld [vmem:[#allocation10 + $0x20] sm:$0xff] }
 0x3da   : > { %3927 = vmatmul.mubr.bf16.vlgmr.msra.gmra.mxu0 %v10258_v26  ;;  %6647 = vmatprep.subr.bf16.mxu1 %v8109_v51  ;;  %v4182_v26 = vld [vmem:[#allocation10 + $0x480] sm:$0xff]  ;;  %v7941_v29 = vcombine.high %v4038_v38, %v4042_v18  ;;  %v7940_v37 = vcombine.low %v4038_v38, %v4042_v18 }
 0x3db   : > { %7937 = vmatprep.mubr.msk.bf16.mxu0 %vm3781_vm15, %v10260_v12  ;;  %6591 = vmatpush1.bf16.msra.mxu0 %v7996_v22  ;;  %v7973_v12 = vcombine.high %v4070_v42, %v4074_v56  ;;  %v8085_v43 = vcombine.high %v4182_v26, %v4186_v62  ;;  %v8084_v57 = vcombine.low %v4182_v26, %v4186_v62  ;;  %v4278_v10 = vld [vmem:[#allocation10 + $0x780] sm:$0xff] }
 0x3dc   : > { %3988 = vmatmul.mubr.bf16.gmra.mxu1 %v10291_v5  ;;  %6592 = vmatprep.subr.bf16.mxu0 %v7989_v40  ;;  %v4282_v58 = vld [vmem:[#allocation10 + $0x7a0] sm:$0xff] }
 0x3dd   : > { %6648 = vmatpush1.bf16.msra.mxu1 %v8108_v49  ;;  %v4158_v60 = vld [vmem:[#allocation10 + $0x3c0] sm:$0xff]  ;;  %v8181_v4 = vcombine.high %v4278_v10, %v4282_v58  ;;  %v8180_v59 = vcombine.low %v4278_v10, %v4282_v58 }
 0x3de   : > { %6649 = vmatprep.subr.bf16.mxu1 %v8101_v41  ;;  %v4162_v19 = vld [vmem:[#allocation10 + $0x3e0] sm:$0xff] }
 0x3df   : > { %6593 = vmatpush1.bf16.msra.mxu0 %v7988_v50  ;;  %v4270_v30 = vld [vmem:[#allocation10 + $0x740] sm:$0xff]  ;;  %v8061_v21 = vcombine.high %v4158_v60, %v4162_v19  ;;  %v8060_v40 = vcombine.low %v4158_v60, %v4162_v19 }
 0x3e0   : > { %6594 = vmatprep.subr.bf16.mxu0 %v7981_v28  ;;  %v4274_v14 = vld [vmem:[#allocation10 + $0x760] sm:$0xff] }
 0x3e1   : > { %6650 = vmatpush1.bf16.msra.mxu1 %v8100_v20  ;;  %v4150_v24 = vld [vmem:[#allocation10 + $0x380] sm:$0xff]  ;;  %v8173_v55 = vcombine.high %v4270_v30, %v4274_v14  ;;  %v8172_v8 = vcombine.low %v4270_v30, %v4274_v14  ;;  %v10429_v14 = vpop.permute.xlu0 %3421 }
 0x3e2   : > { %3937 = vmatmul.mubr.bf16.gmra.mxu0 %v10291_v5  ;;  %6651 = vmatprep.subr.bf16.mxu1 %v8093_v44  ;;  %v7957_v5 = vcombine.high %v4054_v46, %v4058_v34  ;;  %v4154_v51 = vld [vmem:[#allocation10 + $0x3a0] sm:$0xff] }
 0x3e3   : > { %6595 = vmatpush1.bf16.msra.mxu0 %v7980_v53  ;;  %v4262_v3 = vld [vmem:[#allocation10 + $0x700] sm:$0xff]  ;;  %v8053_v49 = vcombine.high %v4150_v24, %v4154_v51  ;;  %v8052_v28 = vcombine.low %v4150_v24, %v4154_v51 }
 0x3e4   : > { %6596 = vmatprep.subr.bf16.mxu0 %v7973_v12  ;;  %v4266_v22 = vld [vmem:[#allocation10 + $0x720] sm:$0xff] }
 0x3e5   : > { %6652 = vmatpush1.bf16.msra.mxu1 %v8092_v47  ;;  %v4142_v54 = vld [vmem:[#allocation10 + $0x340] sm:$0xff]  ;;  %v8165_v63 = vcombine.high %v4262_v3, %v4266_v22  ;;  %v8164_v42 = vcombine.low %v4262_v3, %v4266_v22 }
 0x3e6   : > { %6653 = vmatprep.subr.bf16.mxu1 %v8085_v43  ;;  %v4146_v41 = vld [vmem:[#allocation10 + $0x360] sm:$0xff] }
 0x3e7   : > { %6597 = vmatpush1.bf16.msra.mxu0 %v7972_v16  ;;  %v4254_v31 = vld [vmem:[#allocation10 + $0x6c0] sm:$0xff]  ;;  %v8045_v20 = vcombine.high %v4142_v54, %v4146_v41  ;;  %v8044_v12 = vcombine.low %v4142_v54, %v4146_v41 }
 0x3e8   : > { %6598 = vmatprep.subr.bf16.mxu0 %v7965_v35  ;;  %v4258_v50 = vld [vmem:[#allocation10 + $0x6e0] sm:$0xff] }
 0x3e9   : > { %6654 = vmatpush1.bf16.msra.mxu1 %v8084_v57  ;;  %v4134_v56 = vld [vmem:[#allocation10 + $0x300] sm:$0xff]  ;;  %v8157_v26 = vcombine.high %v4254_v31, %v4258_v50  ;;  %v8156_v23 = vcombine.low %v4254_v31, %v4258_v50 }
 0x3ea   : > { %6655 = vmatprep.subr.bf16.mxu1 %v8077_v39  ;;  %v4138_v44 = vld [vmem:[#allocation10 + $0x320] sm:$0xff] }
 0x3eb   : > { %6599 = vmatpush1.bf16.msra.mxu0 %v7964_v1  ;;  %v4246_v62 = vld [vmem:[#allocation10 + $0x680] sm:$0xff]  ;;  %v8037_v47 = vcombine.high %v4134_v56, %v4138_v44  ;;  %v8036_v35 = vcombine.low %v4134_v56, %v4138_v44 }
 0x3ec   : > { %6600 = vmatprep.subr.bf16.mxu0 %v7957_v5  ;;  %v4250_v53 = vld [vmem:[#allocation10 + $0x6a0] sm:$0xff] }
 0x3ed   : > { %6656 = vmatpush1.bf16.msra.mxu1 %v8076_v25  ;;  %v4126_v9 = vld [vmem:[#allocation10 + $0x2c0] sm:$0xff]  ;;  %v8149_v33 = vcombine.high %v4246_v62, %v4250_v53  ;;  %v8148_v39 = vcombine.low %v4246_v62, %v4250_v53 }
 0x3ee   : > { %6657 = vmatprep.subr.bf16.mxu1 %v8069_v11  ;;  %v4130_v43 = vld [vmem:[#allocation10 + $0x2e0] sm:$0xff] }
 0x3ef   : > { %6601 = vmatpush1.bf16.msra.mxu0 %v7956_v32  ;;  %v4238_v15 = vld [vmem:[#allocation10 + $0x640] sm:$0xff]  ;;  %v8029_v57 = vcombine.high %v4126_v9, %v4130_v43  ;;  %v8028_v48 = vcombine.low %v4126_v9, %v4130_v43 }
 0x3f0   : > { %6602 = vmatprep.subr.bf16.mxu0 %v7949_v6  ;;  %v4242_v16 = vld [vmem:[#allocation10 + $0x660] sm:$0xff] }
 0x3f1   : > { %6658 = vmatpush1.bf16.msra.mxu1 %v8068_v7  ;;  %v10420_v46 = vld [vmem:[#allocation10 + $0x9c0] sm:$0xff]  ;;  %v8141_v1 = vcombine.high %v4238_v15, %v4242_v16  ;;  %v8140_v36 = vcombine.low %v4238_v15, %v4242_v16 }
 0x3f2   : > { %6659 = vmatprep.subr.bf16.mxu1 %v8189_v27  ;;  %v10422_v34 = vld [vmem:[#allocation10 + $0x9e0] sm:$0xff] }
 0x3f3   : > { %6603 = vmatpush1.bf16.msra.mxu0 %v7948_v61  ;;  %v4118_v45 = vld [vmem:[#allocation10 + $0x280] sm:$0xff]  ;;  %v8252_v5 = vcombine.low %v10420_v46, %v10422_v34  ;;  %v8253_v19 = vcombine.high %v10420_v46, %v10422_v34 }
 0x3f4   : > { %6604 = vmatprep.subr.bf16.mxu0 %v7941_v29  ;;  %v4122_v52 = vld [vmem:[#allocation10 + $0x2a0] sm:$0xff] }
 0x3f5   : > { %6660 = vmatpush2.bf16.msra.mxu1 %v8188_v0  ;;  %v4230_v25 = vld [vmem:[#allocation10 + $0x600] sm:$0xff]  ;;  %v8021_v11 = vcombine.high %v4118_v45, %v4122_v52  ;;  %v8020_v7 = vcombine.low %v4118_v45, %v4122_v52 }
 0x3f6   : > { %6661 = vmatprep.subr.bf16.mxu1 %v8181_v4  ;;  %v4234_v2 = vld [vmem:[#allocation10 + $0x620] sm:$0xff] }
 0x3f7   : > { %6605 = vmatpush1.bf16.msra.mxu0 %v7940_v37  ;;  %v4110_v17 = vld [vmem:[#allocation10 + $0x240] sm:$0xff]  ;;  %v8133_v6 = vcombine.high %v4230_v25, %v4234_v2  ;;  %v8132_v27 = vcombine.low %v4230_v25, %v4234_v2  ;;  %v10431_v37 = vpop.permute.xlu1 %3426 }
 0x3f8   : > { %6606 = vmatprep.subr.bf16.mxu0 %v8061_v21  ;;  %v4114_v32 = vld [vmem:[#allocation10 + $0x260] sm:$0xff] }
 0x3f9   : > { %6662 = vmatpush2.bf16.msra.mxu1 %v8180_v59  ;;  %v4454_v38 = vld [vmem:[#allocation10 + $0xd00] sm:$0x77]  ;;  %v8013_v18 = vcombine.high %v4110_v17, %v4114_v32  ;;  %v8012_v29 = vcombine.low %v4110_v17, %v4114_v32 }
 0x3fa   : > { %6663 = vmatprep.subr.bf16.mxu1 %v8173_v55  ;;  %v4102_v10 = vld [vmem:[#allocation10 + $0x200] sm:$0xff]  ;;  %v8357_v61 = vcombine.high %v4454_v38, %v4454_v38 }
 0x3fb   : > { %6607 = vmatpush2.bf16.msra.mxu0 %v8060_v40  ;;  %v4106_v58 = vld [vmem:[#allocation10 + $0x220] sm:$0xff] }
 0x3fc   : > { %6608 = vmatprep.subr.bf16.mxu0 %v8053_v49  ;;  %v8005_v0 = vcombine.high %v4102_v10, %v4106_v58  ;;  %v8004_v60 = vcombine.low %v4102_v10, %v4106_v58  ;;  %v8356_v49 = vcombine.low %v4454_v38, %v4454_v38  ;;  %v4446_v41 = vld [vmem:[#allocation10 + $0xcc0] sm:$0xff] }
 0x3fd   : > { %6664 = vmatpush2.bf16.msra.mxu1 %v8172_v8  ;;  %v4434_v25 = vld [vmem:[#allocation10 + $0xc60] sm:$0xff] }
 0x3fe   : > { %6665 = vmatprep.subr.bf16.mxu1 %v8165_v63  ;;  %v4450_v63 = vld [vmem:[#allocation10 + $0xce0] sm:$0xff] }
 0x3ff   : > { %6609 = vmatpush2.bf16.msra.mxu0 %v8052_v28  ;;  %v10437_v28 = vpop.permute.xlu0 %3431  ;;  %v8349_v62 = vcombine.high %v4446_v41, %v4450_v63  ;;  %v8348_v16 = vcombine.low %v4446_v41, %v4450_v63  ;;  %v4426_v10 = vld [vmem:[#allocation10 + $0xc20] sm:$0xff] }
 0x400   : > { %6610 = vmatprep.subr.bf16.mxu0 %v8045_v20  ;;  %v4334_v63 = vld [vmem:[#allocation10 + $0x940] sm:$0xff] }
 0x401   : > { %6666 = vmatpush2.bf16.msra.mxu1 %v8164_v42  ;;  %v10441_v42 = vpop.permute.xlu1 %3436  ;;  %v4318_v34 = vld [vmem:[#allocation10 + $0x8c0] sm:$0xff] }
 0x402   : > { %6667 = vmatprep.subr.bf16.mxu1 %v8157_v26  ;;  %v6567_v26 = vsel %vm6565_vm1, %v8356_v49, 0 }
 0x403   : > { %6611 = vmatpush2.bf16.msra.mxu0 %v8044_v12 }
 0x404   : > { %6612 = vmatprep.subr.bf16.mxu0 %v8037_v47  ;;  %v4438_v47 = vld [vmem:[#allocation10 + $0xc80] sm:$0xff] }
 0x405   : > { %6668 = vmatpush2.bf16.msra.mxu1 %v8156_v23  ;;  %v4442_v23 = vld [vmem:[#allocation10 + $0xca0] sm:$0xff] }
 0x406   : > { %6669 = vmatprep.subr.bf16.mxu1 %v8149_v33 }
 0x407   : > { %6613 = vmatpush2.bf16.msra.mxu0 %v8036_v35 }
 0x408   : > { %6614 = vmatprep.subr.bf16.mxu0 %v8029_v57  ;;  %v8341_v57 = vcombine.high %v4438_v47, %v4442_v23 }
 0x409   : > { %6670 = vmatpush2.bf16.msra.mxu1 %v8148_v39 }
 0x40a   : > { %6671 = vmatprep.subr.bf16.mxu1 %v8141_v1  ;;  %v4430_v1 = vld [vmem:[#allocation10 + $0xc40] sm:$0xff] }
 0x40b   : > { %6615 = vmatpush2.bf16.msra.mxu0 %v8028_v48 }
 0x40c   : > { %6616 = vmatprep.subr.bf16.mxu0 %v8021_v11 }
 0x40d   : > { %6672 = vmatpush2.bf16.msra.mxu1 %v8140_v36  ;;  %v8340_v36 = vcombine.low %v4438_v47, %v4442_v23 }
 0x40e   : > { %6673 = vmatprep.subr.bf16.mxu1 %v8133_v6 }
 0x40f   : > { %6617 = vmatpush2.bf16.msra.mxu0 %v8020_v7  ;;  %v8333_v7 = vcombine.high %v4430_v1, %v4434_v25 }
 0x410   : > { %6618 = vmatprep.subr.bf16.mxu0 %v8013_v18 }
 0x411   : > { %6674 = vmatpush2.bf16.msra.mxu1 %v8132_v27  ;;  %v4422_v27 = vld [vmem:[#allocation10 + $0xc00] sm:$0xff] }
 0x412   : > { %8364 = vmatprep.subr.msk.bf16.mxu1 %vm6565_vm1, %v8357_v61 }
 0x413   : > { %6619 = vmatpush2.bf16.msra.mxu0 %v8012_v29 }
 0x414   : > { %6620 = vmatprep.subr.bf16.mxu0 %v8005_v0  ;;  %v8332_v0 = vcombine.low %v4430_v1, %v4434_v25  ;;  %v4314_v1 = vld [vmem:[#allocation10 + $0x8a0] sm:$0xff] }
 0x417   : > { %6621 = vmatpush2.bf16.msra.mxu0 %v8004_v60 }
 0x418   : > { %6696 = vmatprep.subr.bf16.mxu0 %v8253_v19 }
 0x467   : > { %v3875_v4 = vpop.f32.mrf.mxu1 }
 0x468   : > { %v3876_v51 = vadd.f32 %v3875_v4, %v10429_v14  ;;  %v4342_v4 = vld [vmem:[#allocation10 + $0x980] sm:$0xff] }
 0x469   : > { %v3877_v30 = vpop.f32.mrf.mxu1 }
 0x46a   : > { %v3878_v59 = vadd.f32 %v3877_v30, %v10429_v14  ;;  %v3998_v31 = vmax.f32 %v3876_v51, 0.0  ;;  %v4346_v30 = vld [vmem:[#allocation10 + $0x9a0] sm:$0xff]  ;;  %v10463_v51 = vld [vmem:[#allocation10 + $0x1c8] sm:$0xff] }
 0x46b   : > { %v3879_v21 = vpop.f32.mrf.mxu1  ;;  %v8245_v49 = vcombine.high %v4342_v4, %v4346_v30 }
 0x46c   : > { %v3880_v24 = vadd.f32 %v3879_v21, %v10431_v37  ;;  %v3999_v8 = vmax.f32 %v3878_v59, 0.0  ;;  %v8325_v21 = vcombine.high %v4422_v27, %v4426_v10 }
 0x46d   : > { %v3881_v55 = vpop.f32.mrf.mxu1 }
 0x46e   : > { %v3882_v3 = vadd.f32 %v3881_v55, %v10431_v37  ;;  %v4005_v22 = vmax.f32 %v3880_v24, 0.0  ;;  %v10465_v55 = vld [vmem:[#allocation10 + $0x1e8] sm:$0xff] }
 0x46f   : > { %v3885_v40 = vpop.f32.mrf.mxu1 }
 0x470   : > { %v4006_v54 = vmax.f32 %v3882_v3, 0.0  ;;  %v10443_v56 = vpack.c.bf16 %v4005_v22, %v3998_v31  ;;  %v3886_v9 = vadd.f32 %v3885_v40, %v10437_v28  ;;  %v4338_v31 = vld [vmem:[#allocation10 + $0x960] sm:$0xff] }
 0x471   : > { %v3887_v50 = vpop.f32.mrf.mxu1  ;;  %v8237_v47 = vcombine.high %v4334_v63, %v4338_v31 }
 0x472   : > { %v10439_v20 = vpack.c.bf16 %v4006_v54, %v3999_v8  ;;  %v3888_v53 = vadd.f32 %v3887_v50, %v10437_v28  ;;  %v4012_v2 = vmax.f32 %v3886_v9, 0.0  ;;  %v8324_v8 = vcombine.low %v4422_v27, %v4426_v10  ;;  %v4294_v27 = vld [vmem:[#allocation10 + $0x800] sm:$0xff] }
 0x473   : > { %v3889_v44 = vpop.f32.mrf.mxu1  ;;  %v7999_v50 = vcombine.high %v10463_v51, %v10465_v55  ;;  %v4298_v10 = vld [vmem:[#allocation10 + $0x820] sm:$0xff] }
 0x474   : > { %v3890_v12 = vadd.f32 %v3889_v44, %v10441_v42  ;;  %6675 = vmatprep.mubr.bf16.mxu1 %v10439_v20  ;;  %v4013_v39 = vmax.f32 %v3888_v53, 0.0  ;;  %v8244_v53 = vcombine.low %v4342_v4, %v4346_v30  ;;  %v4091_v4 = vld [vmem:[#allocation10 + $0x1a8] sm:$0xff]  ;;  %v8197_v30 = vcombine.high %v4294_v27, %v4298_v10 }
 0x475   : > { %v3891_v43 = vpop.f32.mrf.mxu1  ;;  %6676 = vmatmul.mubr.bf16.vlgmr.msra.gmra.mxu1 %v10443_v56 }
 0x476   : > { %v3892_v33 = vadd.f32 %v3891_v43, %v10441_v42  ;;  %v3822_v15 = vpop.f32.mrf.mxu0  ;;  %6756 = vmatpush1.bf16.msra.mxu1 %v6567_v26  ;;  %v4019_v35 = vmax.f32 %v3890_v12, 0.0  ;;  %v4326_v43 = vld [vmem:[#allocation10 + $0x900] sm:$0xff] }
 0x477   : > { %6757 = vmatprep.subr.bf16.mxu1 %v8349_v62  ;;  %v3823_v38 = vadd.f32 %v3822_v15, %v10429_v14 }
 0x478   : > { %v4020_v45 = vmax.f32 %v3892_v33, 0.0  ;;  %v3824_v52 = vpop.f32.mrf.mxu0  ;;  %v10454_v17 = vpack.c.bf16 %v4019_v35, %v4012_v2  ;;  %v4330_v33 = vld [vmem:[#allocation10 + $0x920] sm:$0xff]  ;;  %v8236_v35 = vcombine.low %v4334_v63, %v4338_v31  ;;  %v8196_v31 = vcombine.low %v4294_v27, %v4298_v10  ;;  %v4063_v27 = vld [vmem:[#allocation10 + $0xc8] sm:$0xff] }
 0x479   : > { %v3825_v32 = vadd.f32 %v3824_v52, %v10429_v14  ;;  %v3996_v59 = vmax.f32 %v3823_v38, 0.0  ;;  %v8229_v46 = vcombine.high %v4326_v43, %v4330_v33  ;;  %v4310_v52 = vld [vmem:[#allocation10 + $0x880] sm:$0xff]  ;;  %v4067_v10 = vld [vmem:[#allocation10 + $0xe8] sm:$0xff] }
 0x47a   : > { %v10452_v48 = vpack.c.bf16 %v4020_v45, %v4013_v39  ;;  %v3826_v11 = vpop.f32.mrf.mxu0  ;;  %6758 = vmatpush1.bf16.msra.mxu1 %v8348_v16  ;;  %v8228_v39 = vcombine.low %v4326_v43, %v4330_v33  ;;  %v8213_v2 = vcombine.high %v4310_v52, %v4314_v1 }
 0x47b   : > { %v3827_v6 = vadd.f32 %v3826_v11, %v10431_v37  ;;  %6759 = vmatprep.subr.bf16.mxu1 %v8341_v57  ;;  %v3997_v60 = vmax.f32 %v3825_v32, 0.0  ;;  %v4302_v11 = vld [vmem:[#allocation10 + $0x840] sm:$0xff] }
 0x47c   : > { %6685 = vmatprep.mubr.bf16.mxu1 %v10452_v48  ;;  %v3828_v18 = vpop.f32.mrf.mxu0 }
 0x47d   : > { %v3829_v58 = vadd.f32 %v3828_v18, %v10431_v37  ;;  %6686 = vmatmul.mubr.bf16.gmra.mxu1 %v10454_v17  ;;  %v4003_v61 = vmax.f32 %v3827_v6, 0.0  ;;  %v8212_v6 = vcombine.low %v4310_v52, %v4314_v1 }
 0x47e   : > { %v3832_v29 = vpop.f32.mrf.mxu0  ;;  %6760 = vmatpush1.bf16.msra.mxu1 %v8340_v36  ;;  %6781 = vmatprep.mubr.bf16.mxu1 %v9829_v13  ;;  %v4306_v36 = vld [vmem:[#allocation10 + $0x860] sm:$0xff] }
 0x47f   : > { %v4004_v19 = vmax.f32 %v3829_v58, 0.0  ;;  %6761 = vmatprep.subr.bf16.mxu1 %v8333_v7  ;;  %v10469_v22 = vpack.c.bf16 %v4003_v61, %v3996_v59  ;;  %v3833_v44 = vadd.f32 %v3832_v29, %v10437_v28  ;;  %v8205_v38 = vcombine.high %v4302_v11, %v4306_v36 }
 0x480   : > { %v3834_v24 = vpop.f32.mrf.mxu0  ;;  %v8204_v29 = vcombine.low %v4302_v11, %v4306_v36  ;;  %v4398_v11 = vld [vmem:[#allocation10 + $0xb40] sm:$0xff] }
 0x481   : > { %v10467_v3 = vpack.c.bf16 %v4004_v19, %v3997_v60  ;;  %v3835_v54 = vadd.f32 %v3834_v24, %v10437_v28  ;;  %v4010_v15 = vmax.f32 %v3833_v44, 0.0  ;;  %v4087_v19 = vld [vmem:[#allocation10 + $0x188] sm:$0xff]  ;;  %v4414_v24 = vld [vmem:[#allocation10 + $0xbc0] sm:$0xff] }
 0x482   : > { %v3836_v40 = vpop.f32.mrf.mxu0  ;;  %6762 = vmatpush1.bf16.msra.mxu1 %v8332_v0  ;;  %v7991_v63 = vcombine.high %v4087_v19, %v4091_v4  ;;  %v4083_v44 = vld [vmem:[#allocation10 + $0x168] sm:$0xff]  ;;  %v4402_v36 = vld [vmem:[#allocation10 + $0xb60] sm:$0xff] }
 0x483   : > { %v3837_v41 = vadd.f32 %v3836_v40, %v10441_v42  ;;  %6622 = vmatprep.mubr.bf16.mxu0 %v10467_v3  ;;  %6763 = vmatprep.subr.bf16.mxu1 %v8325_v21  ;;  %v4011_v23 = vmax.f32 %v3835_v54, 0.0  ;;  %v4418_v40 = vld [vmem:[#allocation10 + $0xbe0] sm:$0xff] }
 0x484   : > { %v3838_v26 = vpop.f32.mrf.mxu0  ;;  %6623 = vmatmul.mubr.bf16.vlgmr.msra.gmra.mxu0 %v10469_v22 }
 0x485   : > { %v3839_v62 = vadd.f32 %v3838_v26, %v10441_v42  ;;  %6697 = vmatpush1.bf16.msra.mxu0 %v8252_v5  ;;  %v4017_v12 = vmax.f32 %v3837_v41, 0.0  ;;  %v4322_v5 = vld [vmem:[#allocation10 + $0x8e0] sm:$0xff] }
 0x486   : > { %6698 = vmatprep.subr.bf16.mxu0 %v8245_v49  ;;  %6764 = vmatpush1.bf16.msra.mxu1 %v8324_v8  ;;  %v8221_v45 = vcombine.high %v4318_v34, %v4322_v5  ;;  %v8220_v25 = vcombine.low %v4318_v34, %v4322_v5  ;;  %v7998_v8 = vcombine.low %v10463_v51, %v10465_v55  ;;  %v4406_v55 = vld [vmem:[#allocation10 + $0xb80] sm:$0xff]  ;;  %v4071_v34 = vld [vmem:[#allocation10 + $0x108] sm:$0xff] }
 0x487   : > { %v4018_v9 = vmax.f32 %v3839_v62, 0.0  ;;  %6802 = vmatprep.subr.bf16.mxu1 %v7999_v50  ;;  %v10484_v57 = vpack.c.bf16 %v4017_v12, %v4010_v15  ;;  %v4079_v50 = vld [vmem:[#allocation10 + $0x148] sm:$0xff] }
 0x488   : > { %v7983_v43 = vcombine.high %v4079_v50, %v4083_v44  ;;  %v4075_v5 = vld [vmem:[#allocation10 + $0x128] sm:$0xff] }
 0x489   : > { %v10482_v16 = vpack.c.bf16 %v4018_v9, %v4011_v23  ;;  %6699 = vmatpush1.bf16.msra.mxu0 %v8244_v53  ;;  %v8317_v53 = vcombine.high %v4414_v24, %v4418_v40  ;;  %v7990_v9 = vcombine.low %v4087_v19, %v4091_v4  ;;  %v7967_v19 = vcombine.high %v4063_v27, %v4067_v10 }
 0x48a   : > { %6700 = vmatprep.subr.bf16.mxu0 %v8237_v47  ;;  %v4410_v47 = vld [vmem:[#allocation10 + $0xba0] sm:$0xff]  ;;  %v8300_v4 = vcombine.low %v4398_v11, %v4402_v36 }
 0x48b   : > { %6632 = vmatprep.mubr.bf16.mxu0 %v10482_v16 }
 0x48c   : > { %6633 = vmatmul.mubr.bf16.gmra.mxu0 %v10484_v57 }
 0x48d   : > { %6701 = vmatpush1.bf16.msra.mxu0 %v8236_v35 }
 0x48e   : > { %6702 = vmatprep.subr.bf16.mxu0 %v8229_v46  ;;  %v8316_v46 = vcombine.low %v4414_v24, %v4418_v40  ;;  %v4382_v24 = vld [vmem:[#allocation10 + $0xac0] sm:$0xff] }
 0x48f   : > { %v4386_v40 = vld [vmem:[#allocation10 + $0xae0] sm:$0xff] }
 0x491   : > { %6703 = vmatpush1.bf16.msra.mxu0 %v8228_v39  ;;  %v8309_v39 = vcombine.high %v4406_v55, %v4410_v47 }
 0x492   : > { %6704 = vmatprep.subr.bf16.mxu0 %v8221_v45 }
 0x493   : > { %v3981_v32 = vpop.f32.mrf.mxu1 }
 0x494   : > { %v3982_v18 = vadd.f32 %v3981_v32, %v10429_v14  ;;  %v7982_v32 = vcombine.low %v4079_v50, %v4083_v44  ;;  %v4051_v50 = vld [vmem:[#allocation10 + $0x68] sm:$0xff]  ;;  %v8285_v44 = vcombine.high %v4382_v24, %v4386_v40 }
 0x495   : > { %6705 = vmatpush1.bf16.msra.mxu0 %v8220_v25  ;;  %v3983_v7 = vpop.f32.mrf.mxu1 }
 0x496   : > { %6706 = vmatprep.subr.bf16.mxu0 %v8213_v2  ;;  %v4002_v21 = vmax.f32 %v3982_v18, 0.0  ;;  %v8308_v18 = vcombine.low %v4406_v55, %v4410_v47  ;;  %v8284_v47 = vcombine.low %v4382_v24, %v4386_v40 }
 0x497   : > { %v3984_v58 = vpop.f32.mrf.mxu1 }
 0x498   : > { %v3985_v61 = vadd.f32 %v3984_v58, %v10431_v37  ;;  %v8301_v58 = vcombine.high %v4398_v11, %v4402_v36 }
 0x499   : > { %6707 = vmatpush1.bf16.msra.mxu0 %v8212_v6  ;;  %v3986_v0 = vpop.f32.mrf.mxu1  ;;  %v7975_v6 = vcombine.high %v4071_v34, %v4075_v5 }
 0x49a   : > { %v10490_v60 = vpop.f32.mrf.mxu0  ;;  %6708 = vmatprep.subr.bf16.mxu0 %v8205_v38  ;;  %v4009_v59 = vmax.f32 %v3985_v61, 0.0  ;;  %v4390_v61 = vld [vmem:[#allocation10 + $0xb00] sm:$0xff]  ;;  %v7974_v0 = vcombine.low %v4071_v34, %v4075_v5 }
 0x49c   : > { %v3989_v49 = vpop.f32.mrf.mxu1  ;;  %v3930_v54 = vpop.f32.mrf.mxu0  ;;  %v10494_v41 = vpack.c.bf16 %v4009_v59, %v4002_v21  ;;  %v4059_v21 = vld [vmem:[#allocation10 + $0xa8] sm:$0xff] }
 0x49d   : > { %6709 = vmatpush1.bf16.msra.mxu0 %v8204_v29  ;;  %v3990_v12 = vadd.f32 %v3989_v49, %v10437_v28  ;;  %v3931_v51 = vadd.f32 %v3930_v54, %v10429_v14  ;;  %v4394_v29 = vld [vmem:[#allocation10 + $0xb20] sm:$0xff] }
 0x49e   : > { %v3991_v26 = vpop.f32.mrf.mxu1  ;;  %v10496_v62 = vpop.f32.mrf.mxu0  ;;  %6710 = vmatprep.subr.bf16.mxu0 %v8197_v30  ;;  %8365 = vmatmul.mubr.msk.bf16.vlgmr.msra.gmra.mxu1 %vm6558_vm5, %v10494_v41  ;;  %v4055_v30 = vld [vmem:[#allocation10 + $0x88] sm:$0xff]  ;;  %v8293_v59 = vcombine.high %v4390_v61, %v4394_v29 }
 0x49f   : > { %6803 = vmatpush1.bf16.msra.mxu1 %v7998_v8  ;;  %6791 = vmatprep.mubr.bf16.mxu1 %v9829_v13  ;;  %v4016_v52 = vmax.f32 %v3990_v12, 0.0  ;;  %v4001_v25 = vmax.f32 %v3931_v51, 0.0  ;;  %v7966_v8 = vcombine.low %v4063_v27, %v4067_v10  ;;  %v7959_v54 = vcombine.high %v4055_v30, %v4059_v21  ;;  %v4374_v26 = vld [vmem:[#allocation10 + $0xa80] sm:$0xff]  ;;  %v4155_v27 = vld [vmem:[#allocation10 + $0x3a8] sm:$0xff] }
 0x4a0   : > { %v3992_v23 = vpop.f32.mrf.mxu1  ;;  %v3934_v33 = vpop.f32.mrf.mxu0  ;;  %6804 = vmatprep.subr.bf16.mxu1 %v7991_v63  ;;  %v8292_v63 = vcombine.low %v4390_v61, %v4394_v29  ;;  %v7958_v51 = vcombine.low %v4055_v30, %v4059_v21  ;;  %v4223_v61 = vld [vmem:[#allocation10 + $0x5c8] sm:$0xff] }
 0x4a1   : > { %v3993_v15 = vadd.f32 %v3992_v23, %v10441_v42  ;;  %v3935_v35 = vadd.f32 %v3934_v33, %v10431_v37  ;;  %6711 = vmatpush1.bf16.msra.mxu0 %v8196_v31  ;;  %v4047_v31 = vld [vmem:[#allocation10 + $0x48] sm:$0xff]  ;;  %v4366_v33 = vld [vmem:[#allocation10 + $0xa40] sm:$0xff] }
 0x4a2   : > { %6712 = vmatprep.subr.bf16.mxu0 %v8317_v53  ;;  %v3994_v45 = vpop.f32.mrf.mxu1  ;;  %v10513_v49 = vpop.f32.mrf.mxu0  ;;  %v4378_v53 = vld [vmem:[#allocation10 + $0xaa0] sm:$0xff]  ;;  %v7951_v55 = vcombine.high %v4047_v31, %v4051_v50  ;;  %v4039_v23 = vld [vmem:[#allocation10 + $0x8] sm:$0xff] }
 0x4a3   : > { %v4023_v1 = vmax.f32 %v3993_v15, 0.0  ;;  %v4008_v2 = vmax.f32 %v3935_v35, 0.0  ;;  %6805 = vmatpush1.bf16.msra.mxu1 %v7990_v9  ;;  %v4043_v9 = vld [vmem:[#allocation10 + $0x28] sm:$0xff]  ;;  %v4370_v15 = vld [vmem:[#allocation10 + $0xa60] sm:$0xff]  ;;  %v8276_v5 = vcombine.low %v4374_v26, %v4378_v53 }
 0x4a4   : > { %6806 = vmatprep.subr.bf16.mxu1 %v7983_v43  ;;  %v3940_v12 = vpop.f32.mrf.mxu0  ;;  %v8277_v43 = vcombine.high %v4374_v26, %v4378_v53  ;;  %v7943_v34 = vcombine.high %v4039_v23, %v4043_v9  ;;  %v4163_v45 = vld [vmem:[#allocation10 + $0x3e8] sm:$0xff]  ;;  %v7942_v11 = vcombine.low %v4039_v23, %v4043_v9 }
 0x4a5   : > { %v10505_v7 = vpack.c.bf16 %v4023_v1, %v4016_v52  ;;  %v10507_v38 = vpack.c.bf16 %v4008_v2, %v4001_v25  ;;  %6713 = vmatpush2.bf16.msra.mxu0 %v8316_v46  ;;  %v7950_v46 = vcombine.low %v4047_v31, %v4051_v50  ;;  %v8269_v52 = vcombine.high %v4366_v33, %v4370_v15  ;;  %v4358_v1 = vld [vmem:[#allocation10 + $0xa00] sm:$0xff]  ;;  %v4227_v29 = vld [vmem:[#allocation10 + $0x5e8] sm:$0xff] }
 0x4a6   : > { %6714 = vmatprep.subr.bf16.mxu0 %v8309_v39  ;;  %v3942_v35 = vpop.f32.mrf.mxu0  ;;  %v4159_v39 = vld [vmem:[#allocation10 + $0x3c8] sm:$0xff]  ;;  %v4362_v25 = vld [vmem:[#allocation10 + $0xa20] sm:$0xff]  ;;  %v8127_v24 = vcombine.high %v4223_v61, %v4227_v29 }
 0x4a7   : > { %8366 = vmatmul.mubr.msk.bf16.gmra.mxu1 %vm6558_vm5, %v10505_v7  ;;  %6728 = vmatprep.mubr.bf16.mxu0 %v10507_v38  ;;  %v8063_v36 = vcombine.high %v4159_v39, %v4163_v45  ;;  %v8261_v10 = vcombine.high %v4358_v1, %v4362_v25  ;;  %v8260_v21 = vcombine.low %v4358_v1, %v4362_v25  ;;  %v4219_v31 = vld [vmem:[#allocation10 + $0x5a8] sm:$0xff] }
 0x4a8   : > { %6807 = vmatpush1.bf16.msra.mxu1 %v7982_v32  ;;  %6834 = vmatprep.mubr.bf16.mxu1 %v10467_v3  ;;  %v3944_v2 = vpop.f32.mrf.mxu0  ;;  %v8268_v32 = vcombine.low %v4366_v33, %v4370_v15  ;;  %v4135_v26 = vld [vmem:[#allocation10 + $0x308] sm:$0xff] }
 0x4a9   : > { %6808 = vmatprep.subr.bf16.mxu1 %v7975_v6  ;;  %6715 = vmatpush2.bf16.msra.mxu0 %v8308_v18  ;;  %v3933_v6 = vadd.f32 %v10496_v62, %v10431_v37  ;;  %v4151_v18 = vld [vmem:[#allocation10 + $0x388] sm:$0xff] }
 0x4aa   : > { %6716 = vmatprep.subr.bf16.mxu0 %v8301_v58  ;;  %v3945_v58 = vadd.f32 %v3944_v2, %v10441_v42  ;;  %v8055_v30 = vcombine.high %v4151_v18, %v4155_v27  ;;  %v4143_v62 = vld [vmem:[#allocation10 + $0x348] sm:$0xff] }
 0x4ab   : > { %v4007_v37 = vmax.f32 %v3933_v6, 0.0  ;;  %v4139_v53 = vld [vmem:[#allocation10 + $0x328] sm:$0xff] }
 0x4ac   : > { %6809 = vmatpush1.bf16.msra.mxu1 %v7974_v0  ;;  %v3929_v0 = vadd.f32 %v10490_v60, %v10429_v14  ;;  %v4022_v40 = vmax.f32 %v3945_v58, 0.0  ;;  %v4207_v9 = vld [vmem:[#allocation10 + $0x548] sm:$0xff]  ;;  %v8039_v33 = vcombine.high %v4135_v26, %v4139_v53 }
 0x4ad   : > { %6810 = vmatprep.subr.bf16.mxu1 %v7967_v19  ;;  %6717 = vmatpush2.bf16.msra.mxu0 %v8300_v4  ;;  %v8062_v19 = vcombine.low %v4159_v39, %v4163_v45  ;;  %v3941_v4 = vadd.f32 %v3940_v12, %v10437_v28  ;;  %v8126_v12 = vcombine.low %v4223_v61, %v4227_v29  ;;  %v4127_v15 = vld [vmem:[#allocation10 + $0x2c8] sm:$0xff] }
 0x4ae   : > { %6718 = vmatprep.subr.bf16.mxu0 %v8293_v59  ;;  %v4147_v59 = vld [vmem:[#allocation10 + $0x368] sm:$0xff] }
 0x4af   : > { %v4015_v14 = vmax.f32 %v3941_v4, 0.0  ;;  %v8047_v60 = vcombine.high %v4143_v62, %v4147_v59  ;;  %v8046_v23 = vcombine.low %v4143_v62, %v4147_v59  ;;  %v4203_v39 = vld [vmem:[#allocation10 + $0x528] sm:$0xff] }
 0x4b0   : > { %6811 = vmatpush1.bf16.msra.mxu1 %v7966_v8  ;;  %v4000_v8 = vmax.f32 %v3929_v0, 0.0  ;;  %v4119_v1 = vld [vmem:[#allocation10 + $0x288] sm:$0xff] }
 0x4b1   : > { %6812 = vmatprep.subr.bf16.mxu1 %v7959_v54  ;;  %6719 = vmatpush2.bf16.msra.mxu0 %v8292_v63  ;;  %v8054_v54 = vcombine.low %v4151_v18, %v4155_v27  ;;  %v4215_v63 = vld [vmem:[#allocation10 + $0x588] sm:$0xff] }
 0x4b2   : > { %6720 = vmatprep.subr.bf16.mxu0 %v8285_v44  ;;  %v10521_v50 = vpack.c.bf16 %v4007_v37, %v4000_v8  ;;  %v3943_v44 = vadd.f32 %v3942_v35, %v10441_v42  ;;  %v4131_v35 = vld [vmem:[#allocation10 + $0x2e8] sm:$0xff] }
 0x4b3   : > { %v8031_v45 = vcombine.high %v4127_v15, %v4131_v35  ;;  %v4123_v25 = vld [vmem:[#allocation10 + $0x2a8] sm:$0xff] }
 0x4b4   : > { %6813 = vmatpush1.bf16.msra.mxu1 %v7958_v51  ;;  %v10524_v51 = vpack.c.bf16 %v4022_v40, %v4015_v14  ;;  %v4021_v42 = vmax.f32 %v3943_v44, 0.0  ;;  %v4195_v6 = vld [vmem:[#allocation10 + $0x4e8] sm:$0xff]  ;;  %v8023_v18 = vcombine.high %v4119_v1, %v4123_v25  ;;  %v8022_v29 = vcombine.low %v4119_v1, %v4123_v25 }
 0x4b5   : > { %6814 = vmatprep.subr.bf16.mxu1 %v7951_v55  ;;  %6721 = vmatpush2.bf16.msra.mxu0 %v8284_v47  ;;  %v8119_v55 = vcombine.high %v4215_v63, %v4219_v31  ;;  %v3939_v47 = vadd.f32 %v10513_v49, %v10437_v28  ;;  %v8038_v28 = vcombine.low %v4135_v26, %v4139_v53  ;;  %v4199_v49 = vld [vmem:[#allocation10 + $0x508] sm:$0xff] }
 0x4b6   : > { %6722 = vmatprep.subr.bf16.mxu0 %v8277_v43  ;;  %v4211_v43 = vld [vmem:[#allocation10 + $0x568] sm:$0xff]  ;;  %v8102_v58 = vcombine.low %v4199_v49, %v4203_v39 }
 0x4b7   : > { %v8110_v2 = vcombine.low %v4207_v9, %v4211_v43  ;;  %v4111_v27 = vld [vmem:[#allocation10 + $0x248] sm:$0xff] }
 0x4b8   : > { %6815 = vmatpush1.bf16.msra.mxu1 %v7950_v46  ;;  %v8118_v46 = vcombine.low %v4215_v63, %v4219_v31  ;;  %v4183_v0 = vld [vmem:[#allocation10 + $0x488] sm:$0xff] }
 0x4b9   : > { %6816 = vmatprep.subr.bf16.mxu1 %v7943_v34  ;;  %6723 = vmatpush2.bf16.msra.mxu0 %v8276_v5  ;;  %v8111_v34 = vcombine.high %v4207_v9, %v4211_v43  ;;  %v4014_v5 = vmax.f32 %v3939_v47, 0.0  ;;  %v4179_v40 = vld [vmem:[#allocation10 + $0x468] sm:$0xff] }
 0x4ba   : > { %6724 = vmatprep.subr.bf16.mxu0 %v8269_v52  ;;  %v4351_v63 = vld [vmem:[#allocation10 + $0x9c8] sm:$0xff] }
 0x4bb   : > { %v10530_v52 = vpack.c.bf16 %v4021_v42, %v4014_v5  ;;  %v4355_v31 = vld [vmem:[#allocation10 + $0x9e8] sm:$0xff] }
 0x4bc   : > { %6817 = vmatpush1.bf16.msra.mxu1 %v7942_v11  ;;  %v8103_v11 = vcombine.high %v4199_v49, %v4203_v39  ;;  %v4167_v44 = vld [vmem:[#allocation10 + $0x408] sm:$0xff]  ;;  %v8255_v53 = vcombine.high %v4351_v63, %v4355_v31  ;;  %v8254_v9 = vcombine.low %v4351_v63, %v4355_v31 }
 0x4bd   : > { %6818 = vmatprep.subr.bf16.mxu1 %v8063_v36  ;;  %6725 = vmatpush2.bf16.msra.mxu0 %v8268_v32  ;;  %v8030_v36 = vcombine.low %v4127_v15, %v4131_v35  ;;  %v4191_v32 = vld [vmem:[#allocation10 + $0x4c8] sm:$0xff] }
 0x4be   : > { %6726 = vmatprep.subr.bf16.mxu0 %v8261_v10  ;;  %v4115_v10 = vld [vmem:[#allocation10 + $0x268] sm:$0xff]  ;;  %v8095_v61 = vcombine.high %v4191_v32, %v4195_v6  ;;  %v8094_v37 = vcombine.low %v4191_v32, %v4195_v6 }
 0x4bf   : > { %v8015_v4 = vcombine.high %v4111_v27, %v4115_v10  ;;  %v8014_v59 = vcombine.low %v4111_v27, %v4115_v10  ;;  %v4171_v26 = vld [vmem:[#allocation10 + $0x428] sm:$0xff] }
 0x4c0   : > { %6819 = vmatpush2.bf16.msra.mxu1 %v8062_v19  ;;  %v4187_v19 = vld [vmem:[#allocation10 + $0x4a8] sm:$0xff]  ;;  %v8070_v15 = vcombine.low %v4167_v44, %v4171_v26 }
 0x4c1   : > { %6820 = vmatprep.subr.bf16.mxu1 %v8055_v30  ;;  %6727 = vmatpush2.bf16.msra.mxu0 %v8260_v21  ;;  %v4103_v30 = vld [vmem:[#allocation10 + $0x208] sm:$0xff]  ;;  %v8087_v62 = vcombine.high %v4183_v0, %v4187_v19 }
 0x4c2   : > { %6855 = vmatprep.subr.bf16.mxu0 %v8127_v24  ;;  %v4107_v21 = vld [vmem:[#allocation10 + $0x228] sm:$0xff] }
 0x4c3   : > { %v4175_v24 = vld [vmem:[#allocation10 + $0x448] sm:$0xff]  ;;  %v8007_v8 = vcombine.high %v4103_v30, %v4107_v21 }
 0x4c4   : > { %6821 = vmatpush2.bf16.msra.mxu1 %v8054_v54  ;;  %6729 = vmatmul.mubr.bf16.vlgmr.msra.gmra.mxu0 %v10521_v50  ;;  %v8086_v54 = vcombine.low %v4183_v0, %v4187_v19  ;;  %v8079_v14 = vcombine.high %v4175_v24, %v4179_v40  ;;  %v4347_v47 = vld [vmem:[#allocation10 + $0x9a8] sm:$0xff] }
 0x4c5   : > { %6822 = vmatprep.subr.bf16.mxu1 %v8047_v60  ;;  %6738 = vmatprep.mubr.bf16.mxu0 %v10524_v51  ;;  %v8006_v60 = vcombine.low %v4103_v30, %v4107_v21  ;;  %v4287_v43 = vld [vmem:[#allocation10 + $0x7c8] sm:$0xff] }
 0x4c6   : > { %6856 = vmatpush1.bf16.msra.mxu0 %v8126_v12  ;;  %v8078_v12 = vcombine.low %v4175_v24, %v4179_v40  ;;  %v4335_v35 = vld [vmem:[#allocation10 + $0x948] sm:$0xff] }
 0x4c7   : > { %6857 = vmatprep.subr.bf16.mxu0 %v8119_v55  ;;  %v4343_v55 = vld [vmem:[#allocation10 + $0x988] sm:$0xff] }
 0x4c8   : > { %6823 = vmatpush2.bf16.msra.mxu1 %v8046_v23  ;;  %v8071_v23 = vcombine.high %v4167_v44, %v4171_v26  ;;  %v8247_v42 = vcombine.high %v4343_v55, %v4347_v47  ;;  %v8246_v5 = vcombine.low %v4343_v55, %v4347_v47  ;;  %v4283_v49 = vld [vmem:[#allocation10 + $0x7a8] sm:$0xff] }
 0x4c9   : > { %6824 = vmatprep.subr.bf16.mxu1 %v8039_v33  ;;  %v4291_v33 = vld [vmem:[#allocation10 + $0x7e8] sm:$0xff] }
 0x4ca   : > { %6858 = vmatpush1.bf16.msra.mxu0 %v8118_v46  ;;  %v4339_v46 = vld [vmem:[#allocation10 + $0x968] sm:$0xff] }
 0x4cb   : > { %6859 = vmatprep.subr.bf16.mxu0 %v8111_v34  ;;  %v8191_v34 = vcombine.high %v4287_v43, %v4291_v33  ;;  %v8239_v39 = vcombine.high %v4335_v35, %v4339_v46  ;;  %v4327_v1 = vld [vmem:[#allocation10 + $0x908] sm:$0xff] }
 0x4cc   : > { %6825 = vmatpush2.bf16.msra.mxu1 %v8038_v28  ;;  %6739 = vmatmul.mubr.bf16.gmra.mxu0 %v10530_v52  ;;  %v4279_v28 = vld [vmem:[#allocation10 + $0x788] sm:$0xff] }
 0x4cd   : > { %6826 = vmatprep.subr.bf16.mxu1 %v8031_v45  ;;  %6887 = vmatprep.mubr.bf16.mxu0 %v10439_v20  ;;  %v8190_v45 = vcombine.low %v4287_v43, %v4291_v33  ;;  %v4331_v25 = vld [vmem:[#allocation10 + $0x928] sm:$0xff] }
 0x4ce   : > { %6860 = vmatpush1.bf16.msra.mxu0 %v8110_v2  ;;  %v8183_v2 = vcombine.high %v4279_v28, %v4283_v49  ;;  %v4275_v32 = vld [vmem:[#allocation10 + $0x768] sm:$0xff]  ;;  %v8231_v6 = vcombine.high %v4327_v1, %v4331_v25 }
 0x4cf   : > { %6861 = vmatprep.subr.bf16.mxu0 %v8103_v11  ;;  %v8238_v11 = vcombine.low %v4335_v35, %v4339_v46  ;;  %v4319_v27 = vld [vmem:[#allocation10 + $0x8c8] sm:$0xff] }
 0x4d0   : > { %6827 = vmatpush2.bf16.msra.mxu1 %v8030_v36  ;;  %v4271_v36 = vld [vmem:[#allocation10 + $0x748] sm:$0xff] }
 0x4d1   : > { %6828 = vmatprep.subr.bf16.mxu1 %v8023_v18  ;;  %v8182_v18 = vcombine.low %v4279_v28, %v4283_v49  ;;  %v4323_v10 = vld [vmem:[#allocation10 + $0x8e8] sm:$0xff] }
 0x4d2   : > { %6862 = vmatpush1.bf16.msra.mxu0 %v8102_v58  ;;  %v8175_v58 = vcombine.high %v4271_v36, %v4275_v32  ;;  %v4267_v0 = vld [vmem:[#allocation10 + $0x728] sm:$0xff]  ;;  %v8223_v19 = vcombine.high %v4319_v27, %v4323_v10 }
 0x4d3   : > { %6863 = vmatprep.subr.bf16.mxu0 %v8095_v61  ;;  %v8230_v61 = vcombine.low %v4327_v1, %v4331_v25  ;;  %v4311_v30 = vld [vmem:[#allocation10 + $0x888] sm:$0xff] }
 0x4d4   : > { %6829 = vmatpush2.bf16.msra.mxu1 %v8022_v29  ;;  %v4263_v29 = vld [vmem:[#allocation10 + $0x708] sm:$0xff] }
 0x4d5   : > { %6830 = vmatprep.subr.bf16.mxu1 %v8015_v4  ;;  %v8174_v4 = vcombine.low %v4271_v36, %v4275_v32  ;;  %v4315_v21 = vld [vmem:[#allocation10 + $0x8a8] sm:$0xff] }
 0x4d6   : > { %6864 = vmatpush1.bf16.msra.mxu0 %v8094_v37  ;;  %v8167_v37 = vcombine.high %v4263_v29, %v4267_v0  ;;  %v4259_v24 = vld [vmem:[#allocation10 + $0x6e8] sm:$0xff]  ;;  %v8215_v40 = vcombine.high %v4311_v30, %v4315_v21 }
 0x4d7   : > { %6865 = vmatprep.subr.bf16.mxu0 %v8087_v62  ;;  %v8222_v62 = vcombine.low %v4319_v27, %v4323_v10  ;;  %v4307_v63 = vld [vmem:[#allocation10 + $0x868] sm:$0xff] }
 0x4d8   : > { %6831 = vmatpush2.bf16.msra.mxu1 %v8014_v59  ;;  %v4255_v59 = vld [vmem:[#allocation10 + $0x6c8] sm:$0xff] }
 0x4d9   : > { %6832 = vmatprep.subr.bf16.mxu1 %v8007_v8  ;;  %v8166_v8 = vcombine.low %v4263_v29, %v4267_v0  ;;  %v8159_v31 = vcombine.high %v4255_v59, %v4259_v24  ;;  %v4251_v44 = vld [vmem:[#allocation10 + $0x6a8] sm:$0xff] }
 0x4da   : > { %6866 = vmatpush1.bf16.msra.mxu0 %v8086_v54  ;;  %v4303_v54 = vld [vmem:[#allocation10 + $0x848] sm:$0xff] }
 0x4db   : > { %6867 = vmatprep.subr.bf16.mxu0 %v8079_v14  ;;  %v8214_v14 = vcombine.low %v4311_v30, %v4315_v21  ;;  %v8207_v26 = vcombine.high %v4303_v54, %v4307_v63  ;;  %v4299_v55 = vld [vmem:[#allocation10 + $0x828] sm:$0xff] }
 0x4dc   : > { %6833 = vmatpush2.bf16.msra.mxu1 %v8006_v60  ;;  %v4247_v60 = vld [vmem:[#allocation10 + $0x688] sm:$0xff] }
 0x4dd   : > { %6908 = vmatprep.subr.bf16.mxu1 %v8255_v53  ;;  %v8158_v53 = vcombine.low %v4255_v59, %v4259_v24  ;;  %v8151_v47 = vcombine.high %v4247_v60, %v4251_v44  ;;  %v4243_v43 = vld [vmem:[#allocation10 + $0x668] sm:$0xff] }
 0x4de   : > { %6868 = vmatpush1.bf16.msra.mxu0 %v8078_v12  ;;  %v4295_v12 = vld [vmem:[#allocation10 + $0x808] sm:$0xff] }
 0x4df   : > { %6835 = vmatmul.mubr.bf16.vlgmr.msra.gmra.mxu1 %v10469_v22  ;;  %6869 = vmatprep.subr.bf16.mxu0 %v8071_v23  ;;  %v8206_v23 = vcombine.low %v4303_v54, %v4307_v63  ;;  %v8199_v33 = vcombine.high %v4295_v12, %v4299_v55  ;;  %v4419_v35 = vld [vmem:[#allocation10 + $0xbe8] sm:$0xff] }
 0x4e0   : > { %6844 = vmatprep.mubr.bf16.mxu1 %v10482_v16  ;;  %6909 = vmatpush1.bf16.msra.mxu1 %v8254_v9  ;;  %v4239_v9 = vld [vmem:[#allocation10 + $0x648] sm:$0xff] }
 0x4e1   : > { %6910 = vmatprep.subr.bf16.mxu1 %v8247_v42  ;;  %v8150_v42 = vcombine.low %v4247_v60, %v4251_v44  ;;  %v8143_v46 = vcombine.high %v4239_v9, %v4243_v43  ;;  %v4235_v28 = vld [vmem:[#allocation10 + $0x628] sm:$0xff] }
 0x4e2   : > { %6870 = vmatpush1.bf16.msra.mxu0 %v8070_v15  ;;  %v4415_v15 = vld [vmem:[#allocation10 + $0xbc8] sm:$0xff] }
 0x4e3   : > { %6871 = vmatprep.subr.bf16.mxu0 %v8191_v34  ;;  %v8198_v34 = vcombine.low %v4295_v12, %v4299_v55  ;;  %v8319_v49 = vcombine.high %v4415_v15, %v4419_v35  ;;  %v4411_v1 = vld [vmem:[#allocation10 + $0xba8] sm:$0xff] }
 0x4e4   : > { %6911 = vmatpush1.bf16.msra.mxu1 %v8246_v5  ;;  %v4231_v5 = vld [vmem:[#allocation10 + $0x608] sm:$0xff] }
 0x4e5   : > { %6912 = vmatprep.subr.bf16.mxu1 %v8239_v39  ;;  %v8142_v39 = vcombine.low %v4239_v9, %v4243_v43  ;;  %v8135_v25 = vcombine.high %v4231_v5, %v4235_v28  ;;  %v8134_v32 = vcombine.low %v4231_v5, %v4235_v28  ;;  %v4451_v29 = vld [vmem:[#allocation10 + $0xce8] sm:$0xff]  ;;  %v4100_v5 = vld [vmem:[#allocation10 + $0x1f0] sm:$0xff] }
 0x4e6   : > { %6872 = vmatpush2.bf16.msra.mxu0 %v8190_v45  ;;  %v4407_v45 = vld [vmem:[#allocation10 + $0xb88] sm:$0xff] }
 0x4e7   : > { %6845 = vmatmul.mubr.bf16.gmra.mxu1 %v10484_v57  ;;  %6873 = vmatprep.subr.bf16.mxu0 %v8183_v2  ;;  %v8318_v2 = vcombine.low %v4415_v15, %v4419_v35  ;;  %v8311_v36 = vcombine.high %v4407_v45, %v4411_v1  ;;  %v4443_v59 = vld [vmem:[#allocation10 + $0xca8] sm:$0xff] }
 0x4e8   : > { %6913 = vmatpush1.bf16.msra.mxu1 %v8238_v11  ;;  %6940 = vmatprep.mubr.bf16.mxu1 %v10507_v38  ;;  %v4455_v11 = vld [vmem:[#allocation10 + $0xd08] sm:$0x77] }
 0x4e9   : > { %6914 = vmatprep.subr.bf16.mxu1 %v8231_v6  ;;  %v4399_v6 = vld [vmem:[#allocation10 + $0xb48] sm:$0xff]  ;;  %v8359_v27 = vcombine.high %v4455_v11, %v4455_v11  ;;  %v8358_v10 = vcombine.low %v4455_v11, %v4455_v11  ;;  %v4092_v11 = vld [vmem:[#allocation10 + $0x1b0] sm:$0xff] }
 0x4ea   : > { %6874 = vmatpush2.bf16.msra.mxu0 %v8182_v18  ;;  %v4403_v18 = vld [vmem:[#allocation10 + $0xb68] sm:$0xff] }
 0x4eb   : > { %6875 = vmatprep.subr.bf16.mxu0 %v8175_v58  ;;  %v8310_v58 = vcombine.low %v4407_v45, %v4411_v1  ;;  %v8303_v0 = vcombine.high %v4399_v6, %v4403_v18  ;;  %v6573_v30 = vsel %vm6565_vm1, %v8358_v10, 0  ;;  %v4435_v60 = vld [vmem:[#allocation10 + $0xc68] sm:$0xff] }
 0x4ec   : > { %6915 = vmatpush1.bf16.msra.mxu1 %v8230_v61  ;;  %v4447_v61 = vld [vmem:[#allocation10 + $0xcc8] sm:$0xff] }
 0x4ed   : > { %6916 = vmatprep.subr.bf16.mxu1 %v8223_v19  ;;  %v4391_v19 = vld [vmem:[#allocation10 + $0xb08] sm:$0xff]  ;;  %v8351_v21 = vcombine.high %v4447_v61, %v4451_v29  ;;  %v8350_v54 = vcombine.low %v4447_v61, %v4451_v29  ;;  %v4084_v61 = vld [vmem:[#allocation10 + $0x170] sm:$0xff] }
 0x4ee   : > { %6876 = vmatpush2.bf16.msra.mxu0 %v8174_v4  ;;  %v4395_v4 = vld [vmem:[#allocation10 + $0xb28] sm:$0xff] }
 0x4ef   : > { %6877 = vmatprep.subr.bf16.mxu0 %v8167_v37  ;;  %v8302_v37 = vcombine.low %v4399_v6, %v4403_v18  ;;  %v8295_v24 = vcombine.high %v4391_v19, %v4395_v4  ;;  %v4427_v9 = vld [vmem:[#allocation10 + $0xc28] sm:$0xff]  ;;  %v4224_v6 = vld [vmem:[#allocation10 + $0x5d0] sm:$0xff] }
 0x4f0   : > { %6917 = vmatpush1.bf16.msra.mxu1 %v8222_v62  ;;  %v4439_v62 = vld [vmem:[#allocation10 + $0xc88] sm:$0xff]  ;;  %v4228_v18 = vld [vmem:[#allocation10 + $0x5f0] sm:$0xff] }
 0x4f1   : > { %6918 = vmatprep.subr.bf16.mxu1 %v8215_v40  ;;  %v4383_v40 = vld [vmem:[#allocation10 + $0xac8] sm:$0xff]  ;;  %v8343_v63 = vcombine.high %v4439_v62, %v4443_v59  ;;  %v8342_v12 = vcombine.low %v4439_v62, %v4443_v59  ;;  %v8129_v29 = vcombine.high %v4224_v6, %v4228_v18  ;;  %v4076_v62 = vld [vmem:[#allocation10 + $0x130] sm:$0xff] }
 0x4f2   : > { %6878 = vmatpush2.bf16.msra.mxu0 %v8166_v8  ;;  %v4387_v8 = vld [vmem:[#allocation10 + $0xae8] sm:$0xff] }
 0x4f3   : > { %6879 = vmatprep.subr.bf16.mxu0 %v8159_v31  ;;  %v8294_v31 = vcombine.low %v4391_v19, %v4395_v4  ;;  %v8287_v44 = vcombine.high %v4383_v40, %v4387_v8  ;;  %v4216_v19 = vld [vmem:[#allocation10 + $0x590] sm:$0xff] }
 0x4f4   : > { %6919 = vmatpush1.bf16.msra.mxu1 %v8214_v14  ;;  %v4431_v14 = vld [vmem:[#allocation10 + $0xc48] sm:$0xff]  ;;  %v4220_v4 = vld [vmem:[#allocation10 + $0x5b0] sm:$0xff] }
 0x4f5   : > { %6920 = vmatprep.subr.bf16.mxu1 %v8207_v26  ;;  %v4375_v26 = vld [vmem:[#allocation10 + $0xa88] sm:$0xff]  ;;  %v8335_v55 = vcombine.high %v4431_v14, %v4435_v60  ;;  %v8334_v15 = vcombine.low %v4431_v14, %v4435_v60  ;;  %v8121_v59 = vcombine.high %v4216_v19, %v4220_v4  ;;  %v4068_v14 = vld [vmem:[#allocation10 + $0xf0] sm:$0xff] }
 0x4f6   : > { %6880 = vmatpush2.bf16.msra.mxu0 %v8158_v53  ;;  %v4379_v53 = vld [vmem:[#allocation10 + $0xaa8] sm:$0xff] }
 0x4f7   : > { %6881 = vmatprep.subr.bf16.mxu0 %v8151_v47  ;;  %v8286_v47 = vcombine.low %v4383_v40, %v4387_v8  ;;  %v8279_v43 = vcombine.high %v4375_v26, %v4379_v53  ;;  %v4208_v40 = vld [vmem:[#allocation10 + $0x550] sm:$0xff] }
 0x4f8   : > { %6921 = vmatpush1.bf16.msra.mxu1 %v8206_v23  ;;  %v4423_v23 = vld [vmem:[#allocation10 + $0xc08] sm:$0xff]  ;;  %v4212_v8 = vld [vmem:[#allocation10 + $0x570] sm:$0xff] }
 0x4f9   : > { %6922 = vmatprep.subr.bf16.mxu1 %v8199_v33  ;;  %v4367_v33 = vld [vmem:[#allocation10 + $0xa48] sm:$0xff]  ;;  %v8327_v35 = vcombine.high %v4423_v23, %v4427_v9  ;;  %v8326_v45 = vcombine.low %v4423_v23, %v4427_v9  ;;  %v8113_v60 = vcombine.high %v4208_v40, %v4212_v8  ;;  %v4060_v23 = vld [vmem:[#allocation10 + $0xb0] sm:$0xff] }
 0x4fa   : > { %6882 = vmatpush2.bf16.msra.mxu0 %v8150_v42  ;;  %v4371_v42 = vld [vmem:[#allocation10 + $0xa68] sm:$0xff] }
 0x4fb   : > { %6883 = vmatprep.subr.bf16.mxu0 %v8143_v46  ;;  %v8278_v46 = vcombine.low %v4375_v26, %v4379_v53  ;;  %v8271_v28 = vcombine.high %v4367_v33, %v4371_v42  ;;  %v4200_v26 = vld [vmem:[#allocation10 + $0x510] sm:$0xff] }
 0x4fc   : > { %6923 = vmatpush1.bf16.msra.mxu1 %v8198_v34  ;;  %v4096_v34 = vld [vmem:[#allocation10 + $0x1d0] sm:$0xff] }
 0x4fd   : > { %6924 = vmatprep.subr.bf16.mxu1 %v8319_v49  ;;  %v4359_v49 = vld [vmem:[#allocation10 + $0xa08] sm:$0xff]  ;;  %v8001_v1 = vcombine.high %v4096_v34, %v4100_v5  ;;  %v4204_v53 = vld [vmem:[#allocation10 + $0x530] sm:$0xff] }
 0x4fe   : > { %6884 = vmatpush2.bf16.msra.mxu0 %v8142_v39  ;;  %v4363_v39 = vld [vmem:[#allocation10 + $0xa28] sm:$0xff]  ;;  %v8105_v9 = vcombine.high %v4200_v26, %v4204_v53 }
 0x4ff   : > { %6885 = vmatprep.subr.bf16.mxu0 %v8135_v25  ;;  %v8270_v25 = vcombine.low %v4367_v33, %v4371_v42  ;;  %v8262_v10 = vcombine.low %v4359_v49, %v4363_v39  ;;  %v4192_v33 = vld [vmem:[#allocation10 + $0x4d0] sm:$0xff] }
 0x500   : > { %6925 = vmatpush2.bf16.msra.mxu1 %v8318_v2  ;;  %v4088_v2 = vld [vmem:[#allocation10 + $0x190] sm:$0xff] }
 0x501   : > { %6926 = vmatprep.subr.bf16.mxu1 %v8311_v36  ;;  %v8263_v36 = vcombine.high %v4359_v49, %v4363_v39  ;;  %v4196_v42 = vld [vmem:[#allocation10 + $0x4f0] sm:$0xff] }
 0x502   : > { %6886 = vmatpush2.bf16.msra.mxu0 %v8134_v32  ;;  %v8000_v32 = vcombine.low %v4096_v34, %v4100_v5  ;;  %v4052_v34 = vld [vmem:[#allocation10 + $0x70] sm:$0xff]  ;;  %v8097_v5 = vcombine.high %v4192_v33, %v4196_v42 }
 0x503   : > { %8367 = vmatprep.subr.msk.bf16.mxu0 %vm6565_vm1, %v8359_v27  ;;  %v7993_v27 = vcombine.high %v4088_v2, %v4092_v11  ;;  %v4184_v49 = vld [vmem:[#allocation10 + $0x490] sm:$0xff] }
 0x504   : > { %6927 = vmatpush2.bf16.msra.mxu1 %v8310_v58  ;;  %v4080_v58 = vld [vmem:[#allocation10 + $0x150] sm:$0xff] }
 0x505   : > { %6928 = vmatprep.subr.bf16.mxu1 %v8303_v0  ;;  %6888 = vmatmul.mubr.bf16.vlgmr.msra.gmra.mxu0 %v10443_v56  ;;  %v7992_v0 = vcombine.low %v4088_v2, %v4092_v11  ;;  %v4188_v39 = vld [vmem:[#allocation10 + $0x4b0] sm:$0xff] }
 0x506   : > { %6897 = vmatprep.mubr.bf16.mxu0 %v10452_v48  ;;  %6968 = vmatpush1.bf16.msra.mxu0 %v6573_v30  ;;  %v7985_v30 = vcombine.high %v4080_v58, %v4084_v61  ;;  %v4044_v2 = vld [vmem:[#allocation10 + $0x30] sm:$0xff]  ;;  %v8089_v11 = vcombine.high %v4184_v49, %v4188_v39 }
 0x507   : > { %6969 = vmatprep.subr.bf16.mxu0 %v8351_v21  ;;  %v8128_v21 = vcombine.low %v4224_v6, %v4228_v18  ;;  %v4180_v6 = vld [vmem:[#allocation10 + $0x470] sm:$0xff] }
 0x508   : > { %6929 = vmatpush2.bf16.msra.mxu1 %v8302_v37  ;;  %v4072_v37 = vld [vmem:[#allocation10 + $0x110] sm:$0xff] }
 0x509   : > { %6930 = vmatprep.subr.bf16.mxu1 %v8295_v24  ;;  %v7984_v24 = vcombine.low %v4080_v58, %v4084_v61  ;;  %v4164_v58 = vld [vmem:[#allocation10 + $0x3f0] sm:$0xff] }
 0x50a   : > { %6970 = vmatpush1.bf16.msra.mxu0 %v8350_v54  ;;  %v7977_v54 = vcombine.high %v4072_v37, %v4076_v62 }
 0x50b   : > { %6971 = vmatprep.subr.bf16.mxu0 %v8343_v63  ;;  %v8120_v63 = vcombine.low %v4216_v19, %v4220_v4  ;;  %v4172_v19 = vld [vmem:[#allocation10 + $0x430] sm:$0xff] }
 0x50c   : > { %6931 = vmatpush2.bf16.msra.mxu1 %v8294_v31  ;;  %v4064_v31 = vld [vmem:[#allocation10 + $0xd0] sm:$0xff] }
 0x50d   : > { %6932 = vmatprep.subr.bf16.mxu1 %v8287_v44  ;;  %6898 = vmatmul.mubr.bf16.gmra.mxu0 %v10454_v17  ;;  %v7976_v44 = vcombine.low %v4072_v37, %v4076_v62  ;;  %v4156_v37 = vld [vmem:[#allocation10 + $0x3b0] sm:$0xff] }
 0x50e   : > { %6972 = vmatpush1.bf16.msra.mxu0 %v8342_v12  ;;  %6993 = vmatprep.mubr.bf16.mxu0 %v9829_v13  ;;  %v7969_v12 = vcombine.high %v4064_v31, %v4068_v14 }
 0x50f   : > { %6973 = vmatprep.subr.bf16.mxu0 %v8335_v55  ;;  %v8112_v55 = vcombine.low %v4208_v40, %v4212_v8  ;;  %v4288_v40 = vld [vmem:[#allocation10 + $0x7d0] sm:$0xff] }
 0x510   : > { %6933 = vmatpush2.bf16.msra.mxu1 %v8286_v47  ;;  %v4056_v47 = vld [vmem:[#allocation10 + $0x90] sm:$0xff] }
 0x511   : > { %6934 = vmatprep.subr.bf16.mxu1 %v8279_v43  ;;  %v7968_v43 = vcombine.low %v4064_v31, %v4068_v14  ;;  %v4292_v8 = vld [vmem:[#allocation10 + $0x7f0] sm:$0xff] }
 0x512   : > { %6974 = vmatpush1.bf16.msra.mxu0 %v8334_v15  ;;  %v7961_v15 = vcombine.high %v4056_v47, %v4060_v23  ;;  %v4144_v31 = vld [vmem:[#allocation10 + $0x350] sm:$0xff] }
 0x513   : > { %6975 = vmatprep.subr.bf16.mxu0 %v8327_v35  ;;  %v8104_v35 = vcombine.low %v4200_v26, %v4204_v53  ;;  %v4148_v14 = vld [vmem:[#allocation10 + $0x370] sm:$0xff] }
 0x514   : > { %6935 = vmatpush2.bf16.msra.mxu1 %v8278_v46  ;;  %v4048_v46 = vld [vmem:[#allocation10 + $0x50] sm:$0xff] }
 0x515   : > { %6936 = vmatprep.subr.bf16.mxu1 %v8271_v28  ;;  %v7960_v28 = vcombine.low %v4056_v47, %v4060_v23  ;;  %v4280_v53 = vld [vmem:[#allocation10 + $0x790] sm:$0xff]  ;;  %v8192_v47 = vcombine.low %v4288_v40, %v4292_v8 }
 0x516   : > { %6976 = vmatpush1.bf16.msra.mxu0 %v8326_v45  ;;  %v7953_v45 = vcombine.high %v4048_v46, %v4052_v34  ;;  %v4136_v23 = vld [vmem:[#allocation10 + $0x310] sm:$0xff] }
 0x517   : > { %7014 = vmatprep.subr.bf16.mxu0 %v8001_v1  ;;  %v8096_v1 = vcombine.low %v4192_v33, %v4196_v42  ;;  %v8048_v42 = vcombine.low %v4144_v31, %v4148_v14 }
 0x518   : > { %6937 = vmatpush2.bf16.msra.mxu1 %v8270_v25  ;;  %v4040_v25 = vld [vmem:[#allocation10 + $0x10] sm:$0xff] }
 0x519   : > { %6938 = vmatprep.subr.bf16.mxu1 %v8263_v36  ;;  %8368 = vmatmul.mubr.msk.bf16.vlgmr.msra.gmra.mxu0 %vm6558_vm5, %v10494_v41  ;;  %v7952_v36 = vcombine.low %v4048_v46, %v4052_v34  ;;  %v7945_v18 = vcombine.high %v4040_v25, %v4044_v2 }
 0x51a   : > { %7015 = vmatpush1.bf16.msra.mxu0 %v8000_v32  ;;  %7003 = vmatprep.mubr.bf16.mxu0 %v9829_v13  ;;  %v4176_v32 = vld [vmem:[#allocation10 + $0x450] sm:$0xff] }
 0x51b   : > { %7016 = vmatprep.subr.bf16.mxu0 %v7993_v27  ;;  %v8088_v27 = vcombine.low %v4184_v49, %v4188_v39  ;;  %v8081_v61 = vcombine.high %v4176_v32, %v4180_v6 }
 0x51c   : > { %6939 = vmatpush2.bf16.msra.mxu1 %v8262_v10  ;;  %v4160_v10 = vld [vmem:[#allocation10 + $0x3d0] sm:$0xff] }
 0x51d   : > { %7067 = vmatprep.subr.bf16.mxu1 %v8129_v29  ;;  %v7944_v29 = vcombine.low %v4040_v25, %v4044_v2  ;;  %v8065_v4 = vcombine.high %v4160_v10, %v4164_v58  ;;  %v4268_v25 = vld [vmem:[#allocation10 + $0x730] sm:$0xff] }
 0x51e   : > { %7017 = vmatpush1.bf16.msra.mxu0 %v7992_v0  ;;  %v4168_v0 = vld [vmem:[#allocation10 + $0x410] sm:$0xff] }
 0x51f   : > { %6941 = vmatmul.mubr.bf16.vlgmr.msra.gmra.mxu1 %v10521_v50  ;;  %7018 = vmatprep.subr.bf16.mxu0 %v7985_v30  ;;  %v8080_v30 = vcombine.low %v4176_v32, %v4180_v6  ;;  %v8073_v62 = vcombine.high %v4168_v0, %v4172_v19  ;;  %v4120_v32 = vld [vmem:[#allocation10 + $0x290] sm:$0xff] }
 0x520   : > { %6950 = vmatprep.mubr.bf16.mxu1 %v10524_v51  ;;  %7068 = vmatpush1.bf16.msra.mxu1 %v8128_v21  ;;  %v4152_v21 = vld [vmem:[#allocation10 + $0x390] sm:$0xff] }
 0x521   : > { %7069 = vmatprep.subr.bf16.mxu1 %v8121_v59  ;;  %8369 = vmatmul.mubr.msk.bf16.gmra.mxu0 %vm6558_vm5, %v10505_v7  ;;  %v8056_v26 = vcombine.low %v4152_v21, %v4156_v37  ;;  %v4124_v6 = vld [vmem:[#allocation10 + $0x2b0] sm:$0xff] }
 0x522   : > { %7019 = vmatpush1.bf16.msra.mxu0 %v7984_v24  ;;  %7046 = vmatprep.mubr.bf16.mxu0 %v10467_v3  ;;  %v8064_v24 = vcombine.low %v4160_v10, %v4164_v58 }
 0x523   : > { %7020 = vmatprep.subr.bf16.mxu0 %v7977_v54  ;;  %v8057_v54 = vcombine.high %v4152_v21, %v4156_v37  ;;  %v4112_v37 = vld [vmem:[#allocation10 + $0x250] sm:$0xff] }
 0x524   : > { %7070 = vmatpush1.bf16.msra.mxu1 %v8120_v63  ;;  %v8072_v63 = vcombine.low %v4168_v0, %v4172_v19  ;;  %v4260_v0 = vld [vmem:[#allocation10 + $0x6f0] sm:$0xff] }
 0x525   : > { %7071 = vmatprep.subr.bf16.mxu1 %v8113_v60  ;;  %v8193_v60 = vcombine.high %v4288_v40, %v4292_v8 }
 0x526   : > { %7021 = vmatpush1.bf16.msra.mxu0 %v7976_v44 }
 0x527   : > { %6951 = vmatmul.mubr.bf16.gmra.mxu1 %v10530_v52  ;;  %7022 = vmatprep.subr.bf16.mxu0 %v7969_v12  ;;  %v4284_v12 = vld [vmem:[#allocation10 + $0x7b0] sm:$0xff] }
 0x528   : > { %7072 = vmatpush1.bf16.msra.mxu1 %v8112_v55  ;;  %7099 = vmatprep.mubr.bf16.mxu1 %v10439_v20  ;;  %v8049_v55 = vcombine.high %v4144_v31, %v4148_v14  ;;  %v8184_v34 = vcombine.low %v4280_v53, %v4284_v12  ;;  %v4252_v31 = vld [vmem:[#allocation10 + $0x6b0] sm:$0xff] }
 0x529   : > { %7073 = vmatprep.subr.bf16.mxu1 %v8105_v9  ;;  %v4140_v9 = vld [vmem:[#allocation10 + $0x330] sm:$0xff] }
 0x52a   : > { %7023 = vmatpush1.bf16.msra.mxu0 %v7968_v43  ;;  %v8185_v43 = vcombine.high %v4280_v53, %v4284_v12  ;;  %v8041_v46 = vcombine.high %v4136_v23, %v4140_v9  ;;  %v4104_v53 = vld [vmem:[#allocation10 + $0x210] sm:$0xff] }
 0x52b   : > { %7024 = vmatprep.subr.bf16.mxu0 %v7961_v15  ;;  %v4272_v15 = vld [vmem:[#allocation10 + $0x750] sm:$0xff] }
 0x52c   : > { %7074 = vmatpush1.bf16.msra.mxu1 %v8104_v35  ;;  %v4276_v35 = vld [vmem:[#allocation10 + $0x770] sm:$0xff] }
 0x52d   : > { %7075 = vmatprep.subr.bf16.mxu1 %v8097_v5  ;;  %v4128_v5 = vld [vmem:[#allocation10 + $0x2d0] sm:$0xff]  ;;  %v8177_v49 = vcombine.high %v4272_v15, %v4276_v35 }
 0x52e   : > { %7025 = vmatpush1.bf16.msra.mxu0 %v7960_v28  ;;  %v4132_v28 = vld [vmem:[#allocation10 + $0x2f0] sm:$0xff] }
 0x52f   : > { %7026 = vmatprep.subr.bf16.mxu0 %v7953_v45  ;;  %v8040_v45 = vcombine.low %v4136_v23, %v4140_v9  ;;  %v8033_v2 = vcombine.high %v4128_v5, %v4132_v28  ;;  %v4108_v12 = vld [vmem:[#allocation10 + $0x230] sm:$0xff] }
 0x530   : > { %7076 = vmatpush1.bf16.msra.mxu1 %v8096_v1  ;;  %v4264_v1 = vld [vmem:[#allocation10 + $0x710] sm:$0xff] }
 0x531   : > { %7077 = vmatprep.subr.bf16.mxu1 %v8089_v11  ;;  %v8176_v11 = vcombine.low %v4272_v15, %v4276_v35  ;;  %v8009_v35 = vcombine.high %v4104_v53, %v4108_v12 }
 0x532   : > { %7027 = vmatpush1.bf16.msra.mxu0 %v7952_v36 }
 0x533   : > { %7028 = vmatprep.subr.bf16.mxu0 %v7945_v18  ;;  %v8169_v18 = vcombine.high %v4264_v1, %v4268_v25 }
 0x534   : > { %7078 = vmatpush1.bf16.msra.mxu1 %v8088_v27 }
 0x535   : > { %7079 = vmatprep.subr.bf16.mxu1 %v8081_v61  ;;  %v6677_v59 = vpop.f32.mrf.mxu1  ;;  %v8032_v61 = vcombine.low %v4128_v5, %v4132_v28  ;;  %v4352_v5 = vld [vmem:[#allocation10 + $0x9d0] sm:$0xff] }
 0x536   : > { %7029 = vmatpush1.bf16.msra.mxu0 %v7944_v29  ;;  %v4256_v29 = vld [vmem:[#allocation10 + $0x6d0] sm:$0xff] }
 0x537   : > { %7030 = vmatprep.subr.bf16.mxu0 %v8065_v4  ;;  %v6679_v44 = vpop.f32.mrf.mxu1  ;;  %v8025_v4 = vcombine.high %v4120_v32, %v4124_v6  ;;  %v4356_v28 = vld [vmem:[#allocation10 + $0x9f0] sm:$0xff] }
 0x538   : > { %7080 = vmatpush1.bf16.msra.mxu1 %v8080_v30  ;;  %v8168_v30 = vcombine.low %v4264_v1, %v4268_v25  ;;  %v8008_v25 = vcombine.low %v4104_v53, %v4108_v12  ;;  %v4440_v53 = vld [vmem:[#allocation10 + $0xc90] sm:$0xff] }
 0x539   : > { %7081 = vmatprep.subr.bf16.mxu1 %v8073_v62  ;;  %v6681_v33 = vpop.f32.mrf.mxu1  ;;  %v4116_v62 = vld [vmem:[#allocation10 + $0x270] sm:$0xff] }
 0x53a   : > { %7031 = vmatpush2.bf16.msra.mxu0 %v8064_v24  ;;  %v8161_v24 = vcombine.high %v4256_v29, %v4260_v0  ;;  %v4444_v12 = vld [vmem:[#allocation10 + $0xcb0] sm:$0xff] }
 0x53b   : > { %7032 = vmatprep.subr.bf16.mxu0 %v8057_v54  ;;  %v6683_v39 = vpop.f32.mrf.mxu1  ;;  %v8024_v54 = vcombine.low %v4120_v32, %v4124_v6  ;;  %v8257_v32 = vcombine.high %v4352_v5, %v4356_v28 }
 0x53c   : > { %7082 = vmatpush1.bf16.msra.mxu1 %v8072_v63  ;;  %v4248_v63 = vld [vmem:[#allocation10 + $0x690] sm:$0xff] }
 0x53d   : > { %7083 = vmatprep.subr.bf16.mxu1 %v8193_v60  ;;  %v6687_v10 = vpop.f32.mrf.mxu1  ;;  %v8017_v60 = vcombine.high %v4112_v37, %v4116_v62 }
 0x53e   : > { %7033 = vmatpush2.bf16.msra.mxu0 %v8056_v26 }
 0x53f   : > { %7034 = vmatprep.subr.bf16.mxu0 %v8049_v55  ;;  %v8153_v55 = vcombine.high %v4248_v63, %v4252_v31 }
 0x540   : > { %7084 = vmatpush2.bf16.msra.mxu1 %v8192_v47 }
 0x541   : > { %7085 = vmatprep.subr.bf16.mxu1 %v8185_v43  ;;  %v8016_v43 = vcombine.low %v4112_v37, %v4116_v62 }
 0x542   : > { %7035 = vmatpush2.bf16.msra.mxu0 %v8048_v42  ;;  %v4244_v42 = vld [vmem:[#allocation10 + $0x670] sm:$0xff] }
 0x543   : > { %7036 = vmatprep.subr.bf16.mxu0 %v8041_v46  ;;  %v8152_v46 = vcombine.low %v4248_v63, %v4252_v31  ;;  %v4328_v63 = vld [vmem:[#allocation10 + $0x910] sm:$0xff] }
 0x544   : > { %7086 = vmatpush2.bf16.msra.mxu1 %v8184_v34  ;;  %v6624_v36 = vpop.f32.mrf.mxu0  ;;  %v4332_v31 = vld [vmem:[#allocation10 + $0x930] sm:$0xff] }
 0x545   : > { %7087 = vmatprep.subr.bf16.mxu1 %v8177_v49  ;;  %v10554_v27 = vadd.f32 %v6677_v59, %v6624_v36  ;;  %v6689_v59 = vpop.f32.mrf.mxu1 }
 0x546   : > { %7037 = vmatpush2.bf16.msra.mxu0 %v8040_v45  ;;  %v6626_v58 = vpop.f32.mrf.mxu0 }
 0x547   : > { %v10556_v19 = vadd.f32 %v6679_v44, %v6626_v58  ;;  %7038 = vmatprep.subr.bf16.mxu0 %v8033_v2  ;;  %v8160_v44 = vcombine.low %v4256_v29, %v4260_v0  ;;  %v6691_v23 = vpop.f32.mrf.mxu1  ;;  %v4232_v2 = vld [vmem:[#allocation10 + $0x610] sm:$0xff] }
 0x548   : > { %7088 = vmatpush2.bf16.msra.mxu1 %v8176_v11  ;;  %v6628_v21 = vpop.f32.mrf.mxu0  ;;  %v4236_v11 = vld [vmem:[#allocation10 + $0x630] sm:$0xff] }
 0x549   : > { %7089 = vmatprep.subr.bf16.mxu1 %v8169_v18  ;;  %v10558_v40 = vadd.f32 %v6681_v33, %v6628_v21  ;;  %v4240_v33 = vld [vmem:[#allocation10 + $0x650] sm:$0xff]  ;;  %v6693_v45 = vpop.f32.mrf.mxu1  ;;  %v8137_v58 = vcombine.high %v4232_v2, %v4236_v11 }
 0x54a   : > { %7039 = vmatpush2.bf16.msra.mxu0 %v8032_v61  ;;  %v6630_v8 = vpop.f32.mrf.mxu0  ;;  %v8145_v49 = vcombine.high %v4240_v33, %v4244_v42  ;;  %v8144_v6 = vcombine.low %v4240_v33, %v4244_v42  ;;  %v4344_v18 = vld [vmem:[#allocation10 + $0x990] sm:$0xff]  ;;  %v8256_v61 = vcombine.low %v4352_v5, %v4356_v28  ;;  %v8345_v33 = vcombine.high %v4440_v53, %v4444_v12 }
 0x54b   : > { %v10560_v14 = vadd.f32 %v6683_v39, %v6630_v8  ;;  %7040 = vmatprep.subr.bf16.mxu0 %v8025_v4  ;;  %v4456_v29 = vld [vmem:[#allocation10 + $0xd10] sm:$0x77]  ;;  %v8136_v4 = vcombine.low %v4232_v2, %v4236_v11  ;;  %v8232_v42 = vcombine.low %v4328_v63, %v4332_v31  ;;  %v8344_v5 = vcombine.low %v4440_v53, %v4444_v12  ;;  %v4085_v53 = vld [vmem:[#allocation10 + $0x178] sm:$0xff] }
 0x54c   : > { %7090 = vmatpush2.bf16.msra.mxu1 %v8168_v30  ;;  %v6634_v26 = vpop.f32.mrf.mxu0  ;;  %v4336_v30 = vld [vmem:[#allocation10 + $0x950] sm:$0xff]  ;;  %v8361_v37 = vcombine.high %v4456_v29, %v4456_v29  ;;  %v8360_v62 = vcombine.low %v4456_v29, %v4456_v29  ;;  %v4101_v29 = vld [vmem:[#allocation10 + $0x1f8] sm:$0xff] }
 0x54d   : > { %7091 = vmatprep.subr.bf16.mxu1 %v8161_v24  ;;  %v10562_v47 = vadd.f32 %v6687_v10, %v6634_v26  ;;  %v4348_v10 = vld [vmem:[#allocation10 + $0x9b0] sm:$0xff] }
 0x54e   : > { %7041 = vmatpush2.bf16.msra.mxu0 %v8024_v54  ;;  %v6636_v9 = vpop.f32.mrf.mxu0  ;;  %v8249_v0 = vcombine.high %v4344_v18, %v4348_v10  ;;  %v4340_v21 = vld [vmem:[#allocation10 + $0x970] sm:$0xff]  ;;  %v8248_v24 = vcombine.low %v4344_v18, %v4348_v10 }
 0x54f   : > { %v10564_v15 = vadd.f32 %v6689_v59, %v6636_v9  ;;  %7042 = vmatprep.subr.bf16.mxu0 %v8017_v60  ;;  %v4448_v59 = vld [vmem:[#allocation10 + $0xcd0] sm:$0xff]  ;;  %v8241_v54 = vcombine.high %v4336_v30, %v4340_v21  ;;  %v6579_v60 = vsel %vm6565_vm1, %v8360_v62, 0  ;;  %v8240_v26 = vcombine.low %v4336_v30, %v4340_v21 }
 0x550   : > { %7092 = vmatpush2.bf16.msra.mxu1 %v8160_v44  ;;  %v6638_v34 = vpop.f32.mrf.mxu0  ;;  %v4452_v8 = vld [vmem:[#allocation10 + $0xcf0] sm:$0xff] }
 0x551   : > { %7093 = vmatprep.subr.bf16.mxu1 %v8153_v55  ;;  %v10566_v39 = vadd.f32 %v6691_v23, %v6638_v34  ;;  %v8353_v44 = vcombine.high %v4448_v59, %v4452_v8  ;;  %v8233_v55 = vcombine.high %v4328_v63, %v4332_v31  ;;  %v8352_v23 = vcombine.low %v4448_v59, %v4452_v8  ;;  %v4320_v9 = vld [vmem:[#allocation10 + $0x8d0] sm:$0xff]  ;;  %v4093_v59 = vld [vmem:[#allocation10 + $0x1b8] sm:$0xff] }
 0x552   : > { %7043 = vmatpush2.bf16.msra.mxu0 %v8016_v43  ;;  %v6640_v1 = vpop.f32.mrf.mxu0  ;;  %v4324_v43 = vld [vmem:[#allocation10 + $0x8f0] sm:$0xff] }
 0x553   : > { %v10568_v36 = vadd.f32 %v6693_v45, %v6640_v1  ;;  %7044 = vmatprep.subr.bf16.mxu0 %v8009_v35  ;;  %v4432_v35 = vld [vmem:[#allocation10 + $0xc50] sm:$0xff]  ;;  %v8225_v34 = vcombine.high %v4320_v9, %v4324_v43  ;;  %v8224_v1 = vcombine.low %v4320_v9, %v4324_v43 }
 0x554   : > { %7094 = vmatpush2.bf16.msra.mxu1 %v8152_v46  ;;  %v4436_v46 = vld [vmem:[#allocation10 + $0xc70] sm:$0xff] }
 0x555   : > { %7095 = vmatprep.subr.bf16.mxu1 %v8145_v49  ;;  %v4312_v28 = vld [vmem:[#allocation10 + $0x890] sm:$0xff]  ;;  %v8337_v45 = vcombine.high %v4432_v35, %v4436_v46 }
 0x556   : > { %7045 = vmatpush2.bf16.msra.mxu0 %v8008_v25  ;;  %v4316_v49 = vld [vmem:[#allocation10 + $0x8b0] sm:$0xff] }
 0x557   : > { %7120 = vmatprep.subr.bf16.mxu0 %v8257_v32  ;;  %v4424_v25 = vld [vmem:[#allocation10 + $0xc10] sm:$0xff]  ;;  %v8217_v11 = vcombine.high %v4312_v28, %v4316_v49  ;;  %v8336_v32 = vcombine.low %v4432_v35, %v4436_v46  ;;  %v4077_v35 = vld [vmem:[#allocation10 + $0x138] sm:$0xff] }
 0x558   : > { %7096 = vmatpush2.bf16.msra.mxu1 %v8144_v6  ;;  %v4428_v2 = vld [vmem:[#allocation10 + $0xc30] sm:$0xff] }
 0x559   : > { %7097 = vmatprep.subr.bf16.mxu1 %v8137_v58  ;;  %7047 = vmatmul.mubr.bf16.vlgmr.msra.gmra.mxu0 %v10469_v22  ;;  %v4304_v6 = vld [vmem:[#allocation10 + $0x850] sm:$0xff]  ;;  %v8329_v10 = vcombine.high %v4424_v25, %v4428_v2  ;;  %v8216_v58 = vcombine.low %v4312_v28, %v4316_v49 }
 0x55a   : > { %7056 = vmatprep.mubr.bf16.mxu0 %v10482_v16  ;;  %7121 = vmatpush1.bf16.msra.mxu0 %v8256_v61  ;;  %v4308_v18 = vld [vmem:[#allocation10 + $0x870] sm:$0xff]  ;;  %v4097_v61 = vld [vmem:[#allocation10 + $0x1d8] sm:$0xff] }
 0x55b   : > { %7122 = vmatprep.subr.bf16.mxu0 %v8249_v0  ;;  %v8209_v0 = vcombine.high %v4304_v6, %v4308_v18  ;;  %v4296_v30 = vld [vmem:[#allocation10 + $0x810] sm:$0xff]  ;;  %v8208_v62 = vcombine.low %v4304_v6, %v4308_v18 }
 0x55c   : > { %7098 = vmatpush2.bf16.msra.mxu1 %v8136_v4  ;;  %v8328_v4 = vcombine.low %v4424_v25, %v4428_v2  ;;  %v4300_v21 = vld [vmem:[#allocation10 + $0x830] sm:$0xff]  ;;  %v4065_v25 = vld [vmem:[#allocation10 + $0xd8] sm:$0xff] }
 0x55d   : > { %8370 = vmatprep.subr.msk.bf16.mxu1 %vm6565_vm1, %v8361_v37  ;;  %v8003_v37 = vcombine.high %v4097_v61, %v4101_v29  ;;  %v8201_v8 = vcombine.high %v4296_v30, %v4300_v21  ;;  %v4416_v63 = vld [vmem:[#allocation10 + $0xbd0] sm:$0xff]  ;;  %v4069_v2 = vld [vmem:[#allocation10 + $0xf8] sm:$0xff] }
 0x55e   : > { %7123 = vmatpush1.bf16.msra.mxu0 %v8248_v24  ;;  %v4089_v24 = vld [vmem:[#allocation10 + $0x198] sm:$0xff]  ;;  %v4420_v31 = vld [vmem:[#allocation10 + $0xbf0] sm:$0xff] }
 0x55f   : > { %7100 = vmatmul.mubr.bf16.vlgmr.msra.gmra.mxu1 %v10443_v56  ;;  %7124 = vmatprep.subr.bf16.mxu0 %v8241_v54  ;;  %v8002_v54 = vcombine.low %v4097_v61, %v4101_v29  ;;  %v8321_v12 = vcombine.high %v4416_v63, %v4420_v31  ;;  %v4412_v9 = vld [vmem:[#allocation10 + $0xbb0] sm:$0xff]  ;;  %v4057_v29 = vld [vmem:[#allocation10 + $0x98] sm:$0xff] }
 0x560   : > { %7109 = vmatprep.mubr.bf16.mxu1 %v10452_v48  ;;  %7180 = vmatpush1.bf16.msra.mxu1 %v6579_v60  ;;  %v7995_v60 = vcombine.high %v4089_v24, %v4093_v59  ;;  %v4400_v28 = vld [vmem:[#allocation10 + $0xb50] sm:$0xff] }
 0x561   : > { %7181 = vmatprep.subr.bf16.mxu1 %v8353_v44  ;;  %7057 = vmatmul.mubr.bf16.gmra.mxu0 %v10484_v57  ;;  %v8200_v44 = vcombine.low %v4296_v30, %v4300_v21  ;;  %v4404_v49 = vld [vmem:[#allocation10 + $0xb70] sm:$0xff]  ;;  %v7970_v21 = vcombine.low %v4065_v25, %v4069_v2 }
 0x562   : > { %7125 = vmatpush1.bf16.msra.mxu0 %v8240_v26  ;;  %7152 = vmatprep.mubr.bf16.mxu0 %v10507_v38  ;;  %v4081_v26 = vld [vmem:[#allocation10 + $0x158] sm:$0xff]  ;;  %v4392_v18 = vld [vmem:[#allocation10 + $0xb10] sm:$0xff]  ;;  %v8304_v61 = vcombine.low %v4400_v28, %v4404_v49 }
 0x563   : > { %7126 = vmatprep.subr.bf16.mxu0 %v8233_v55  ;;  %v7994_v55 = vcombine.low %v4089_v24, %v4093_v59  ;;  %v7987_v43 = vcombine.high %v4081_v26, %v4085_v53  ;;  %v4049_v59 = vld [vmem:[#allocation10 + $0x58] sm:$0xff] }
 0x564   : > { %7182 = vmatpush1.bf16.msra.mxu1 %v8352_v23  ;;  %v4408_v23 = vld [vmem:[#allocation10 + $0xb90] sm:$0xff] }
 0x565   : > { %7183 = vmatprep.subr.bf16.mxu1 %v8345_v33  ;;  %v8320_v33 = vcombine.low %v4416_v63, %v4420_v31  ;;  %v8313_v46 = vcombine.high %v4408_v23, %v4412_v9 }
 0x566   : > { %7127 = vmatpush1.bf16.msra.mxu0 %v8232_v42  ;;  %v4073_v42 = vld [vmem:[#allocation10 + $0x118] sm:$0xff] }
 0x567   : > { %7110 = vmatmul.mubr.bf16.gmra.mxu1 %v10454_v17  ;;  %7128 = vmatprep.subr.bf16.mxu0 %v8225_v34  ;;  %v6783_v34 = vpop.f32.mrf.mxu1  ;;  %v7978_v6 = vcombine.low %v4073_v42, %v4077_v35 }
 0x568   : > { %7184 = vmatpush1.bf16.msra.mxu1 %v8344_v5  ;;  %7205 = vmatprep.mubr.bf16.mxu1 %v9829_v13  ;;  %v7986_v5 = vcombine.low %v4081_v26, %v4085_v53  ;;  %v4380_v26 = vld [vmem:[#allocation10 + $0xab0] sm:$0xff] }
 0x569   : > { %7185 = vmatprep.subr.bf16.mxu1 %v8337_v45  ;;  %v7979_v45 = vcombine.high %v4073_v42, %v4077_v35 }
 0x56a   : > { %7129 = vmatpush1.bf16.msra.mxu0 %v8224_v1  ;;  %v8312_v1 = vcombine.low %v4408_v23, %v4412_v9  ;;  %v4041_v9 = vld [vmem:[#allocation10 + $0x18] sm:$0xff] }
 0x56b   : > { %7130 = vmatprep.subr.bf16.mxu0 %v8217_v11  ;;  %v8305_v11 = vcombine.high %v4400_v28, %v4404_v49  ;;  %v4368_v49 = vld [vmem:[#allocation10 + $0xa50] sm:$0xff] }
 0x56c   : > { %7186 = vmatpush1.bf16.msra.mxu1 %v8336_v32  ;;  %v6785_v32 = vpop.f32.mrf.mxu1 }
 0x56d   : > { %7187 = vmatprep.subr.bf16.mxu1 %v8329_v10  ;;  %v4396_v10 = vld [vmem:[#allocation10 + $0xb30] sm:$0xff] }
 0x56e   : > { %7131 = vmatpush1.bf16.msra.mxu0 %v8216_v58  ;;  %v7971_v58 = vcombine.high %v4065_v25, %v4069_v2  ;;  %v6787_v30 = vpop.f32.mrf.mxu1  ;;  %v10589_v2 = vld [vmem:[#allocation10 + $0x3d8] sm:$0xff] }
 0x56f   : > { %7132 = vmatprep.subr.bf16.mxu0 %v8209_v0  ;;  %v4061_v0 = vld [vmem:[#allocation10 + $0xb8] sm:$0xff] }
 0x570   : > { %7188 = vmatpush1.bf16.msra.mxu1 %v8328_v4  ;;  %v8297_v4 = vcombine.high %v4392_v18, %v4396_v10  ;;  %v7963_v24 = vcombine.high %v4057_v29, %v4061_v0  ;;  %v6789_v63 = vpop.f32.mrf.mxu1  ;;  %v7962_v31 = vcombine.low %v4057_v29, %v4061_v0  ;;  %v4360_v0 = vld [vmem:[#allocation10 + $0xa10] sm:$0xff] }
 0x571   : > { %7226 = vmatprep.subr.bf16.mxu1 %v8003_v37  ;;  %v4384_v37 = vld [vmem:[#allocation10 + $0xad0] sm:$0xff] }
 0x572   : > { %7133 = vmatpush1.bf16.msra.mxu0 %v8208_v62  ;;  %v4388_v62 = vld [vmem:[#allocation10 + $0xaf0] sm:$0xff] }
 0x573   : > { %8371 = vmatmul.mubr.msk.bf16.vlgmr.msra.gmra.mxu1 %vm6558_vm5, %v10494_v41  ;;  %7134 = vmatprep.subr.bf16.mxu0 %v8201_v8  ;;  %v4053_v8 = vld [vmem:[#allocation10 + $0x78] sm:$0xff]  ;;  %v8288_v23 = vcombine.low %v4384_v37, %v4388_v62 }
 0x574   : > { %7227 = vmatpush1.bf16.msra.mxu1 %v8002_v54  ;;  %7215 = vmatprep.mubr.bf16.mxu1 %v9829_v13  ;;  %v8289_v54 = vcombine.high %v4384_v37, %v4388_v62 }
 0x575   : > { %7228 = vmatprep.subr.bf16.mxu1 %v7995_v60 }
 0x576   : > { %7135 = vmatpush1.bf16.msra.mxu0 %v8200_v44  ;;  %v4376_v44 = vld [vmem:[#allocation10 + $0xa90] sm:$0xff] }
 0x577   : > { %7136 = vmatprep.subr.bf16.mxu0 %v8321_v12  ;;  %v7955_v12 = vcombine.high %v4049_v59, %v4053_v8  ;;  %v8281_v35 = vcombine.high %v4376_v44, %v4380_v26 }
 0x578   : > { %7229 = vmatpush1.bf16.msra.mxu1 %v7994_v55 }
 0x579   : > { %7230 = vmatprep.subr.bf16.mxu1 %v7987_v43  ;;  %v4045_v43 = vld [vmem:[#allocation10 + $0x38] sm:$0xff] }
 0x57a   : > { %7137 = vmatpush2.bf16.msra.mxu0 %v8320_v33  ;;  %v7947_v25 = vcombine.high %v4041_v9, %v4045_v43 }
 0x57b   : > { %8372 = vmatmul.mubr.msk.bf16.gmra.mxu1 %vm6558_vm5, %v10505_v7  ;;  %7138 = vmatprep.subr.bf16.mxu0 %v8313_v46  ;;  %v6793_v46 = vpop.f32.mrf.mxu1 }
 0x57c   : > { %7231 = vmatpush1.bf16.msra.mxu1 %v7986_v5  ;;  %7258 = vmatprep.mubr.bf16.mxu1 %v10467_v3  ;;  %v8296_v3 = vcombine.low %v4392_v18, %v4396_v10  ;;  %v7954_v5 = vcombine.low %v4049_v59, %v4053_v8  ;;  %v8280_v18 = vcombine.low %v4376_v44, %v4380_v26  ;;  %v7439_v10 = vld [vmem:[#allocation12 + $0x8] sm:$0xff]  ;;  %v4153_v8 = vld [vmem:[#allocation10 + $0x398] sm:$0xff] }
 0x57d   : > { %7232 = vmatprep.subr.bf16.mxu1 %v7979_v45  ;;  %v4372_v45 = vld [vmem:[#allocation10 + $0xa70] sm:$0xff] }
 0x57e   : > { %7139 = vmatpush2.bf16.msra.mxu0 %v8312_v1  ;;  %v8273_v29 = vcombine.high %v4368_v49, %v4372_v45  ;;  %v8272_v44 = vcombine.low %v4368_v49, %v4372_v45 }
 0x57f   : > { %7140 = vmatprep.subr.bf16.mxu0 %v8305_v11  ;;  %v10591_v11 = vld [vmem:[#allocation10 + $0x3f8] sm:$0xff] }
 0x580   : > { %7233 = vmatpush1.bf16.msra.mxu1 %v7978_v6  ;;  %v7446_v6 = vld [vmem:[#allocation12 + $0x40] sm:$0xff]  ;;  %v8067_v62 = vcombine.high %v10589_v2, %v10591_v11 }
 0x581   : > { %7234 = vmatprep.subr.bf16.mxu1 %v7971_v58 }
 0x582   : > { %7141 = vmatpush2.bf16.msra.mxu0 %v8304_v61 }
 0x583   : > { %7142 = vmatprep.subr.bf16.mxu0 %v8297_v4  ;;  %v6795_v4 = vpop.f32.mrf.mxu1 }
 0x584   : > { %7235 = vmatpush1.bf16.msra.mxu1 %v7970_v21  ;;  %v6730_v60 = vpop.f32.mrf.mxu0  ;;  %v7447_v21 = vld [vmem:[#allocation12 + $0x48] sm:$0xff] }
 0x585   : > { %7236 = vmatprep.subr.bf16.mxu1 %v7963_v24  ;;  %v6731_v53 = vadd.f32 %v6730_v60, %v10554_v27 }
 0x586   : > { %7143 = vmatpush2.bf16.msra.mxu0 %v8296_v3  ;;  %v6732_v55 = vpop.f32.mrf.mxu0 }
 0x587   : > { %v6784_v33 = vadd.f32 %v6783_v34, %v6731_v53  ;;  %v6733_v42 = vadd.f32 %v6732_v55, %v10556_v19  ;;  %7144 = vmatprep.subr.bf16.mxu0 %v8289_v54  ;;  %v7438_v34 = vld [vmem:[#allocation12] sm:$0xff] }
 0x588   : > { %7237 = vmatpush1.bf16.msra.mxu1 %v7962_v31  ;;  %v6734_v28 = vpop.f32.mrf.mxu0  ;;  %v7454_v31 = vld [vmem:[#allocation12 + $0x80] sm:$0xff] }
 0x589   : > { %7238 = vmatprep.subr.bf16.mxu1 %v7955_v12  ;;  %v6786_v1 = vadd.f32 %v6785_v32, %v6733_v42  ;;  %v6735_v27 = vadd.f32 %v6734_v28, %v10558_v40  ;;  %v4364_v32 = vld [vmem:[#allocation10 + $0xa30] sm:$0xff]  ;;  %v7946_v40 = vcombine.low %v4041_v9, %v4045_v43  ;;  %v7470_v24 = vmul.f32 %v7438_v34, %v6784_v33  ;;  %v4225_v9 = vld [vmem:[#allocation10 + $0x5d8] sm:$0xff]  ;;  %v6797_v33 = vpop.f32.mrf.mxu1 }
 0x58a   : > { %7145 = vmatpush2.bf16.msra.mxu0 %v8288_v23  ;;  %v6736_v19 = vpop.f32.mrf.mxu0  ;;  %v8265_v26 = vcombine.high %v4360_v0, %v4364_v32  ;;  %v4229_v43 = vld [vmem:[#allocation10 + $0x5f8] sm:$0xff] }
 0x58b   : > { %v6788_v58 = vadd.f32 %v6787_v30, %v6735_v27  ;;  %v6737_v61 = vadd.f32 %v6736_v19, %v10560_v14  ;;  %7146 = vmatprep.subr.bf16.mxu0 %v8281_v35  ;;  %v4157_v14 = vld [vmem:[#allocation10 + $0x3b8] sm:$0xff]  ;;  %v7471_v54 = vmul.f32 %v7439_v10, %v6786_v1  ;;  %v8264_v1 = vcombine.low %v4360_v0, %v4364_v32 }
 0x58c   : > { %7239 = vmatpush1.bf16.msra.mxu1 %v7954_v5  ;;  %v6740_v37 = vpop.f32.mrf.mxu0  ;;  %v8059_v35 = vcombine.high %v4153_v8, %v4157_v14  ;;  %v4145_v27 = vld [vmem:[#allocation10 + $0x358] sm:$0xff]  ;;  %v8131_v34 = vcombine.high %v4225_v9, %v4229_v43  ;;  %v8058_v10 = vcombine.low %v4153_v8, %v4157_v14 }
 0x58d   : > { %v7478_v3 = vmul.f32 %v7446_v6, %v6788_v58  ;;  %7240 = vmatprep.subr.bf16.mxu1 %v7947_v25  ;;  %v6790_v59 = vadd.f32 %v6789_v63, %v6737_v61  ;;  %v6741_v30 = vadd.f32 %v6740_v37, %v10562_v47  ;;  %v8066_v47 = vcombine.low %v10589_v2, %v10591_v11  ;;  %v7455_v63 = vld [vmem:[#allocation12 + $0x88] sm:$0xff]  ;;  %v4149_v25 = vld [vmem:[#allocation10 + $0x378] sm:$0xff]  ;;  %v6799_v11 = vpop.f32.mrf.mxu1 }
 0x58e   : > { %7147 = vmatpush2.bf16.msra.mxu0 %v8280_v18  ;;  %v6742_v60 = vpop.f32.mrf.mxu0  ;;  %v7463_v58 = vld [vmem:[#allocation12 + $0xc8] sm:$0xff]  ;;  %v4217_v61 = vld [vmem:[#allocation10 + $0x598] sm:$0xff]  ;;  %v8051_v0 = vcombine.high %v4145_v27, %v4149_v25  ;;  %v8130_v37 = vcombine.low %v4225_v9, %v4229_v43 }
 0x58f   : > { %v7502_v53 = vadd.f32 %v7478_v3, %v7470_v24  ;;  %v7479_v12 = vmul.f32 %v7447_v21, %v6790_v59  ;;  %v6794_v55 = vadd.f32 %v6793_v46, %v6741_v30  ;;  %v6743_v23 = vadd.f32 %v6742_v60, %v10564_v15  ;;  %7148 = vmatprep.subr.bf16.mxu0 %v8273_v29  ;;  %v7462_v46 = vld [vmem:[#allocation12 + $0xc0] sm:$0xff]  ;;  %v4221_v29 = vld [vmem:[#allocation10 + $0x5b8] sm:$0xff] }
 0x590   : > { %7241 = vmatpush1.bf16.msra.mxu1 %v7946_v40  ;;  %v6744_v42 = vpop.f32.mrf.mxu0  ;;  %v4137_v32 = vld [vmem:[#allocation10 + $0x318] sm:$0xff]  ;;  %v8050_v3 = vcombine.low %v4145_v27, %v4149_v25  ;;  %v8122_v60 = vcombine.low %v4217_v61, %v4221_v29 }
 0x591   : > { %v7511_v5 = vadd.f32 %v7479_v12, %v7471_v54  ;;  %v7486_v28 = vmul.f32 %v7454_v31, %v6794_v55  ;;  %7242 = vmatprep.subr.bf16.mxu1 %v8067_v62  ;;  %v6796_v49 = vadd.f32 %v6795_v4, %v6743_v23  ;;  %v6745_v45 = vadd.f32 %v6744_v42, %v10566_v39  ;;  %v4141_v21 = vld [vmem:[#allocation10 + $0x338] sm:$0xff] }
 0x592   : > { %7149 = vmatpush2.bf16.msra.mxu0 %v8272_v44  ;;  %v6746_v15 = vpop.f32.mrf.mxu0  ;;  %v4209_v59 = vld [vmem:[#allocation10 + $0x558] sm:$0xff]  ;;  %v8043_v14 = vcombine.high %v4137_v32, %v4141_v21 }
 0x593   : > { %v7503_v6 = vadd.f32 %v7502_v53, %v7486_v28  ;;  %v7487_v19 = vmul.f32 %v7455_v63, %v6796_v49  ;;  %v6798_v18 = vadd.f32 %v6797_v33, %v6745_v45  ;;  %v6747_v2 = vadd.f32 %v6746_v15, %v10568_v36  ;;  %7150 = vmatprep.subr.bf16.mxu0 %v8265_v26  ;;  %v4213_v30 = vld [vmem:[#allocation10 + $0x578] sm:$0xff] }
 0x594   : > { %7243 = vmatpush2.bf16.msra.mxu1 %v8066_v47  ;;  %v8123_v36 = vcombine.high %v4217_v61, %v4221_v29  ;;  %v4129_v54 = vld [vmem:[#allocation10 + $0x2d8] sm:$0xff]  ;;  %v8115_v44 = vcombine.high %v4209_v59, %v4213_v30  ;;  %v8042_v26 = vcombine.low %v4137_v32, %v4141_v21  ;;  %v8114_v43 = vcombine.low %v4209_v59, %v4213_v30 }
 0x595   : > { %v7512_v39 = vadd.f32 %v7511_v5, %v7487_v19  ;;  %v7494_v4 = vmul.f32 %v7462_v46, %v6798_v18  ;;  %7244 = vmatprep.subr.bf16.mxu1 %v8059_v35  ;;  %v6800_v40 = vadd.f32 %v6799_v11, %v6747_v2  ;;  %v4133_v31 = vld [vmem:[#allocation10 + $0x2f8] sm:$0xff] }
 0x596   : > { %7151 = vmatpush2.bf16.msra.mxu0 %v8264_v1  ;;  %v4201_v53 = vld [vmem:[#allocation10 + $0x518] sm:$0xff]  ;;  %v8035_v55 = vcombine.high %v4129_v54, %v4133_v31  ;;  %v8034_v47 = vcombine.low %v4129_v54, %v4133_v31 }
 0x597   : > { %v10602_v62 = vadd.f32 %v7503_v6, %v7494_v4  ;;  %v7495_v24 = vmul.f32 %v7463_v58, %v6800_v40  ;;  %7279 = vmatprep.subr.bf16.mxu0 %v8131_v34  ;;  %v4205_v12 = vld [vmem:[#allocation10 + $0x538] sm:$0xff] }
 0x598   : > { %7245 = vmatpush2.bf16.msra.mxu1 %v8058_v10  ;;  %v4121_v23 = vld [vmem:[#allocation10 + $0x298] sm:$0xff]  ;;  %v8107_v33 = vcombine.high %v4201_v53, %v4205_v12  ;;  %v8106_v49 = vcombine.low %v4201_v53, %v4205_v12 }
 0x599   : > { %v10604_v8 = vadd.f32 %v7512_v39, %v7495_v24  ;;  %7246 = vmatprep.subr.bf16.mxu1 %v8051_v0  ;;  %7153 = vmatmul.mubr.bf16.vlgmr.msra.gmra.mxu0 %v10521_v50  ;;  %v4125_v9 = vld [vmem:[#allocation10 + $0x2b8] sm:$0xff] }
 0x59a   : > { %7162 = vmatprep.mubr.bf16.mxu0 %v10524_v51  ;;  %7280 = vmatpush1.bf16.msra.mxu0 %v8130_v37  ;;  %v4193_v63 = vld [vmem:[#allocation10 + $0x4d8] sm:$0xff]  ;;  %v8027_v35 = vcombine.high %v4121_v23, %v4125_v9  ;;  %v8026_v46 = vcombine.low %v4121_v23, %v4125_v9 }
 0x59b   : > { %7281 = vmatprep.subr.bf16.mxu0 %v8123_v36  ;;  %v4197_v42 = vld [vmem:[#allocation10 + $0x4f8] sm:$0xff] }
 0x59c   : > { %7247 = vmatpush2.bf16.msra.mxu1 %v8050_v3  ;;  %v4113_v5 = vld [vmem:[#allocation10 + $0x258] sm:$0xff]  ;;  %v8099_v45 = vcombine.high %v4193_v63, %v4197_v42  ;;  %v8098_v6 = vcombine.low %v4193_v63, %v4197_v42 }
 0x59d   : > { %7248 = vmatprep.subr.bf16.mxu1 %v8043_v14  ;;  %v4117_v28 = vld [vmem:[#allocation10 + $0x278] sm:$0xff] }
 0x59e   : > { %7282 = vmatpush1.bf16.msra.mxu0 %v8122_v60  ;;  %v4185_v15 = vld [vmem:[#allocation10 + $0x498] sm:$0xff]  ;;  %v8019_v27 = vcombine.high %v4113_v5, %v4117_v28  ;;  %v8018_v18 = vcombine.low %v4113_v5, %v4117_v28 }
 0x59f   : > { %7283 = vmatprep.subr.bf16.mxu0 %v8115_v44  ;;  %v4189_v1 = vld [vmem:[#allocation10 + $0x4b8] sm:$0xff] }
 0x5a0   : > { %7249 = vmatpush2.bf16.msra.mxu1 %v8042_v26  ;;  %v4105_v25 = vld [vmem:[#allocation10 + $0x218] sm:$0xff]  ;;  %v8091_v19 = vcombine.high %v4185_v15, %v4189_v1  ;;  %v8090_v10 = vcombine.low %v4185_v15, %v4189_v1 }
 0x5a1   : > { %7250 = vmatprep.subr.bf16.mxu1 %v8035_v55  ;;  %7163 = vmatmul.mubr.bf16.gmra.mxu0 %v10530_v52  ;;  %v4109_v34 = vld [vmem:[#allocation10 + $0x238] sm:$0xff] }
 0x5a2   : > { %7284 = vmatpush1.bf16.msra.mxu0 %v8114_v43  ;;  %7311 = vmatprep.mubr.bf16.mxu0 %v10439_v20  ;;  %v4177_v20 = vld [vmem:[#allocation10 + $0x458] sm:$0xff]  ;;  %v8011_v11 = vcombine.high %v4105_v25, %v4109_v34  ;;  %v8010_v39 = vcombine.low %v4105_v25, %v4109_v34  ;;  %v6836_v43 = vpop.f32.mrf.mxu1 }
 0x5a3   : > { %7285 = vmatprep.subr.bf16.mxu0 %v8107_v33  ;;  %v4181_v2 = vld [vmem:[#allocation10 + $0x478] sm:$0xff] }
 0x5a4   : > { %7251 = vmatpush2.bf16.msra.mxu1 %v8034_v47  ;;  %v4353_v58 = vld [vmem:[#allocation10 + $0x9d8] sm:$0xff]  ;;  %v8083_v29 = vcombine.high %v4177_v20, %v4181_v2  ;;  %v8082_v32 = vcombine.low %v4177_v20, %v4181_v2  ;;  %v6838_v28 = vpop.f32.mrf.mxu1 }
 0x5a5   : > { %7252 = vmatprep.subr.bf16.mxu1 %v8027_v35  ;;  %v4357_v61 = vld [vmem:[#allocation10 + $0x9f8] sm:$0xff] }
 0x5a6   : > { %7286 = vmatpush1.bf16.msra.mxu0 %v8106_v49  ;;  %v4169_v4 = vld [vmem:[#allocation10 + $0x418] sm:$0xff]  ;;  %v8259_v0 = vcombine.high %v4353_v58, %v4357_v61  ;;  %v8258_v36 = vcombine.low %v4353_v58, %v4357_v61 }
 0x5a7   : > { %7287 = vmatprep.subr.bf16.mxu0 %v8099_v45  ;;  %v4173_v40 = vld [vmem:[#allocation10 + $0x438] sm:$0xff] }
 0x5a8   : > { %7253 = vmatpush2.bf16.msra.mxu1 %v8026_v46  ;;  %v4345_v21 = vld [vmem:[#allocation10 + $0x998] sm:$0xff]  ;;  %v8075_v24 = vcombine.high %v4169_v4, %v4173_v40  ;;  %v8074_v14 = vcombine.low %v4169_v4, %v4173_v40 }
 0x5a9   : > { %7254 = vmatprep.subr.bf16.mxu1 %v8019_v27  ;;  %v4349_v37 = vld [vmem:[#allocation10 + $0x9b8] sm:$0xff] }
 0x5aa   : > { %7288 = vmatpush1.bf16.msra.mxu0 %v8098_v6  ;;  %v4289_v3 = vld [vmem:[#allocation10 + $0x7d8] sm:$0xff]  ;;  %v8251_v30 = vcombine.high %v4345_v21, %v4349_v37  ;;  %v8250_v44 = vcombine.low %v4345_v21, %v4349_v37  ;;  %v6840_v6 = vpop.f32.mrf.mxu1 }
 0x5ab   : > { %7289 = vmatprep.subr.bf16.mxu0 %v8091_v19  ;;  %v4293_v59 = vld [vmem:[#allocation10 + $0x7f8] sm:$0xff] }
 0x5ac   : > { %7255 = vmatpush2.bf16.msra.mxu1 %v8018_v18  ;;  %v4337_v54 = vld [vmem:[#allocation10 + $0x958] sm:$0xff]  ;;  %v8195_v60 = vcombine.high %v4289_v3, %v4293_v59  ;;  %v8194_v55 = vcombine.low %v4289_v3, %v4293_v59  ;;  %v6842_v58 = vpop.f32.mrf.mxu1 }
 0x5ad   : > { %7256 = vmatprep.subr.bf16.mxu1 %v8011_v11  ;;  %v4341_v31 = vld [vmem:[#allocation10 + $0x978] sm:$0xff] }
 0x5ae   : > { %7290 = vmatpush1.bf16.msra.mxu0 %v8090_v10  ;;  %v4281_v26 = vld [vmem:[#allocation10 + $0x798] sm:$0xff]  ;;  %v8243_v12 = vcombine.high %v4337_v54, %v4341_v31  ;;  %v8242_v47 = vcombine.low %v4337_v54, %v4341_v31 }
 0x5af   : > { %7291 = vmatprep.subr.bf16.mxu0 %v8083_v29  ;;  %v4285_v53 = vld [vmem:[#allocation10 + $0x7b8] sm:$0xff] }
 0x5b0   : > { %7257 = vmatpush2.bf16.msra.mxu1 %v8010_v39  ;;  %v4329_v23 = vld [vmem:[#allocation10 + $0x918] sm:$0xff]  ;;  %v8187_v33 = vcombine.high %v4281_v26, %v4285_v53 }
 0x5b1   : > { %7332 = vmatprep.subr.bf16.mxu1 %v8259_v0  ;;  %v4333_v9 = vld [vmem:[#allocation10 + $0x938] sm:$0xff] }
 0x5b2   : > { %7292 = vmatpush1.bf16.msra.mxu0 %v8082_v32  ;;  %v4277_v63 = vld [vmem:[#allocation10 + $0x778] sm:$0xff]  ;;  %v8235_v42 = vcombine.high %v4329_v23, %v4333_v9  ;;  %v8234_v45 = vcombine.low %v4329_v23, %v4333_v9 }
 0x5b3   : > { %7259 = vmatmul.mubr.bf16.vlgmr.msra.gmra.mxu1 %v10469_v22  ;;  %7293 = vmatprep.subr.bf16.mxu0 %v8075_v24  ;;  %v4273_v22 = vld [vmem:[#allocation10 + $0x758] sm:$0xff] }
 0x5b4   : > { %7268 = vmatprep.mubr.bf16.mxu1 %v10482_v16  ;;  %7333 = vmatpush1.bf16.msra.mxu1 %v8258_v36  ;;  %v8186_v16 = vcombine.low %v4281_v26, %v4285_v53  ;;  %v4321_v35 = vld [vmem:[#allocation10 + $0x8d8] sm:$0xff]  ;;  %v8179_v49 = vcombine.high %v4273_v22, %v4277_v63  ;;  %v8178_v27 = vcombine.low %v4273_v22, %v4277_v63  ;;  %v6846_v36 = vpop.f32.mrf.mxu1 }
 0x5b5   : > { %7334 = vmatprep.subr.bf16.mxu1 %v8251_v30  ;;  %v4325_v5 = vld [vmem:[#allocation10 + $0x8f8] sm:$0xff] }
 0x5b6   : > { %7294 = vmatpush1.bf16.msra.mxu0 %v8074_v14  ;;  %v4265_v46 = vld [vmem:[#allocation10 + $0x718] sm:$0xff]  ;;  %v8227_v1 = vcombine.high %v4321_v35, %v4325_v5  ;;  %v8226_v18 = vcombine.low %v4321_v35, %v4325_v5  ;;  %v6848_v23 = vpop.f32.mrf.mxu1 }
 0x5b7   : > { %7295 = vmatprep.subr.bf16.mxu0 %v8195_v60  ;;  %v4269_v15 = vld [vmem:[#allocation10 + $0x738] sm:$0xff] }
 0x5b8   : > { %7335 = vmatpush1.bf16.msra.mxu1 %v8250_v44  ;;  %v4313_v25 = vld [vmem:[#allocation10 + $0x898] sm:$0xff]  ;;  %v8171_v19 = vcombine.high %v4265_v46, %v4269_v15 }
 0x5b9   : > { %7336 = vmatprep.subr.bf16.mxu1 %v8243_v12  ;;  %v4317_v34 = vld [vmem:[#allocation10 + $0x8b8] sm:$0xff] }
 0x5ba   : > { %7296 = vmatpush2.bf16.msra.mxu0 %v8194_v55  ;;  %v4261_v20 = vld [vmem:[#allocation10 + $0x6f8] sm:$0xff]  ;;  %v8219_v2 = vcombine.high %v4313_v25, %v4317_v34  ;;  %v8218_v29 = vcombine.low %v4313_v25, %v4317_v34 }
 0x5bb   : > { %7269 = vmatmul.mubr.bf16.gmra.mxu1 %v10484_v57  ;;  %7297 = vmatprep.subr.bf16.mxu0 %v8187_v33  ;;  %v4257_v57 = vld [vmem:[#allocation10 + $0x6d8] sm:$0xff] }
 0x5bc   : > { %7337 = vmatpush1.bf16.msra.mxu1 %v8242_v47  ;;  %7364 = vmatprep.mubr.bf16.mxu1 %v10507_v38  ;;  %v8170_v38 = vcombine.low %v4265_v46, %v4269_v15  ;;  %v4305_v11 = vld [vmem:[#allocation10 + $0x858] sm:$0xff]  ;;  %v8163_v61 = vcombine.high %v4257_v57, %v4261_v20  ;;  %v8162_v21 = vcombine.low %v4257_v57, %v4261_v20 }
 0x5bd   : > { %7338 = vmatprep.subr.bf16.mxu1 %v8235_v42  ;;  %v4309_v10 = vld [vmem:[#allocation10 + $0x878] sm:$0xff] }
 0x5be   : > { %7298 = vmatpush2.bf16.msra.mxu0 %v8186_v16  ;;  %v4249_v39 = vld [vmem:[#allocation10 + $0x698] sm:$0xff]  ;;  %v8211_v0 = vcombine.high %v4305_v11, %v4309_v10  ;;  %v8210_v30 = vcombine.low %v4305_v11, %v4309_v10 }
 0x5bf   : > { %7299 = vmatprep.subr.bf16.mxu0 %v8179_v49  ;;  %v4253_v4 = vld [vmem:[#allocation10 + $0x6b8] sm:$0xff] }
 0x5c0   : > { %7339 = vmatpush1.bf16.msra.mxu1 %v8234_v45  ;;  %v4297_v37 = vld [vmem:[#allocation10 + $0x818] sm:$0xff]  ;;  %v8155_v59 = vcombine.high %v4249_v39, %v4253_v4  ;;  %v8154_v53 = vcombine.low %v4249_v39, %v4253_v4  ;;  %v6850_v45 = vpop.f32.mrf.mxu1 }
 0x5c1   : > { %7340 = vmatprep.subr.bf16.mxu1 %v8227_v1  ;;  %v4301_v24 = vld [vmem:[#allocation10 + $0x838] sm:$0xff] }
 0x5c2   : > { %7300 = vmatpush2.bf16.msra.mxu0 %v8178_v27  ;;  %v4241_v54 = vld [vmem:[#allocation10 + $0x658] sm:$0xff]  ;;  %v8203_v44 = vcombine.high %v4297_v37, %v4301_v24  ;;  %v8202_v33 = vcombine.low %v4297_v37, %v4301_v24 }
 0x5c3   : > { %7301 = vmatprep.subr.bf16.mxu0 %v8171_v19  ;;  %v4245_v31 = vld [vmem:[#allocation10 + $0x678] sm:$0xff] }
 0x5c4   : > { %7341 = vmatpush1.bf16.msra.mxu1 %v8226_v18  ;;  %v4417_v12 = vld [vmem:[#allocation10 + $0xbd8] sm:$0xff]  ;;  %v8146_v5 = vcombine.low %v4241_v54, %v4245_v31 }
 0x5c5   : > { %7342 = vmatprep.subr.bf16.mxu1 %v8219_v2  ;;  %v6889_v40 = vpop.f32.mrf.mxu0  ;;  %v4421_v55 = vld [vmem:[#allocation10 + $0xbf8] sm:$0xff]  ;;  %v6852_v2 = vpop.f32.mrf.mxu1 }
 0x5c6   : > { %v10614_v32 = vadd.f32 %v6889_v40, %v6836_v43  ;;  %7302 = vmatpush2.bf16.msra.mxu0 %v8170_v38  ;;  %v8147_v43 = vcombine.high %v4241_v54, %v4245_v31  ;;  %v4233_v22 = vld [vmem:[#allocation10 + $0x618] sm:$0xff]  ;;  %v8323_v16 = vcombine.high %v4417_v12, %v4421_v55  ;;  %v8322_v1 = vcombine.low %v4417_v12, %v4421_v55 }
 0x5c7   : > { %v6891_v3 = vpop.f32.mrf.mxu0  ;;  %7303 = vmatprep.subr.bf16.mxu0 %v8163_v61  ;;  %v4237_v63 = vld [vmem:[#allocation10 + $0x638] sm:$0xff] }
 0x5c8   : > { %7343 = vmatpush1.bf16.msra.mxu1 %v8218_v29  ;;  %v10616_v14 = vadd.f32 %v6891_v3, %v6838_v28  ;;  %v4409_v28 = vld [vmem:[#allocation10 + $0xb98] sm:$0xff]  ;;  %v8139_v15 = vcombine.high %v4233_v22, %v4237_v63  ;;  %v8138_v18 = vcombine.low %v4233_v22, %v4237_v63 }
 0x5c9   : > { %7344 = vmatprep.subr.bf16.mxu1 %v8211_v0  ;;  %v6893_v60 = vpop.f32.mrf.mxu0  ;;  %v4413_v49 = vld [vmem:[#allocation10 + $0xbb8] sm:$0xff] }
 0x5ca   : > { %v10618_v26 = vadd.f32 %v6893_v60, %v6840_v6  ;;  %7304 = vmatpush2.bf16.msra.mxu0 %v8162_v21  ;;  %v4457_v25 = vld [vmem:[#allocation10 + $0xd18] sm:$0x77]  ;;  %v8315_v6 = vcombine.high %v4409_v28, %v4413_v49 }
 0x5cb   : > { %v6895_v9 = vpop.f32.mrf.mxu0  ;;  %7305 = vmatprep.subr.bf16.mxu0 %v8155_v59  ;;  %v4401_v57 = vld [vmem:[#allocation10 + $0xb58] sm:$0xff]  ;;  %v8363_v11 = vcombine.high %v4457_v25, %v4457_v25  ;;  %v8362_v10 = vcombine.low %v4457_v25, %v4457_v25 }
 0x5cc   : > { %7345 = vmatpush1.bf16.msra.mxu1 %v8210_v30  ;;  %v10620_v47 = vadd.f32 %v6895_v9, %v6842_v58  ;;  %v4405_v20 = vld [vmem:[#allocation10 + $0xb78] sm:$0xff]  ;;  %v8314_v58 = vcombine.low %v4409_v28, %v4413_v49 }
 0x5cd   : > { %7346 = vmatprep.subr.bf16.mxu1 %v8203_v44  ;;  %v6899_v42 = vpop.f32.mrf.mxu0  ;;  %v4449_v29 = vld [vmem:[#allocation10 + $0xcd8] sm:$0xff]  ;;  %v8307_v4 = vcombine.high %v4401_v57, %v4405_v20  ;;  %v6585_v21 = vsel %vm6565_vm1, %v8362_v10, 0  ;;  %v8306_v24 = vcombine.low %v4401_v57, %v4405_v20 }
 0x5ce   : > { %v10622_v35 = vadd.f32 %v6899_v42, %v6846_v36  ;;  %7306 = vmatpush2.bf16.msra.mxu0 %v8154_v53  ;;  %v4453_v39 = vld [vmem:[#allocation10 + $0xcf8] sm:$0xff] }
 0x5cf   : > { %v6901_v46 = vpop.f32.mrf.mxu0  ;;  %7307 = vmatprep.subr.bf16.mxu0 %v8147_v43  ;;  %v4393_v40 = vld [vmem:[#allocation10 + $0xb18] sm:$0xff]  ;;  %v8355_v37 = vcombine.high %v4449_v29, %v4453_v39  ;;  %v8354_v60 = vcombine.low %v4449_v29, %v4453_v39 }
 0x5d0   : > { %7347 = vmatpush1.bf16.msra.mxu1 %v8202_v33  ;;  %v10624_v27 = vadd.f32 %v6901_v46, %v6848_v23  ;;  %v4397_v0 = vld [vmem:[#allocation10 + $0xb38] sm:$0xff] }
 0x5d1   : > { %7348 = vmatprep.subr.bf16.mxu1 %v8323_v16  ;;  %v6903_v34 = vpop.f32.mrf.mxu0  ;;  %v4441_v36 = vld [vmem:[#allocation10 + $0xc98] sm:$0xff]  ;;  %v8299_v30 = vcombine.high %v4393_v40, %v4397_v0  ;;  %v8298_v12 = vcombine.low %v4393_v40, %v4397_v0 }
 0x5d2   : > { %v10626_v19 = vadd.f32 %v6903_v34, %v6850_v45  ;;  %7308 = vmatpush2.bf16.msra.mxu0 %v8146_v5  ;;  %v4445_v3 = vld [vmem:[#allocation10 + $0xcb8] sm:$0xff] }
 0x5d3   : > { %v6905_v38 = vpop.f32.mrf.mxu0  ;;  %7309 = vmatprep.subr.bf16.mxu0 %v8139_v15  ;;  %v4385_v54 = vld [vmem:[#allocation10 + $0xad8] sm:$0xff]  ;;  %v8347_v53 = vcombine.high %v4441_v36, %v4445_v3  ;;  %v8346_v22 = vcombine.low %v4441_v36, %v4445_v3 }
 0x5d4   : > { %7349 = vmatpush2.bf16.msra.mxu1 %v8322_v1  ;;  %v10628_v61 = vadd.f32 %v6905_v38, %v6852_v2  ;;  %v4389_v31 = vld [vmem:[#allocation10 + $0xaf8] sm:$0xff] }
 0x5d5   : > { %7350 = vmatprep.subr.bf16.mxu1 %v8315_v6  ;;  %v4433_v55 = vld [vmem:[#allocation10 + $0xc58] sm:$0xff]  ;;  %v8291_v43 = vcombine.high %v4385_v54, %v4389_v31  ;;  %v8290_v5 = vcombine.low %v4385_v54, %v4389_v31  ;;  %v7456_v31 = vld [vmem:[#allocation12 + $0x90] sm:$0xff] }
 0x5d6   : > { %7310 = vmatpush2.bf16.msra.mxu0 %v8138_v18  ;;  %v4437_v23 = vld [vmem:[#allocation10 + $0xc78] sm:$0xff] }
 0x5d7   : > { %8373 = vmatprep.subr.msk.bf16.mxu0 %vm6565_vm1, %v8363_v11  ;;  %v4377_v33 = vld [vmem:[#allocation10 + $0xa98] sm:$0xff]  ;;  %v8339_v42 = vcombine.high %v4433_v55, %v4437_v23  ;;  %v8338_v6 = vcombine.low %v4433_v55, %v4437_v23  ;;  %v7448_v11 = vld [vmem:[#allocation12 + $0x50] sm:$0xff] }
 0x5d8   : > { %7351 = vmatpush2.bf16.msra.mxu1 %v8314_v58  ;;  %v4425_v28 = vld [vmem:[#allocation10 + $0xc18] sm:$0xff] }
 0x5d9   : > { %7352 = vmatprep.subr.bf16.mxu1 %v8307_v4  ;;  %v6995_v59 = vpop.f32.mrf.mxu0  ;;  %7312 = vmatmul.mubr.bf16.vlgmr.msra.gmra.mxu0 %v10443_v56  ;;  %v4381_v56 = vld [vmem:[#allocation10 + $0xab8] sm:$0xff] }
 0x5da   : > { %7321 = vmatprep.mubr.bf16.mxu0 %v10452_v48  ;;  %7392 = vmatpush1.bf16.msra.mxu0 %v6585_v21  ;;  %v4429_v49 = vld [vmem:[#allocation10 + $0xc38] sm:$0xff]  ;;  %v8283_v46 = vcombine.high %v4377_v33, %v4381_v56  ;;  %v8282_v38 = vcombine.low %v4377_v33, %v4381_v56  ;;  %v10829_v56 = vmov 0.0  }
 0x5db   : > { %v6997_v44 = vpop.f32.mrf.mxu0  ;;  %7393 = vmatprep.subr.bf16.mxu0 %v8355_v37  ;;  %v4369_v25 = vld [vmem:[#allocation10 + $0xa58] sm:$0xff]  ;;  %v8331_v57 = vcombine.high %v4425_v28, %v4429_v49  ;;  %v8330_v0 = vcombine.low %v4425_v28, %v4429_v49 }
 0x5dc   : > { %7353 = vmatpush2.bf16.msra.mxu1 %v8306_v24  ;;  %v4373_v34 = vld [vmem:[#allocation10 + $0xa78] sm:$0xff] }
 0x5dd   : > { %7354 = vmatprep.subr.bf16.mxu1 %v8299_v30  ;;  %v6999_v9 = vpop.f32.mrf.mxu0  ;;  %v7441_v58 = vld [vmem:[#allocation12 + $0x18] sm:$0xff]  ;;  %v8274_v36 = vcombine.low %v4369_v25, %v4373_v34 }
 0x5de   : > { %7394 = vmatpush1.bf16.msra.mxu0 %v8354_v60  ;;  %v4361_v4 = vld [vmem:[#allocation10 + $0xa18] sm:$0xff] }
 0x5df   : > { %v6942_v63 = vpop.f32.mrf.mxu1  ;;  %v7001_v48 = vpop.f32.mrf.mxu0  ;;  %7395 = vmatprep.subr.bf16.mxu0 %v8347_v53  ;;  %v4365_v40 = vld [vmem:[#allocation10 + $0xa38] sm:$0xff] }
 0x5e0   : > { %v6943_v16 = vadd.f32 %v6942_v63, %v10614_v32  ;;  %7355 = vmatpush2.bf16.msra.mxu1 %v8298_v12  ;;  %v7449_v21 = vld [vmem:[#allocation12 + $0x58] sm:$0xff]  ;;  %v8266_v33 = vcombine.low %v4361_v4, %v4365_v40 }
 0x5e1   : > { %v6944_v45 = vpop.f32.mrf.mxu1  ;;  %7356 = vmatprep.subr.bf16.mxu1 %v8291_v43  ;;  %7322 = vmatmul.mubr.bf16.gmra.mxu0 %v10454_v17  ;;  %v7005_v32 = vpop.f32.mrf.mxu0  ;;  %v7440_v17 = vld [vmem:[#allocation12 + $0x10] sm:$0xff]  ;;  %v7457_v23 = vld [vmem:[#allocation12 + $0x98] sm:$0xff] }
 0x5e2   : > { %v6996_v15 = vadd.f32 %v6995_v59, %v6943_v16  ;;  %v6945_v1 = vadd.f32 %v6944_v45, %v10616_v14  ;;  %7396 = vmatpush1.bf16.msra.mxu0 %v8346_v22  ;;  %7417 = vmatprep.mubr.bf16.mxu0 %v9829_v13  ;;  %v8275_v14 = vcombine.high %v4369_v25, %v4373_v34 }
 0x5e3   : > { %v6946_v18 = vpop.f32.mrf.mxu1  ;;  %7397 = vmatprep.subr.bf16.mxu0 %v8339_v42  ;;  %v7007_v24 = vpop.f32.mrf.mxu0  ;;  %v7464_v42 = vld [vmem:[#allocation12 + $0xd0] sm:$0xff] }
 0x5e4   : > { %v6998_v20 = vadd.f32 %v6997_v44, %v6945_v1  ;;  %v6947_v2 = vadd.f32 %v6946_v18, %v10618_v26  ;;  %7357 = vmatpush2.bf16.msra.mxu1 %v8290_v5  ;;  %v7472_v26 = vmul.f32 %v7440_v17, %v6996_v15 }
 0x5e5   : > { %v6948_v10 = vpop.f32.mrf.mxu1  ;;  %7358 = vmatprep.subr.bf16.mxu1 %v8283_v46  ;;  %v7009_v43 = vpop.f32.mrf.mxu0  ;;  %v7465_v46 = vld [vmem:[#allocation12 + $0xd8] sm:$0xff] }
 0x5e6   : > { %v7000_v29 = vadd.f32 %v6999_v9, %v6947_v2  ;;  %v6949_v39 = vadd.f32 %v6948_v10, %v10620_v47  ;;  %7398 = vmatpush1.bf16.msra.mxu0 %v8338_v6  ;;  %v7473_v54 = vmul.f32 %v7441_v58, %v6998_v20  ;;  %v8267_v47 = vcombine.high %v4361_v4, %v4365_v40 }
 0x5e7   : > { %v6952_v37 = vpop.f32.mrf.mxu1  ;;  %7399 = vmatprep.subr.bf16.mxu0 %v8331_v57  ;;  %v7011_v45 = vpop.f32.mrf.mxu0 }
 0x5e8   : > { %v7480_v3 = vmul.f32 %v7448_v11, %v7000_v29  ;;  %v7002_v59 = vadd.f32 %v7001_v48, %v6949_v39  ;;  %v6953_v30 = vadd.f32 %v6952_v37, %v10622_v35  ;;  %7359 = vmatpush2.bf16.msra.mxu1 %v8282_v38 }
 0x5e9   : > { %v6954_v60 = vpop.f32.mrf.mxu1  ;;  %7360 = vmatprep.subr.bf16.mxu1 %v8275_v14 }
 0x5ea   : > { %v7520_v44 = vadd.f32 %v7480_v3, %v7472_v26  ;;  %v7481_v53 = vmul.f32 %v7449_v21, %v7002_v59  ;;  %v7006_v12 = vadd.f32 %v7005_v32, %v6953_v30  ;;  %v6955_v55 = vadd.f32 %v6954_v60, %v10624_v27  ;;  %7400 = vmatpush1.bf16.msra.mxu0 %v8330_v0 }
 0x5eb   : > { %v6956_v9 = vpop.f32.mrf.mxu1  ;;  %8466 = vmatprep.subr.bf16.mxu0 %v10829_v56 }
 0x5ec   : > { %v7529_v22 = vadd.f32 %v7481_v53, %v7473_v54  ;;  %v7488_v35 = vmul.f32 %v7456_v31, %v7006_v12  ;;  %v7008_v63 = vadd.f32 %v7007_v24, %v6955_v55  ;;  %v6957_v48 = vadd.f32 %v6956_v9, %v10626_v19  ;;  %7361 = vmatpush2.bf16.msra.mxu1 %v8274_v36 }
 0x5ed   : > { %v6958_v16 = vpop.f32.mrf.mxu1  ;;  %7362 = vmatprep.subr.bf16.mxu1 %v8267_v47  ;;  %8374 = vmatmul.mubr.msk.bf16.vlgmr.msra.gmra.mxu0 %vm6558_vm5, %v10494_v41 }
 0x5ee   : > { %v7521_v27 = vadd.f32 %v7520_v44, %v7488_v35  ;;  %v7489_v5 = vmul.f32 %v7457_v23, %v7008_v63  ;;  %v7010_v28 = vadd.f32 %v7009_v43, %v6957_v48  ;;  %v6959_v49 = vadd.f32 %v6958_v16, %v10628_v61  ;;  %7427 = vmatprep.mubr.bf16.mxu0 %v9829_v13 }
 0x5f0   : > { %v7530_v15 = vadd.f32 %v7529_v22, %v7489_v5  ;;  %v7496_v1 = vmul.f32 %v7464_v42, %v7010_v28  ;;  %v7012_v25 = vadd.f32 %v7011_v45, %v6959_v49  ;;  %7363 = vmatpush2.bf16.msra.mxu1 %v8266_v33 }
 0x5f2   : > { %v10648_v19 = vadd.f32 %v7521_v27, %v7496_v1  ;;  %v7497_v34 = vmul.f32 %v7465_v46, %v7012_v25 }
 0x5f3   : > { %7365 = vmatmul.mubr.bf16.vlgmr.msra.gmra.mxu1 %v10521_v50 }
 0x5f4   : > { %v10651_v6 = vadd.f32 %v7530_v15, %v7497_v34  ;;  %7374 = vmatprep.mubr.bf16.mxu1 %v10524_v51 }
 0x5f5   : > { %8375 = vmatmul.mubr.msk.bf16.gmra.mxu0 %vm6558_vm5, %v10505_v7 }
 0x5f6   : > { %8470 = vmatprep.mubr.msk.bf16.mxu0 %vm8919_vm4, %v10829_v56  ;;  %vm7610_vm4 = vcmask 261120  }
 0x5fb   : > { %7375 = vmatmul.mubr.bf16.gmra.mxu1 %v10530_v52 }
 0x619   : > { %v7048_v41 = vpop.f32.mrf.mxu0 }
 0x61b   : > { %v7050_v18 = vpop.f32.mrf.mxu0 }
 0x61d   : > { %v7052_v57 = vpop.f32.mrf.mxu0 }
 0x61f   : > { %v7101_v13 = vpop.f32.mrf.mxu1  ;;  %v7054_v50 = vpop.f32.mrf.mxu0 }
 0x620   : > { %v7102_v35 = vadd.f32 %v7101_v13, %v7048_v41  ;;  %v7450_v13 = vld [vmem:[#allocation12 + $0x60] sm:$0xff] }
 0x621   : > { %v7103_v61 = vpop.f32.mrf.mxu1  ;;  %v7058_v38 = vpop.f32.mrf.mxu0 }
 0x622   : > { %v7104_v27 = vadd.f32 %v7103_v61, %v7050_v18 }
 0x623   : > { %v7105_v32 = vpop.f32.mrf.mxu1  ;;  %v7060_v51 = vpop.f32.mrf.mxu0 }
 0x624   : > { %v7106_v33 = vadd.f32 %v7105_v32, %v7052_v57 }
 0x625   : > { %v7107_v20 = vpop.f32.mrf.mxu1  ;;  %v7062_v10 = vpop.f32.mrf.mxu0 }
 0x626   : > { %v7108_v63 = vadd.f32 %v7107_v20, %v7054_v50 }
 0x627   : > { %v7111_v2 = vpop.f32.mrf.mxu1  ;;  %v7064_v58 = vpop.f32.mrf.mxu0 }
 0x628   : > { %v7112_v48 = vadd.f32 %v7111_v2, %v7058_v38  ;;  %v7442_v38 = vld [vmem:[#allocation12 + $0x20] sm:$0xff] }
 0x629   : > { %v7113_v17 = vpop.f32.mrf.mxu1 }
 0x62a   : > { %v7114_v5 = vadd.f32 %v7113_v17, %v7060_v51  ;;  %v7451_v17 = vld [vmem:[#allocation12 + $0x68] sm:$0xff]  ;;  %v7458_v51 = vld [vmem:[#allocation12 + $0xa0] sm:$0xff] }
 0x62b   : > { %v7115_v11 = vpop.f32.mrf.mxu1 }
 0x62c   : > { %v7116_v28 = vadd.f32 %v7115_v11, %v7062_v10 }
 0x62d   : > { %v7117_v7 = vpop.f32.mrf.mxu1 }
 0x62e   : > { %v7118_v1 = vadd.f32 %v7117_v7, %v7064_v58 }
 0x633   : > { %v7207_v14 = vpop.f32.mrf.mxu1 }
 0x635   : > { %v7209_v29 = vpop.f32.mrf.mxu1 }
 0x637   : > { %v7211_v52 = vpop.f32.mrf.mxu1 }
 0x639   : > { %v7213_v40 = vpop.f32.mrf.mxu1 }
 0x63b   : > { %v7217_v21 = vpop.f32.mrf.mxu1 }
 0x63d   : > { %v7219_v24 = vpop.f32.mrf.mxu1 }
 0x63f   : > { %v7221_v26 = vpop.f32.mrf.mxu1 }
 0x641   : > { %v7223_v59 = vpop.f32.mrf.mxu1 }
 0x659   : > { %v7154_v39 = vpop.f32.mrf.mxu0 }
 0x65a   : > { %v7155_v49 = vadd.f32 %v7154_v39, %v7102_v35 }
 0x65b   : > { %v7156_v4 = vpop.f32.mrf.mxu0 }
 0x65c   : > { %v7157_v25 = vadd.f32 %v7156_v4, %v7104_v27  ;;  %v7208_v41 = vadd.f32 %v7207_v14, %v7155_v49  ;;  %v7459_v4 = vld [vmem:[#allocation12 + $0xa8] sm:$0xff] }
 0x65d   : > { %v7158_v0 = vpop.f32.mrf.mxu0 }
 0x65e   : > { %v7159_v42 = vadd.f32 %v7158_v0, %v7106_v33  ;;  %v7210_v11 = vadd.f32 %v7209_v29, %v7157_v25  ;;  %v7466_v0 = vld [vmem:[#allocation12 + $0xe0] sm:$0xff] }
 0x65f   : > { %v7160_v37 = vpop.f32.mrf.mxu0 }
 0x660   : > { %v7161_v45 = vadd.f32 %v7160_v37, %v7108_v63  ;;  %v7212_v34 = vadd.f32 %v7211_v52, %v7159_v42  ;;  %v7443_v52 = vld [vmem:[#allocation12 + $0x28] sm:$0xff]  ;;  %v7474_v37 = vmul.f32 %v7442_v38, %v7208_v41 }
 0x661   : > { %v7164_v36 = vpop.f32.mrf.mxu0 }
 0x662   : > { %v7165_v46 = vadd.f32 %v7164_v36, %v7112_v48  ;;  %v7214_v20 = vadd.f32 %v7213_v40, %v7161_v45  ;;  %v7482_v10 = vmul.f32 %v7450_v13, %v7212_v34 }
 0x663   : > { %v7166_v3 = vpop.f32.mrf.mxu0 }
 0x664   : > { %v7167_v32 = vadd.f32 %v7166_v3, %v7114_v5  ;;  %v7218_v50 = vadd.f32 %v7217_v21, %v7165_v46  ;;  %v7483_v36 = vmul.f32 %v7451_v17, %v7214_v20  ;;  %v7538_v33 = vadd.f32 %v7482_v10, %v7474_v37  ;;  %v7453_v10 = vld [vmem:[#allocation12 + $0x78] sm:$0xff] }
 0x665   : > { %v7168_v30 = vpop.f32.mrf.mxu0 }
 0x666   : > { %v7169_v57 = vadd.f32 %v7168_v30, %v7116_v28  ;;  %v7220_v7 = vadd.f32 %v7219_v24, %v7167_v32  ;;  %v7490_v14 = vmul.f32 %v7458_v51, %v7218_v50  ;;  %v7467_v30 = vld [vmem:[#allocation12 + $0xe8] sm:$0xff]  ;;  %v7452_v50 = vld [vmem:[#allocation12 + $0x70] sm:$0xff]  ;;  %v7514_v51 = vrot.slane %v10604_v8, 4 }
 0x667   : > { %v7170_v31 = vpop.f32.mrf.mxu0 }
 0x668   : > { %v7171_v2 = vadd.f32 %v7170_v31, %v7118_v1  ;;  %v7222_v58 = vadd.f32 %v7221_v26, %v7169_v57  ;;  %v7475_v31 = vmul.f32 %v7443_v52, %v7210_v11  ;;  %v7491_v35 = vmul.f32 %v7459_v4, %v7220_v7  ;;  %v7460_v7 = vld [vmem:[#allocation12 + $0xb0] sm:$0xff]  ;;  %v7445_v52 = vld [vmem:[#allocation12 + $0x38] sm:$0xff] }
 0x669   : > { %v7539_v24 = vadd.f32 %v7538_v33, %v7490_v14  ;;  %v7523_v11 = vrot.slane %v10648_v19, 4 }
 0x66a   : > { %v7224_v40 = vadd.f32 %v7223_v59, %v7171_v2  ;;  %v7498_v63 = vmul.f32 %v7466_v0, %v7222_v58  ;;  %v7547_v42 = vadd.f32 %v7483_v36, %v7475_v31 }
 0x66c   : > { %v7499_v26 = vmul.f32 %v7467_v30, %v7224_v40  ;;  %v7548_v49 = vadd.f32 %v7547_v42, %v7491_v35  ;;  %v7540_v45 = vadd.f32 %v7539_v24, %v7498_v63  ;;  %v7461_v40 = vld [vmem:[#allocation12 + $0xb8] sm:$0xff] }
 0x66e   : > { %v7549_v57 = vadd.f32 %v7548_v49, %v7499_v26 }
 0x673   : > { %v10659_v54 = vpop.f32.mrf.mxu1 }
 0x675   : > { %v10661_v60 = vpop.f32.mrf.mxu1 }
 0x677   : > { %v7264_v53 = vpop.f32.mrf.mxu1 }
 0x679   : > { %v10667_v23 = vpop.f32.mrf.mxu1 }
 0x67b   : > { %v10673_v22 = vpop.f32.mrf.mxu1 }
 0x67d   : > { %v10677_v15 = vpop.f32.mrf.mxu1 }
 0x67f   : > { %v10681_v61 = vpop.f32.mrf.mxu1 }
 0x681   : > { %v7276_v21 = vpop.f32.mrf.mxu1 }
 0x699   : > { %v7313_v47 = vpop.f32.mrf.mxu0 }
 0x69a   : > { %v7314_v27 = vadd.f32 %v7313_v47, %v10659_v54 }
 0x69b   : > { %v10663_v44 = vpop.f32.mrf.mxu0 }
 0x69c   : > { %v7316_v59 = vadd.f32 %v10663_v44, %v10661_v60  ;;  %v7505_v44 = vrot.slane %v10602_v62, 4 }
 0x69d   : > { %v7317_v12 = vpop.f32.mrf.mxu0 }
 0x69e   : > { %v7318_v28 = vadd.f32 %v7317_v12, %v7264_v53  ;;  %v7541_v12 = vrot.slane %v7540_v45, 4  ;;  %v7506_v63 = vadd.f32 %v7505_v44, %v10602_v62 }
 0x69f   : > { %v10665_v55 = vpop.f32.mrf.mxu0 }
 0x6a0   : > { %v7320_v34 = vadd.f32 %v10665_v55, %v10667_v23  ;;  %v7444_v55 = vld [vmem:[#allocation12 + $0x30] sm:$0xff] }
 0x6a1   : > { %v10669_v9 = vpop.f32.mrf.mxu0 }
 0x6a2   : > { %v7324_v54 = vadd.f32 %v10669_v9, %v10673_v22  ;;  %v7550_v9 = vrot.slane %v7549_v57, 4 }
 0x6a3   : > { %v10671_v43 = vpop.f32.mrf.mxu0 }
 0x6a4   : > { %v7326_v38 = vadd.f32 %v10671_v43, %v10677_v15  ;;  %v7532_v43 = vrot.slane %v10651_v6, 4  ;;  %v7542_v15 = vadd.f32 %v7541_v12, %v7540_v45  ;;  %v7469_v45 = vld [vmem:[#allocation12 + $0xf8] sm:$0xff] }
 0x6a5   : > { %v10675_v16 = vpop.f32.mrf.mxu0 }
 0x6a6   : > { %v7328_v58 = vadd.f32 %v10675_v16, %v10681_v61  ;;  %v7524_v16 = vadd.f32 %v7523_v11, %v10648_v19  ;;  %v7551_v61 = vadd.f32 %v7550_v9, %v7549_v57  ;;  %v7507_v19 = vrot.slane %v7506_v63, 2 }
 0x6a7   : > { %v10679_v56 = vpop.f32.mrf.mxu0 }
 0x6a8   : > { %v7330_v36 = vadd.f32 %v10679_v56, %v7276_v21  ;;  %v7515_v21 = vadd.f32 %v7514_v51, %v10604_v8  ;;  %v7508_v12 = vadd.f32 %v7507_v19, %v7506_v63 }
 0x6ad   : > { %v7419_v18 = vpop.f32.mrf.mxu0 }
 0x6af   : > { %v7421_v39 = vpop.f32.mrf.mxu0 }
 0x6b1   : > { %v7423_v3 = vpop.f32.mrf.mxu0 }
 0x6b3   : > { %v7366_v48 = vpop.f32.mrf.mxu1  ;;  %v7425_v29 = vpop.f32.mrf.mxu0 }
 0x6b4   : > { %v7367_v46 = vadd.f32 %v7366_v48, %v7314_v27 }
 0x6b5   : > { %v7368_v5 = vpop.f32.mrf.mxu1  ;;  %v7429_v25 = vpop.f32.mrf.mxu0 }
 0x6b6   : > { %v7369_v13 = vadd.f32 %v7368_v5, %v7316_v59  ;;  %v7420_v20 = vadd.f32 %v7419_v18, %v7367_v46  ;;  %v7533_v5 = vadd.f32 %v7532_v43, %v10651_v6 }
 0x6b7   : > { %v7370_v1 = vpop.f32.mrf.mxu1  ;;  %v7431_v60 = vpop.f32.mrf.mxu0 }
 0x6b8   : > { %v7371_v32 = vadd.f32 %v7370_v1, %v7318_v28  ;;  %v7422_v22 = vadd.f32 %v7421_v39, %v7369_v13  ;;  %v7476_v14 = vmul.f32 %v7444_v55, %v7420_v20  ;;  %v7543_v28 = vrot.slane %v7542_v15, 2 }
 0x6b9   : > { %v7372_v41 = vpop.f32.mrf.mxu1  ;;  %v7433_v30 = vpop.f32.mrf.mxu0 }
 0x6ba   : > { %v7424_v47 = vadd.f32 %v7423_v3, %v7371_v32  ;;  %v7373_v53 = vadd.f32 %v7372_v41, %v7320_v34  ;;  %v7477_v48 = vmul.f32 %v7445_v52, %v7422_v22  ;;  %v7552_v34 = vrot.slane %v7551_v61, 2 }
 0x6bb   : > { %v7376_v2 = vpop.f32.mrf.mxu1  ;;  %v7435_v49 = vpop.f32.mrf.mxu0  ;;  %v7516_v41 = vrot.slane %v7515_v21, 2 }
 0x6bc   : > { %v7426_v23 = vadd.f32 %v7425_v29, %v7373_v53  ;;  %v7377_v17 = vadd.f32 %v7376_v2, %v7324_v54  ;;  %v7484_v4 = vmul.f32 %v7452_v50, %v7424_v47  ;;  %v7468_v29 = vld [vmem:[#allocation12 + $0xf0] sm:$0xff]  ;;  %v7534_v54 = vrot.slane %v7533_v5, 2 }
 0x6bd   : > { %v7378_v18 = vpop.f32.mrf.mxu1  ;;  %v7544_v47 = vadd.f32 %v7543_v28, %v7542_v15  ;;  %v7553_v20 = vadd.f32 %v7552_v34, %v7551_v61 }
 0x6be   : > { %v7430_v0 = vadd.f32 %v7429_v25, %v7377_v17  ;;  %v7379_v37 = vadd.f32 %v7378_v18, %v7326_v38  ;;  %v7485_v39 = vmul.f32 %v7453_v10, %v7426_v23  ;;  %v7556_v24 = vadd.f32 %v7484_v4, %v7476_v14 }
 0x6bf   : > { %v7380_v3 = vpop.f32.mrf.mxu1  ;;  %v7525_v25 = vrot.slane %v7524_v16, 2  ;;  %v7535_v44 = vadd.f32 %v7534_v54, %v7533_v5  ;;  %v7545_v38 = vrot.slane %v7544_v47, 1  ;;  %v7509_v17 = vrot.slane %v7508_v12, 1 }
 0x6c0   : > { %v7492_v31 = vmul.f32 %v7460_v7, %v7430_v0  ;;  %v7432_v33 = vadd.f32 %v7431_v60, %v7379_v37  ;;  %v7381_v35 = vadd.f32 %v7380_v3, %v7328_v58  ;;  %v7565_v59 = vadd.f32 %v7485_v39, %v7477_v48  ;;  %v8645_v0 = vld [vmem:[%s10757_s9 + $0x8] sm:$0xff]   ;;  %v8646_v48 = vld [vmem:[%s10757_s9] sm:$0xff]  }
 0x6c1   : > { %v7382_v42 = vpop.f32.mrf.mxu1  ;;  %v7526_v6 = vadd.f32 %v7525_v25, %v7524_v16  ;;  %v7517_v60 = vadd.f32 %v7516_v41, %v7515_v21  ;;  %v7554_v11 = vrot.slane %v7553_v20, 1  ;;  %v7536_v7 = vrot.slane %v7535_v44, 1  ;;  %8467 = vmatpush3.bf16.msra.mxu0 %v8645_v0 }
 0x6c2   : > { %v7493_v26 = vmul.f32 %v7461_v40, %v7432_v33  ;;  %v7434_v27 = vadd.f32 %v7433_v30, %v7381_v35  ;;  %v7383_v56 = vadd.f32 %v7382_v42, %v7330_v36  ;;  %v7557_v46 = vadd.f32 %v7556_v24, %v7492_v31  ;;  %v7591_v24 = vld [vmem:[#allocation13] sm:$0x1] }
 0x6c3   : > { %v7527_v51 = vrot.slane %v7526_v6, 1  ;;  %v7518_v10 = vrot.slane %v7517_v60, 1  ;;  %v7546_v18 = vadd.f32 %v7545_v38, %v7544_v47  ;;  %v7510_v4 = vadd.f32 %v7509_v17, %v7508_v12 }
 0x6c4   : > { %v7500_v62 = vmul.f32 %v7468_v29, %v7434_v27  ;;  %v7436_v1 = vadd.f32 %v7435_v49, %v7383_v56  ;;  %v7566_v32 = vadd.f32 %v7565_v59, %v7493_v26  ;;  %v7555_v43 = vadd.f32 %v7554_v11, %v7553_v20 }
 0x6c5   : > { %v7528_v37 = vadd.f32 %v7527_v51, %v7526_v6  ;;  %v7519_v14 = vadd.f32 %v7518_v10, %v7517_v60  ;;  %v7537_v40 = vadd.f32 %v7536_v7, %v7535_v44  ;;  %v7574_v30 = vadd.f32 %v7546_v18, %v7510_v4 }
 0x6c6   : > { %v7558_v57 = vadd.f32 %v7557_v46, %v7500_v62  ;;  %v7501_v13 = vmul.f32 %v7469_v45, %v7436_v1  ;;  %v10830_v31 = vmov 0.0  }
 0x6c7   : > { %8468 = vmatprep.subr.bf16.mxu0 %v10830_v31  ;;  %v7575_v33 = vadd.f32 %v7555_v43, %v7519_v14 }
 0x6c8   : > { %v7559_v53 = vrot.slane %v7558_v57, 4  ;;  %v7567_v8 = vadd.f32 %v7566_v32, %v7501_v13  ;;  %8469 = vmatpush3.bf16.msra.mxu0 %v8646_v48 }
 0x6ca   : > { %v7560_v50 = vadd.f32 %v7559_v53, %v7558_v57  ;;  %v7568_v2 = vrot.slane %v7567_v8, 4 }
 0x6cc   : > { %v7561_v55 = vrot.slane %v7560_v50, 2  ;;  %v7569_v23 = vadd.f32 %v7568_v2, %v7567_v8 }
 0x6ce   : > { %v7562_v9 = vadd.f32 %v7561_v55, %v7560_v50  ;;  %v7570_v22 = vrot.slane %v7569_v23, 2 }
 0x6d0   : > { %v7563_v58 = vrot.slane %v7562_v9, 1  ;;  %v7571_v52 = vadd.f32 %v7570_v22, %v7569_v23 }
 0x6d2   : > { %v7564_v15 = vadd.f32 %v7563_v58, %v7562_v9  ;;  %v7572_v36 = vrot.slane %v7571_v52, 1 }
 0x6d4   : > { %v7573_v3 = vadd.f32 %v7572_v36, %v7571_v52  ;;  %v7576_v39 = vadd.f32 %v7564_v15, %v7528_v37 }
 0x6d6   : > { %v7577_v35 = vadd.f32 %v7573_v3, %v7537_v40  ;;  %v7578_v63 = vadd.f32 %v7576_v39, %v7574_v30 }
 0x6d8   : > { %v7579_v16 = vadd.f32 %v7577_v35, %v7575_v33 }
 0x6da   : > { %v7580_v61 = vadd.f32 %v7579_v16, %v7578_v63 }
 0x6dc   : > { %7582 = vrot.lane.b32.xlu0 %v7580_v61, %s8921_s25 }
 0x74e   : > { %v7583_v29 = vpop.permute.xlu0 %7582 }
 0x74f   : > { %v7585_v42 = vadd.f32 %v7583_v29, %v7580_v61 }
 0x751   : > { %7587 = vrot.lane.b32.xlu1 %v7585_v42, %s8909_s29  ;;  %s434_s29 = sand.u32 1, %s8876_s14  }
 0x752   : > { %s435_s21 = scalar_lea.vmem [#allocation15], %s434_s29  ;;  %s7668_s19 = scalar_lea.sflag [#allocation6], %s434_s29 }
 0x753   : > { %s7680_s30 = sshll.u32 %s435_s21, 4  ;;  %s7681_s30 = int_to_ptr.vmem [resolvable:$true] %s7680_s30 }
 0x754   : > { %s8808_s18 = scalar_lea.vmem %s7681_s30, 16  ;;  %p8815_p5 = scmp.lt.s32.totalorder %s7681_s30, %s8813_s20 }
 0x755   : > { %p8809_p7 = scmp.ne.s32.totalorder %s7681_s30, %s8808_s18  ;;  %p8816_p6 = scmp.lt.s32.totalorder %s8814_s17, %s8808_s18 }
 0x757   : > { %p8810_p8 = pnand %p8809_p7, %p10831_p9  ;;  %p8817_p13 = por %p8816_p6, %p8815_p5 }
 0x759   : > { %p8811_p11 = pneg %p8810_p8 }
 0x75b   : > { %p8818_p10 = pnand %p8817_p13, %p8811_p11 }
 0x7c3   : > { %v7588_v26 = vpop.permute.xlu1 %7587 }
 0x7c4   : > { %v7590_v27 = vadd.f32 %v7588_v26, %v7585_v42 }
 0x7c6   : > { %v7592_v56 = vadd.f32 %v7591_v24, %v7590_v27 }
 0x7c8   : > { %v7593_v21 = vpack.c.bf16 %v7592_v56, %v7592_v56 }
 0x7ca   : > { %8471 = vmatmul.mubr.msk.bf16.vlgmr.msra.gmra.mxu0 %vm7610_vm4, %v7593_v21 }
 0x88a   : > { %v7648_v5 = vpop.f32.mrf.mxu0 }
 0x88b   : > { %v7655_v28 = vsel %vm7654_vm6, %v7648_v5, -inf }
 0x88c   : > { %7656 = vmax.xlane.f32.xlu0 %v7655_v28  ;;  %v8472_v49 = vpop.f32.mrf.mxu0 }
 0x88e   : > { %v7651_v45 = vpop.f32.mrf.mxu0 }
 0x890   : > { %v8473_v59 = vpop.f32.mrf.mxu0 }
 0x915   : > { %v7657_v46 = vpop.xlane.xlu0 %7656 }
 0x916   : > { %v7658_v62 = vsub.f32 %v7648_v5, %v7657_v46 }
 0x918   : > { %v7659_v1 = vmul.f32 1.442695, %v7658_v62 }
 0x91a   : > { %8647 = vpow2.f32 %v7659_v1 }
 0x927   : > { %v8648_v19 = vpop.eup %8647 }
 0x928   : > { %v7661_v25 = vsel %vm7654_vm6, %v8648_v19, 0.0 }
 0x929   : > { %7662 = vadd.xlane.f32.xlu1 %v7661_v25 }
 0x9b2   : > { %v7663_v34 = vpop.xlane.xlu1 %7662 }
 0x9b3   : > { %8649 = vrcp.f32 %v7663_v34 }
 0x9c0   : > { %v8650_v32 = vpop.eup %8649 }
 0x9c1   : > { %v7665_v57 = vmul.f32 %v8650_v32, %v8648_v19 }
 0x9c3   : > { %7666 = vst.msk [vmem:[%s435_s21] sm:$0x1] %vm7654_vm6, %v7665_v57 }
 0x9c4   : > { %8821 = shalt.err (!%p8818_p10)
}
 0x9c5   : > { %s8822_s25 = scalar_lea.hbm %s7678_s26, 16  ;;  %s8826_s29 = scalar_lea.hbm %s10758_s10, 32 }
 0x9c6   : > { %p8823_p0 = scmp.ne.s32.totalorder %s7678_s26, %s8822_s25  ;;  %p8827_p3 = scmp.lt.s32.totalorder %s7678_s26, %s10758_s10 }
 0x9c7   : > { %p8828_p2 = scmp.lt.s32.totalorder %s8826_s29, %s8822_s25 }
 0x9c8   : > { %p8824_p1 = pnand %p8823_p0, %p10831_p9 }
 0x9c9   : > { %p8829_p4 = por %p8828_p2, %p8827_p3 }
 0x9ca   : > { %p8825_p12 = pneg %p8824_p1 }
 0x9cc   : > { %p8830_p7 = pnand %p8829_p4, %p8825_p12 }
 0x9ce   : > { %8833 = shalt.err (!%p8830_p7)
}
 0x9cf   : > { %8498 = dma.vmem_to_hbm [thread:$0]  (%p10831_p9), %s7681_s30, 16, %s7678_s26, %s7668_s19  }
 0x9d0 PF: > { %p8535_p8 = scmp.ge.s32.totalorder %s8884_s16, 2  ;;  %s7692_s27 = sand.u32 1, %s8872_s13  }
 0x9d1   : > { %p10832_p11 = scmp.ne.s32.totalorder %s10773_s24, 0  ;;  %s7693_s12 = scalar_lea.sflag [#allocation6], %s7692_s27 }
 0x9d3   : > { %p8520_p5 = pnand %p8535_p8, %p10832_p11 }
 0x9d5   : > { %p8521_p6 = pneg %p8520_p5 }
 0x9d7   : > { %8867 = dma.done.wait (%p8521_p6), %s7693_s12, 16  }
 0x9d8   : > { %8869 = vsyncadd (%p8521_p6), %s7693_s12, 4294967280  ;;  %s10833_s16 = sld [smem:[#allocation22_spill]]  ;;  %s10836_s13 = smov %s8876_s14 }
 0x9d9   : > { %s10834_s18 = sld [smem:[#allocation21_spill]] }
 0x9da   : > { %s10835_s15 = sld [smem:[#allocation23_spill]] }
 0x9de   : > { %p24_p13 = scmp.ge.s32.totalorder %s10833_s16, 4  }
 0x9df   : > { %s10837_s14 = smov %s10834_s18 }
 0x9e0   :  { %26 = sbr.rel (!%p24_p13) target bundleno = 7 (0x7), region = 120 }
 0x9e5   :  { %7697 = vsyncpa [#allocation5], 1 }
 0x9e6   :  { %7699 = vsyncpa [#allocation5 + $0x1], 1 }
 0x9e7   :  { %7700 = vsyncpa [#allocation8], 1 }
 0x9e8   :  { %7701 = vsyncpa [#allocation11], 1 }
 0x9e9   :  { %7702 = vsyncpa [#allocation14], 1 }
 0x9ea   :  { %7703 = vsyncpa [#allocation6], 1 }
 0x9eb   :  { %7705 = vsyncpa [#allocation6 + $0x1], 1 }

</bundles_post_ra>
